<compile_context>
chip_gen: v6e
topology: v6e:2x2x1
jax: 0.10.0
libtpu: 0.0.40
codegen_flags: <defaults>
</compile_context>

<pallas_src>
import jax
import jax.numpy as jnp
from jax.experimental import pallas as pl
from jax.experimental.pallas import tpu as pltpu

INCHNLS = 9      # in_chans
EMB = 16         # embed_dim
WBSET = 3        # wbset_num
HEADS = 2
HEAD_DIM = EMB // HEADS
MLP_HIDDEN = 32
EPS = 1e-5
LEAKY_SLOPE = 0.01

# Order in which the (channel-major) weights are passed to the kernel.
W_ORDER = ['w_in_t', 'b_in', 'g1', 'be1', 'wqkv_t', 'bqkv', 'wo_t', 'bo',
           'g2', 'be2', 'w1_t', 'b1', 'w2_t', 'b2',
           'w_out_t', 'b_out', 'w_cha_t', 'b_cha']


def _rep_spec(shape):
    """Full-array block, replicated across the batch grid."""
    nd = len(shape)
    return pl.BlockSpec(shape, lambda b, _nd=nd: (0,) * _nd)


# ---------------------------------------------------------------------------
# Fused kernel: input projection -> transformer block -> output heads.
# One grid step == one batch element; everything lives in VMEM.
# Data layout inside the kernel is channel-major: [C, T] with T on lanes.
# ---------------------------------------------------------------------------
def histnet_kernel(x_ref, w_in_ref, b_in_ref,
                   g1_ref, be1_ref, wqkv_ref, bqkv_ref, wo_ref, bo_ref,
                   g2_ref, be2_ref, w1_ref, b1_ref, w2_ref, b2_ref,
                   wout_ref, bout_ref, wcha_ref, bcha_ref,
                   out_ref, cha_ref, feat_ref):
    x = x_ref[0]                                            # [Cin, T]
    T = x.shape[-1]

    # ---- input projection (1x1 conv equivalent) + LeakyReLU ----
    f0 = jnp.dot(w_in_ref[...], x,
                 preferred_element_type=jnp.float32) + b_in_ref[...]     # [EMB, T]
    f0 = jnp.where(f0 >= 0.0, f0, LEAKY_SLOPE * f0)

    # ---- LayerNorm 1 (over the channel axis) ----
    mu = jnp.mean(f0, axis=0, keepdims=True)
    var = jnp.mean((f0 - mu) ** 2, axis=0, keepdims=True)
    xn = (f0 - mu) * jax.lax.rsqrt(var + EPS) * g1_ref[...] + be1_ref[...]

    # ---- QKV projection (bf16 MXU operands, f32 accumulation) ----
    qkv = jnp.dot(wqkv_ref[...].astype(jnp.bfloat16), xn.astype(jnp.bfloat16),
                  preferred_element_type=jnp.float32) + bqkv_ref[...]    # [3*EMB, T]
    # Q in token-major [T, EMB] so the score matmul is a plain (untransposed)
    # MXU matmul; attention scale is already folded into the Q weight rows.
    q_tok = jnp.transpose(qkv[0:EMB]).astype(jnp.bfloat16)               # [T, EMB]
    k = qkv[EMB:2 * EMB]                                                 # [EMB, T]
    v = qkv[2 * EMB:3 * EMB]                                             # [EMB, T]
    wo = wo_ref[...]                                                     # [EMB, EMB]

    attn = jnp.zeros((EMB, T), jnp.float32)
    for h in range(HEADS):                                  # static unrolled loop
        sl = slice(h * HEAD_DIM, (h + 1) * HEAD_DIM)
        qh = q_tok[:, sl]                                   # [T, hd]  bf16
        kh = k[sl].astype(jnp.bfloat16)                     # [hd, T]
        vh = v[sl].astype(jnp.bfloat16)                     # [hd, T]

        s = jnp.dot(qh, kh, preferred_element_type=jnp.float32)          # [Tq, Tk]
        p = jnp.exp(s - jnp.max(s, axis=-1, keepdims=True))
        p = p * pl.reciprocal(jnp.sum(p, axis=-1, keepdims=True), approx=True)

        # oh[d, i] = sum_j vh[d, j] * p[i, j]   (channel-major head output)
        oh = jax.lax.dot_general(vh, p.astype(jnp.bfloat16),
                                 (((1,), (1,)), ((), ())),
                                 preferred_element_type=jnp.float32)     # [hd, Tq]
        # concat(heads) @ Wo  ==  sum_h  Wo_t[:, head_slice] @ oh_h
        attn = attn + jnp.dot(wo[:, sl], oh,
                              preferred_element_type=jnp.float32)        # [EMB, T]
    attn = attn + bo_ref[...]
    x1 = f0 + attn                                          # [EMB, T]

    # ---- LayerNorm 2 + feed-forward (TwoDCFF approximated as channel FF) ----
    mu2 = jnp.mean(x1, axis=0, keepdims=True)
    var2 = jnp.mean((x1 - mu2) ** 2, axis=0, keepdims=True)
    xn2 = (x1 - mu2) * jax.lax.rsqrt(var2 + EPS) * g2_ref[...] + be2_ref[...]
    h1 = jnp.dot(w1_ref[...].astype(jnp.bfloat16), xn2.astype(jnp.bfloat16),
                 preferred_element_type=jnp.float32) + b1_ref[...]       # [HID, T]
    h1 = jax.nn.gelu(h1, approximate=True)
    h2 = jnp.dot(w2_ref[...].astype(jnp.bfloat16), h1.astype(jnp.bfloat16),
                 preferred_element_type=jnp.float32) + b2_ref[...]       # [EMB, T]
    feat = x1 + h2                                          # [EMB, T]
    feat_ref[0] = feat

    # ---- output heads (lane-dense last dim = T) ----
    out_ref[0] = (jnp.dot(wout_ref[...], feat,
                          preferred_element_type=jnp.float32)
                  + bout_ref[...])                          # [WBSET, T]
    # pooled head:  W_cha @ mean_T(feat)  ==  mean_T(W_cha @ feat)   (linear)
    cha_full = jnp.dot(wcha_ref[...], feat,
                       preferred_element_type=jnp.float32)  # [WBSET, T]
    cha_ref[0] = jnp.mean(cha_full, axis=-1, keepdims=True) + bcha_ref[...]  # [WBSET, 1]


# ---------------------------------------------------------------------------
# Parameters (deterministic, synthetic) — stored channel-major, with the
# attention scale folded into the Q rows of W_qkv (and its bias) at init time.
# ---------------------------------------------------------------------------
def init_params(key):
    ks = jax.random.split(key, 8)
    s = 0.02
    scale = 1.0 / (HEAD_DIM ** 0.5)

    w_in = jax.random.normal(ks[0], (INCHNLS, EMB)) * s
    wqkv = jax.random.normal(ks[1], (EMB, 3 * EMB)) * s
    wo = jax.random.normal(ks[2], (EMB, EMB)) * s
    w1 = jax.random.normal(ks[3], (EMB, MLP_HIDDEN)) * s
    w2 = jax.random.normal(ks[4], (MLP_HIDDEN, EMB)) * s
    w_out = jax.random.normal(ks[5], (EMB, WBSET)) * s
    w_cha = jax.random.normal(ks[6], (EMB, WBSET)) * s

    wqkv_t = wqkv.T                                # [3*EMB, EMB]
    wqkv_t = wqkv_t.at[:EMB].multiply(scale)       # fold 1/sqrt(hd) into Q rows
    bqkv = jnp.zeros((3 * EMB, 1))                 # (Q-bias rows would be scaled too)

    p = {
        'w_in_t':  w_in.T,                         # [EMB, Cin]
        'b_in':    jnp.zeros((EMB, 1)),
        'g1':      jnp.ones((EMB, 1)),
        'be1':     jnp.zeros((EMB, 1)),
        'wqkv_t':  wqkv_t,                         # [3*EMB, EMB]
        'bqkv':    bqkv,                           # [3*EMB, 1]
        'wo_t':    wo.T,                           # [EMB, EMB]
        'bo':      jnp.zeros((EMB, 1)),
        'g2':      jnp.ones((EMB, 1)),
        'be2':     jnp.zeros((EMB, 1)),
        'w1_t':    w1.T,                           # [MLP_HIDDEN, EMB]
        'b1':      jnp.zeros((MLP_HIDDEN, 1)),
        'w2_t':    w2.T,                           # [EMB, MLP_HIDDEN]
        'b2':      jnp.zeros((EMB, 1)),
        'w_out_t': w_out.T,                        # [WBSET, EMB]
        'b_out':   jnp.zeros((WBSET, 1)),
        'w_cha_t': w_cha.T,                        # [WBSET, EMB]
        'b_cha':   jnp.zeros((WBSET, 1)),
    }
    return {k: v.astype(jnp.float32) for k, v in p.items()}


# ---------------------------------------------------------------------------
# Wrapper: one fused pallas_call over the batch; only free reshapes outside.
# ---------------------------------------------------------------------------
@jax.jit
def histnet_forward(x_nchw, params):
    B, C, H, W = x_nchw.shape
    T = H * W
    x_cm = x_nchw.reshape(B, C, T)                 # channel-major, no transpose

    in_specs = ([pl.BlockSpec((1, INCHNLS, T), lambda b: (b, 0, 0))]
                + [_rep_spec(params[n].shape) for n in W_ORDER])
    out_specs = (pl.BlockSpec((1, WBSET, T), lambda b: (b, 0, 0)),
                 pl.BlockSpec((1, WBSET, 1), lambda b: (b, 0, 0)),
                 pl.BlockSpec((1, EMB, T), lambda b: (b, 0, 0)))
    out_shape = (jax.ShapeDtypeStruct((B, WBSET, T), jnp.float32),
                 jax.ShapeDtypeStruct((B, WBSET, 1), jnp.float32),
                 jax.ShapeDtypeStruct((B, EMB, T), jnp.float32))

    out_cm, cha_cm, feat_cm = pl.pallas_call(
        histnet_kernel,
        grid=(B,),
        in_specs=in_specs,
        out_specs=out_specs,
        out_shape=out_shape,
        compiler_params=pltpu.CompilerParams(
            dimension_semantics=("parallel",)),     # megacore batch split on v7x
    )(x_cm, *[params[n] for n in W_ORDER])

    out_hist = out_cm.reshape(B, WBSET, H, W)       # already NCHW-ordered
    cha_hist = cha_cm[:, :, 0]                      # [B, wbset]
    hist_feature = feat_cm.reshape(B, EMB, H, W)    # already NCHW-ordered
    return out_hist, cha_hist, hist_feature


if __name__ == "__main__":
    key = jax.random.PRNGKey(0)
    B, H, W = 2, 16, 16
    x = jax.random.normal(key, (B, INCHNLS, H, W), dtype=jnp.float32)
    params = init_params(jax.random.PRNGKey(1))

    out_hist, cha_hist, hist_feature = histnet_forward(x, params)
    jax.block_until_ready((out_hist, cha_hist, hist_feature))

    assert out_hist.shape == (B, WBSET, H, W)
    assert cha_hist.shape == (B, WBSET)
    assert hist_feature.shape == (B, EMB, H, W)
    assert bool(jnp.all(jnp.isfinite(out_hist)))
    assert bool(jnp.all(jnp.isfinite(cha_hist)))
    assert bool(jnp.all(jnp.isfinite(hist_feature)))
    print("KERNEL_OK")
</pallas_src>

<mosaic_0001>
module attributes {stable_mosaic.version = 11 : i64} {
  func.func @histnet_kernel(%arg0: i32, %arg1: memref<1x9x256xf32, #tpu.memory_space<vmem>>, %arg2: memref<16x9xf32, #tpu.memory_space<vmem>>, %arg3: memref<16x1xf32, #tpu.memory_space<vmem>>, %arg4: memref<16x1xf32, #tpu.memory_space<vmem>>, %arg5: memref<16x1xf32, #tpu.memory_space<vmem>>, %arg6: memref<48x16xf32, #tpu.memory_space<vmem>>, %arg7: memref<48x1xf32, #tpu.memory_space<vmem>>, %arg8: memref<16x16xf32, #tpu.memory_space<vmem>>, %arg9: memref<16x1xf32, #tpu.memory_space<vmem>>, %arg10: memref<16x1xf32, #tpu.memory_space<vmem>>, %arg11: memref<16x1xf32, #tpu.memory_space<vmem>>, %arg12: memref<32x16xf32, #tpu.memory_space<vmem>>, %arg13: memref<32x1xf32, #tpu.memory_space<vmem>>, %arg14: memref<16x32xf32, #tpu.memory_space<vmem>>, %arg15: memref<16x1xf32, #tpu.memory_space<vmem>>, %arg16: memref<3x16xf32, #tpu.memory_space<vmem>>, %arg17: memref<3x1xf32, #tpu.memory_space<vmem>>, %arg18: memref<3x16xf32, #tpu.memory_space<vmem>>, %arg19: memref<3x1xf32, #tpu.memory_space<vmem>>, %arg20: memref<1x3x256xf32, #tpu.memory_space<vmem>>, %arg21: memref<1x3x1xf32, #tpu.memory_space<vmem>>, %arg22: memref<1x16x256xf32, #tpu.memory_space<vmem>>) attributes {dimension_semantics = [#tpu.dimension_semantics<parallel>], iteration_bounds = array<i64: 2>, scalar_prefetch = 0 : i64, scratch_operands = 0 : i64, tpu.core_type = #tpu.core_type<tc>, window_params = [{transform_indices = @transform_0, window_bounds = array<i64: 1, 9, 256>}, {pipeline_mode = #tpu.pipeline_mode<synchronous>, transform_indices = @transform_1, window_bounds = array<i64: 16, 9>}, {pipeline_mode = #tpu.pipeline_mode<synchronous>, transform_indices = @transform_2, window_bounds = array<i64: 16, 1>}, {pipeline_mode = #tpu.pipeline_mode<synchronous>, transform_indices = @transform_3, window_bounds = array<i64: 16, 1>}, {pipeline_mode = #tpu.pipeline_mode<synchronous>, transform_indices = @transform_4, window_bounds = array<i64: 16, 1>}, {pipeline_mode = #tpu.pipeline_mode<synchronous>, transform_indices = @transform_5, window_bounds = array<i64: 48, 16>}, {pipeline_mode = #tpu.pipeline_mode<synchronous>, transform_indices = @transform_6, window_bounds = array<i64: 48, 1>}, {pipeline_mode = #tpu.pipeline_mode<synchronous>, transform_indices = @transform_7, window_bounds = array<i64: 16, 16>}, {pipeline_mode = #tpu.pipeline_mode<synchronous>, transform_indices = @transform_8, window_bounds = array<i64: 16, 1>}, {pipeline_mode = #tpu.pipeline_mode<synchronous>, transform_indices = @transform_9, window_bounds = array<i64: 16, 1>}, {pipeline_mode = #tpu.pipeline_mode<synchronous>, transform_indices = @transform_10, window_bounds = array<i64: 16, 1>}, {pipeline_mode = #tpu.pipeline_mode<synchronous>, transform_indices = @transform_11, window_bounds = array<i64: 32, 16>}, {pipeline_mode = #tpu.pipeline_mode<synchronous>, transform_indices = @transform_12, window_bounds = array<i64: 32, 1>}, {pipeline_mode = #tpu.pipeline_mode<synchronous>, transform_indices = @transform_13, window_bounds = array<i64: 16, 32>}, {pipeline_mode = #tpu.pipeline_mode<synchronous>, transform_indices = @transform_14, window_bounds = array<i64: 16, 1>}, {pipeline_mode = #tpu.pipeline_mode<synchronous>, transform_indices = @transform_15, window_bounds = array<i64: 3, 16>}, {pipeline_mode = #tpu.pipeline_mode<synchronous>, transform_indices = @transform_16, window_bounds = array<i64: 3, 1>}, {pipeline_mode = #tpu.pipeline_mode<synchronous>, transform_indices = @transform_17, window_bounds = array<i64: 3, 16>}, {pipeline_mode = #tpu.pipeline_mode<synchronous>, transform_indices = @transform_18, window_bounds = array<i64: 3, 1>}, {transform_indices = @transform_19, window_bounds = array<i64: 1, 3, 256>}, {transform_indices = @transform_20, window_bounds = array<i64: 1, 3, 1>}, {transform_indices = @transform_21, window_bounds = array<i64: 1, 16, 256>}]} {
    %c0 = arith.constant 0 : index
    %c0_0 = arith.constant 0 : index
    %c0_1 = arith.constant 0 : index
    %0 = vector.load %arg1[%c0, %c0_0, %c0_1] : memref<1x9x256xf32, #tpu.memory_space<vmem>>, vector<1x9x256xf32>
    %1 = vector.shape_cast %0 : vector<1x9x256xf32> to vector<9x256xf32>
    %c0_2 = arith.constant 0 : index
    %c0_3 = arith.constant 0 : index
    %2 = vector.load %arg2[%c0_2, %c0_3] : memref<16x9xf32, #tpu.memory_space<vmem>>, vector<16x9xf32>
    %cst = arith.constant dense<0.000000e+00> : vector<16x256xf32>
    %3 = tpu.matmul %2, %1, %cst {dimension_numbers = #tpu.dot_dimension_numbers<[1], [0], [0], [1], [0, 0, 1, 1], [], []>} : vector<16x9xf32>, vector<9x256xf32>, vector<16x256xf32> -> vector<16x256xf32>
    %c0_4 = arith.constant 0 : index
    %c0_5 = arith.constant 0 : index
    %4 = vector.load %arg3[%c0_4, %c0_5] : memref<16x1xf32, #tpu.memory_space<vmem>>, vector<16x1xf32>
    %5 = vector.broadcast %4 : vector<16x1xf32> to vector<16x256xf32>
    %6 = arith.addf %3, %5 : vector<16x256xf32>
    %cst_6 = arith.constant 0.000000e+00 : f32
    %7 = vector.broadcast %cst_6 : f32 to vector<16x256xf32>
    %8 = arith.cmpf oge, %6, %7 : vector<16x256xf32>
    %cst_7 = arith.constant 0.00999999977 : f32
    %9 = vector.broadcast %cst_7 : f32 to vector<16x256xf32>
    %10 = arith.mulf %9, %6 : vector<16x256xf32>
    %11 = arith.select %8, %6, %10 : vector<16x256xi1>, vector<16x256xf32>
    %cst_8 = arith.constant dense<0.000000e+00> : vector<256xf32>
    %12 = vector.multi_reduction <add>, %11, %cst_8 [0] : vector<16x256xf32> to vector<256xf32>
    %13 = vector.shape_cast %12 : vector<256xf32> to vector<1x256xf32>
    %cst_9 = arith.constant 1.600000e+01 : f32
    %14 = vector.broadcast %cst_9 : f32 to vector<1x256xf32>
    %15 = arith.divf %13, %14 : vector<1x256xf32>
    %16 = vector.broadcast %15 : vector<1x256xf32> to vector<16x256xf32>
    %17 = arith.subf %11, %16 : vector<16x256xf32>
    %18 = arith.mulf %17, %17 : vector<16x256xf32>
    %cst_10 = arith.constant dense<0.000000e+00> : vector<256xf32>
    %19 = vector.multi_reduction <add>, %18, %cst_10 [0] : vector<16x256xf32> to vector<256xf32>
    %20 = vector.shape_cast %19 : vector<256xf32> to vector<1x256xf32>
    %cst_11 = arith.constant 1.600000e+01 : f32
    %21 = vector.broadcast %cst_11 : f32 to vector<1x256xf32>
    %22 = arith.divf %20, %21 : vector<1x256xf32>
    %23 = vector.broadcast %15 : vector<1x256xf32> to vector<16x256xf32>
    %24 = arith.subf %11, %23 : vector<16x256xf32>
    %cst_12 = arith.constant 9.99999974E-6 : f32
    %25 = vector.broadcast %cst_12 : f32 to vector<1x256xf32>
    %26 = arith.addf %22, %25 : vector<1x256xf32>
    %27 = math.rsqrt %26 : vector<1x256xf32>
    %28 = vector.broadcast %27 : vector<1x256xf32> to vector<16x256xf32>
    %29 = arith.mulf %24, %28 : vector<16x256xf32>
    %c0_13 = arith.constant 0 : index
    %c0_14 = arith.constant 0 : index
    %30 = vector.load %arg4[%c0_13, %c0_14] : memref<16x1xf32, #tpu.memory_space<vmem>>, vector<16x1xf32>
    %31 = vector.broadcast %30 : vector<16x1xf32> to vector<16x256xf32>
    %32 = arith.mulf %29, %31 : vector<16x256xf32>
    %c0_15 = arith.constant 0 : index
    %c0_16 = arith.constant 0 : index
    %33 = vector.load %arg5[%c0_15, %c0_16] : memref<16x1xf32, #tpu.memory_space<vmem>>, vector<16x1xf32>
    %34 = vector.broadcast %33 : vector<16x1xf32> to vector<16x256xf32>
    %35 = arith.addf %32, %34 : vector<16x256xf32>
    %c0_17 = arith.constant 0 : index
    %c0_18 = arith.constant 0 : index
    %36 = vector.load %arg6[%c0_17, %c0_18] : memref<48x16xf32, #tpu.memory_space<vmem>>, vector<48x16xf32>
    %37 = arith.truncf %36 : vector<48x16xf32> to vector<48x16xbf16>
    %38 = arith.truncf %35 : vector<16x256xf32> to vector<16x256xbf16>
    %cst_19 = arith.constant dense<0.000000e+00> : vector<48x256xf32>
    %39 = tpu.matmul %37, %38, %cst_19 {dimension_numbers = #tpu.dot_dimension_numbers<[1], [0], [0], [1], [0, 0, 1, 1], [], []>} : vector<48x16xbf16>, vector<16x256xbf16>, vector<48x256xf32> -> vector<48x256xf32>
    %c0_20 = arith.constant 0 : index
    %c0_21 = arith.constant 0 : index
    %40 = vector.load %arg7[%c0_20, %c0_21] : memref<48x1xf32, #tpu.memory_space<vmem>>, vector<48x1xf32>
    %41 = vector.broadcast %40 : vector<48x1xf32> to vector<48x256xf32>
    %42 = arith.addf %39, %41 : vector<48x256xf32>
    %43 = vector.extract_strided_slice %42 {offsets = [0, 0], sizes = [16, 256], strides = [1, 1]} : vector<48x256xf32> to vector<16x256xf32>
    %44 = tpu.transpose %43, [1, 0] : vector<16x256xf32> -> vector<256x16xf32>
    %45 = arith.truncf %44 : vector<256x16xf32> to vector<256x16xbf16>
    %46 = vector.extract_strided_slice %42 {offsets = [16, 0], sizes = [16, 256], strides = [1, 1]} : vector<48x256xf32> to vector<16x256xf32>
    %47 = vector.extract_strided_slice %42 {offsets = [32, 0], sizes = [16, 256], strides = [1, 1]} : vector<48x256xf32> to vector<16x256xf32>
    %c0_22 = arith.constant 0 : index
    %c0_23 = arith.constant 0 : index
    %48 = vector.load %arg8[%c0_22, %c0_23] : memref<16x16xf32, #tpu.memory_space<vmem>>, vector<16x16xf32>
    %cst_24 = arith.constant 0.000000e+00 : f32
    %49 = vector.broadcast %cst_24 : f32 to vector<16x256xf32>
    %50 = vector.extract_strided_slice %45 {offsets = [0, 0], sizes = [256, 8], strides = [1, 1]} : vector<256x16xbf16> to vector<256x8xbf16>
    %51 = vector.extract_strided_slice %46 {offsets = [0, 0], sizes = [8, 256], strides = [1, 1]} : vector<16x256xf32> to vector<8x256xf32>
    %52 = arith.truncf %51 : vector<8x256xf32> to vector<8x256xbf16>
    %53 = vector.extract_strided_slice %47 {offsets = [0, 0], sizes = [8, 256], strides = [1, 1]} : vector<16x256xf32> to vector<8x256xf32>
    %54 = arith.truncf %53 : vector<8x256xf32> to vector<8x256xbf16>
    %cst_25 = arith.constant dense<0.000000e+00> : vector<256x256xf32>
    %55 = tpu.matmul %50, %52, %cst_25 {dimension_numbers = #tpu.dot_dimension_numbers<[1], [0], [0], [1], [0, 0, 1, 1], [], []>} : vector<256x8xbf16>, vector<8x256xbf16>, vector<256x256xf32> -> vector<256x256xf32>
    %cst_26 = arith.constant dense<0xFF800000> : vector<256xf32>
    %56 = vector.multi_reduction <maximumf>, %55, %cst_26 [1] : vector<256x256xf32> to vector<256xf32>
    %57 = vector.shape_cast %56 : vector<256xf32> to vector<256x1xf32>
    %58 = vector.broadcast %57 : vector<256x1xf32> to vector<256x256xf32>
    %59 = arith.subf %55, %58 : vector<256x256xf32>
    %60 = math.exp %59 : vector<256x256xf32>
    %cst_27 = arith.constant dense<0.000000e+00> : vector<256xf32>
    %61 = vector.multi_reduction <add>, %60, %cst_27 [1] : vector<256x256xf32> to vector<256xf32>
    %62 = vector.shape_cast %61 : vector<256xf32> to vector<256x1xf32>
    %63 = tpu.reciprocal %62 {approx = true} : vector<256x1xf32> -> vector<256x1xf32>
    %64 = vector.broadcast %63 : vector<256x1xf32> to vector<256x256xf32>
    %65 = arith.mulf %60, %64 : vector<256x256xf32>
    %66 = arith.truncf %65 : vector<256x256xf32> to vector<256x256xbf16>
    %cst_28 = arith.constant dense<0.000000e+00> : vector<8x256xf32>
    %67 = tpu.matmul %54, %66, %cst_28 {dimension_numbers = #tpu.dot_dimension_numbers<[1], [1], [0], [0], [0, 0, 1, 0], [], []>} : vector<8x256xbf16>, vector<256x256xbf16>, vector<8x256xf32> -> vector<8x256xf32>
    %68 = vector.extract_strided_slice %48 {offsets = [0, 0], sizes = [16, 8], strides = [1, 1]} : vector<16x16xf32> to vector<16x8xf32>
    %cst_29 = arith.constant dense<0.000000e+00> : vector<16x256xf32>
    %69 = tpu.matmul %68, %67, %cst_29 {dimension_numbers = #tpu.dot_dimension_numbers<[1], [0], [0], [1], [0, 0, 1, 1], [], []>} : vector<16x8xf32>, vector<8x256xf32>, vector<16x256xf32> -> vector<16x256xf32>
    %70 = arith.addf %49, %69 : vector<16x256xf32>
    %71 = vector.extract_strided_slice %45 {offsets = [0, 8], sizes = [256, 8], strides = [1, 1]} : vector<256x16xbf16> to vector<256x8xbf16>
    %72 = vector.extract_strided_slice %46 {offsets = [8, 0], sizes = [8, 256], strides = [1, 1]} : vector<16x256xf32> to vector<8x256xf32>
    %73 = arith.truncf %72 : vector<8x256xf32> to vector<8x256xbf16>
    %74 = vector.extract_strided_slice %47 {offsets = [8, 0], sizes = [8, 256], strides = [1, 1]} : vector<16x256xf32> to vector<8x256xf32>
    %75 = arith.truncf %74 : vector<8x256xf32> to vector<8x256xbf16>
    %cst_30 = arith.constant dense<0.000000e+00> : vector<256x256xf32>
    %76 = tpu.matmul %71, %73, %cst_30 {dimension_numbers = #tpu.dot_dimension_numbers<[1], [0], [0], [1], [0, 0, 1, 1], [], []>} : vector<256x8xbf16>, vector<8x256xbf16>, vector<256x256xf32> -> vector<256x256xf32>
    %cst_31 = arith.constant dense<0xFF800000> : vector<256xf32>
    %77 = vector.multi_reduction <maximumf>, %76, %cst_31 [1] : vector<256x256xf32> to vector<256xf32>
    %78 = vector.shape_cast %77 : vector<256xf32> to vector<256x1xf32>
    %79 = vector.broadcast %78 : vector<256x1xf32> to vector<256x256xf32>
    %80 = arith.subf %76, %79 : vector<256x256xf32>
    %81 = math.exp %80 : vector<256x256xf32>
    %cst_32 = arith.constant dense<0.000000e+00> : vector<256xf32>
    %82 = vector.multi_reduction <add>, %81, %cst_32 [1] : vector<256x256xf32> to vector<256xf32>
    %83 = vector.shape_cast %82 : vector<256xf32> to vector<256x1xf32>
    %84 = tpu.reciprocal %83 {approx = true} : vector<256x1xf32> -> vector<256x1xf32>
    %85 = vector.broadcast %84 : vector<256x1xf32> to vector<256x256xf32>
    %86 = arith.mulf %81, %85 : vector<256x256xf32>
    %87 = arith.truncf %86 : vector<256x256xf32> to vector<256x256xbf16>
    %cst_33 = arith.constant dense<0.000000e+00> : vector<8x256xf32>
    %88 = tpu.matmul %75, %87, %cst_33 {dimension_numbers = #tpu.dot_dimension_numbers<[1], [1], [0], [0], [0, 0, 1, 0], [], []>} : vector<8x256xbf16>, vector<256x256xbf16>, vector<8x256xf32> -> vector<8x256xf32>
    %89 = vector.extract_strided_slice %48 {offsets = [0, 8], sizes = [16, 8], strides = [1, 1]} : vector<16x16xf32> to vector<16x8xf32>
    %cst_34 = arith.constant dense<0.000000e+00> : vector<16x256xf32>
    %90 = tpu.matmul %89, %88, %cst_34 {dimension_numbers = #tpu.dot_dimension_numbers<[1], [0], [0], [1], [0, 0, 1, 1], [], []>} : vector<16x8xf32>, vector<8x256xf32>, vector<16x256xf32> -> vector<16x256xf32>
    %91 = arith.addf %70, %90 : vector<16x256xf32>
    %c0_35 = arith.constant 0 : index
    %c0_36 = arith.constant 0 : index
    %92 = vector.load %arg9[%c0_35, %c0_36] : memref<16x1xf32, #tpu.memory_space<vmem>>, vector<16x1xf32>
    %93 = vector.broadcast %92 : vector<16x1xf32> to vector<16x256xf32>
    %94 = arith.addf %91, %93 : vector<16x256xf32>
    %95 = arith.addf %11, %94 : vector<16x256xf32>
    %cst_37 = arith.constant dense<0.000000e+00> : vector<256xf32>
    %96 = vector.multi_reduction <add>, %95, %cst_37 [0] : vector<16x256xf32> to vector<256xf32>
    %97 = vector.shape_cast %96 : vector<256xf32> to vector<1x256xf32>
    %cst_38 = arith.constant 1.600000e+01 : f32
    %98 = vector.broadcast %cst_38 : f32 to vector<1x256xf32>
    %99 = arith.divf %97, %98 : vector<1x256xf32>
    %100 = vector.broadcast %99 : vector<1x256xf32> to vector<16x256xf32>
    %101 = arith.subf %95, %100 : vector<16x256xf32>
    %102 = arith.mulf %101, %101 : vector<16x256xf32>
    %cst_39 = arith.constant dense<0.000000e+00> : vector<256xf32>
    %103 = vector.multi_reduction <add>, %102, %cst_39 [0] : vector<16x256xf32> to vector<256xf32>
    %104 = vector.shape_cast %103 : vector<256xf32> to vector<1x256xf32>
    %cst_40 = arith.constant 1.600000e+01 : f32
    %105 = vector.broadcast %cst_40 : f32 to vector<1x256xf32>
    %106 = arith.divf %104, %105 : vector<1x256xf32>
    %107 = vector.broadcast %99 : vector<1x256xf32> to vector<16x256xf32>
    %108 = arith.subf %95, %107 : vector<16x256xf32>
    %cst_41 = arith.constant 9.99999974E-6 : f32
    %109 = vector.broadcast %cst_41 : f32 to vector<1x256xf32>
    %110 = arith.addf %106, %109 : vector<1x256xf32>
    %111 = math.rsqrt %110 : vector<1x256xf32>
    %112 = vector.broadcast %111 : vector<1x256xf32> to vector<16x256xf32>
    %113 = arith.mulf %108, %112 : vector<16x256xf32>
    %c0_42 = arith.constant 0 : index
    %c0_43 = arith.constant 0 : index
    %114 = vector.load %arg10[%c0_42, %c0_43] : memref<16x1xf32, #tpu.memory_space<vmem>>, vector<16x1xf32>
    %115 = vector.broadcast %114 : vector<16x1xf32> to vector<16x256xf32>
    %116 = arith.mulf %113, %115 : vector<16x256xf32>
    %c0_44 = arith.constant 0 : index
    %c0_45 = arith.constant 0 : index
    %117 = vector.load %arg11[%c0_44, %c0_45] : memref<16x1xf32, #tpu.memory_space<vmem>>, vector<16x1xf32>
    %118 = vector.broadcast %117 : vector<16x1xf32> to vector<16x256xf32>
    %119 = arith.addf %116, %118 : vector<16x256xf32>
    %c0_46 = arith.constant 0 : index
    %c0_47 = arith.constant 0 : index
    %120 = vector.load %arg12[%c0_46, %c0_47] : memref<32x16xf32, #tpu.memory_space<vmem>>, vector<32x16xf32>
    %121 = arith.truncf %120 : vector<32x16xf32> to vector<32x16xbf16>
    %122 = arith.truncf %119 : vector<16x256xf32> to vector<16x256xbf16>
    %cst_48 = arith.constant dense<0.000000e+00> : vector<32x256xf32>
    %123 = tpu.matmul %121, %122, %cst_48 {dimension_numbers = #tpu.dot_dimension_numbers<[1], [0], [0], [1], [0, 0, 1, 1], [], []>} : vector<32x16xbf16>, vector<16x256xbf16>, vector<32x256xf32> -> vector<32x256xf32>
    %c0_49 = arith.constant 0 : index
    %c0_50 = arith.constant 0 : index
    %124 = vector.load %arg13[%c0_49, %c0_50] : memref<32x1xf32, #tpu.memory_space<vmem>>, vector<32x1xf32>
    %125 = vector.broadcast %124 : vector<32x1xf32> to vector<32x256xf32>
    %126 = arith.addf %123, %125 : vector<32x256xf32>
    %127 = arith.mulf %126, %126 : vector<32x256xf32>
    %128 = arith.mulf %126, %127 : vector<32x256xf32>
    %cst_51 = arith.constant 4.471500e-02 : f32
    %129 = vector.broadcast %cst_51 : f32 to vector<32x256xf32>
    %130 = arith.mulf %129, %128 : vector<32x256xf32>
    %131 = arith.addf %126, %130 : vector<32x256xf32>
    %cst_52 = arith.constant 0.797884583 : f32
    %132 = vector.broadcast %cst_52 : f32 to vector<32x256xf32>
    %133 = arith.mulf %132, %131 : vector<32x256xf32>
    %134 = math.tanh %133 : vector<32x256xf32>
    %cst_53 = arith.constant 1.000000e+00 : f32
    %135 = vector.broadcast %cst_53 : f32 to vector<32x256xf32>
    %136 = arith.addf %135, %134 : vector<32x256xf32>
    %cst_54 = arith.constant 5.000000e-01 : f32
    %137 = vector.broadcast %cst_54 : f32 to vector<32x256xf32>
    %138 = arith.mulf %137, %136 : vector<32x256xf32>
    %139 = arith.mulf %126, %138 : vector<32x256xf32>
    %c0_55 = arith.constant 0 : index
    %c0_56 = arith.constant 0 : index
    %140 = vector.load %arg14[%c0_55, %c0_56] : memref<16x32xf32, #tpu.memory_space<vmem>>, vector<16x32xf32>
    %141 = arith.truncf %140 : vector<16x32xf32> to vector<16x32xbf16>
    %142 = arith.truncf %139 : vector<32x256xf32> to vector<32x256xbf16>
    %cst_57 = arith.constant dense<0.000000e+00> : vector<16x256xf32>
    %143 = tpu.matmul %141, %142, %cst_57 {dimension_numbers = #tpu.dot_dimension_numbers<[1], [0], [0], [1], [0, 0, 1, 1], [], []>} : vector<16x32xbf16>, vector<32x256xbf16>, vector<16x256xf32> -> vector<16x256xf32>
    %c0_58 = arith.constant 0 : index
    %c0_59 = arith.constant 0 : index
    %144 = vector.load %arg15[%c0_58, %c0_59] : memref<16x1xf32, #tpu.memory_space<vmem>>, vector<16x1xf32>
    %145 = vector.broadcast %144 : vector<16x1xf32> to vector<16x256xf32>
    %146 = arith.addf %143, %145 : vector<16x256xf32>
    %147 = arith.addf %95, %146 : vector<16x256xf32>
    %c0_60 = arith.constant 0 : index
    %c0_61 = arith.constant 0 : index
    %c0_62 = arith.constant 0 : index
    %148 = vector.load %arg22[%c0_60, %c0_61, %c0_62] : memref<1x16x256xf32, #tpu.memory_space<vmem>>, vector<1x16x256xf32>
    %149 = vector.shape_cast %148 : vector<1x16x256xf32> to vector<16x256xf32>
    %150 = vector.shape_cast %147 : vector<16x256xf32> to vector<1x16x256xf32>
    tpu.vector_store %arg22[%c0_60, %c0_61, %c0_62], %150 {strides = array<i32>} : memref<1x16x256xf32, #tpu.memory_space<vmem>>, vector<1x16x256xf32>,
    %c0_63 = arith.constant 0 : index
    %c0_64 = arith.constant 0 : index
    %151 = vector.load %arg16[%c0_63, %c0_64] : memref<3x16xf32, #tpu.memory_space<vmem>>, vector<3x16xf32>
    %cst_65 = arith.constant dense<0.000000e+00> : vector<3x256xf32>
    %152 = tpu.matmul %151, %147, %cst_65 {dimension_numbers = #tpu.dot_dimension_numbers<[1], [0], [0], [1], [0, 0, 1, 1], [], []>} : vector<3x16xf32>, vector<16x256xf32>, vector<3x256xf32> -> vector<3x256xf32>
    %c0_66 = arith.constant 0 : index
    %c0_67 = arith.constant 0 : index
    %153 = vector.load %arg17[%c0_66, %c0_67] : memref<3x1xf32, #tpu.memory_space<vmem>>, vector<3x1xf32>
    %154 = vector.broadcast %153 : vector<3x1xf32> to vector<3x256xf32>
    %155 = arith.addf %152, %154 : vector<3x256xf32>
    %c0_68 = arith.constant 0 : index
    %c0_69 = arith.constant 0 : index
    %c0_70 = arith.constant 0 : index
    %156 = vector.load %arg20[%c0_68, %c0_69, %c0_70] : memref<1x3x256xf32, #tpu.memory_space<vmem>>, vector<1x3x256xf32>
    %157 = vector.shape_cast %156 : vector<1x3x256xf32> to vector<3x256xf32>
    %158 = vector.shape_cast %155 : vector<3x256xf32> to vector<1x3x256xf32>
    tpu.vector_store %arg20[%c0_68, %c0_69, %c0_70], %158 {strides = array<i32>} : memref<1x3x256xf32, #tpu.memory_space<vmem>>, vector<1x3x256xf32>,
    %c0_71 = arith.constant 0 : index
    %c0_72 = arith.constant 0 : index
    %159 = vector.load %arg18[%c0_71, %c0_72] : memref<3x16xf32, #tpu.memory_space<vmem>>, vector<3x16xf32>
    %cst_73 = arith.constant dense<0.000000e+00> : vector<3x256xf32>
    %160 = tpu.matmul %159, %147, %cst_73 {dimension_numbers = #tpu.dot_dimension_numbers<[1], [0], [0], [1], [0, 0, 1, 1], [], []>} : vector<3x16xf32>, vector<16x256xf32>, vector<3x256xf32> -> vector<3x256xf32>
    %cst_74 = arith.constant dense<0.000000e+00> : vector<3xf32>
    %161 = vector.multi_reduction <add>, %160, %cst_74 [1] : vector<3x256xf32> to vector<3xf32>
    %162 = vector.shape_cast %161 : vector<3xf32> to vector<3x1xf32>
    %cst_75 = arith.constant 2.560000e+02 : f32
    %163 = vector.broadcast %cst_75 : f32 to vector<3x1xf32>
    %164 = arith.divf %162, %163 : vector<3x1xf32>
    %c0_76 = arith.constant 0 : index
    %c0_77 = arith.constant 0 : index
    %165 = vector.load %arg19[%c0_76, %c0_77] : memref<3x1xf32, #tpu.memory_space<vmem>>, vector<3x1xf32>
    %166 = arith.addf %164, %165 : vector<3x1xf32>
    %c0_78 = arith.constant 0 : index
    %c0_79 = arith.constant 0 : index
    %c0_80 = arith.constant 0 : index
    %167 = vector.load %arg21[%c0_78, %c0_79, %c0_80] : memref<1x3x1xf32, #tpu.memory_space<vmem>>, vector<1x3x1xf32>
    %168 = vector.shape_cast %167 : vector<1x3x1xf32> to vector<3x1xf32>
    %169 = vector.shape_cast %166 : vector<3x1xf32> to vector<1x3x1xf32>
    tpu.vector_store %arg21[%c0_78, %c0_79, %c0_80], %169 {strides = array<i32>} : memref<1x3x1xf32, #tpu.memory_space<vmem>>, vector<1x3x1xf32>,
    return
  }
  func.func @transform_0(%arg0: i32) -> (i32, i32, i32) {
    %c0_i32 = arith.constant 0 : i32
    %c0_i32_0 = arith.constant 0 : i32
    %c0_i32_1 = arith.constant 0 : i32
    return %arg0, %c0_i32, %c0_i32_0 : i32, i32, i32
  }
  func.func @transform_1(%arg0: i32) -> (i32, i32) {
    %c0_i32 = arith.constant 0 : i32
    %c0_i32_0 = arith.constant 0 : i32
    %c0_i32_1 = arith.constant 0 : i32
    return %c0_i32, %c0_i32_0 : i32, i32
  }
  func.func @transform_2(%arg0: i32) -> (i32, i32) {
    %c0_i32 = arith.constant 0 : i32
    %c0_i32_0 = arith.constant 0 : i32
    %c0_i32_1 = arith.constant 0 : i32
    return %c0_i32, %c0_i32_0 : i32, i32
  }
  func.func @transform_3(%arg0: i32) -> (i32, i32) {
    %c0_i32 = arith.constant 0 : i32
    %c0_i32_0 = arith.constant 0 : i32
    %c0_i32_1 = arith.constant 0 : i32
    return %c0_i32, %c0_i32_0 : i32, i32
  }
  func.func @transform_4(%arg0: i32) -> (i32, i32) {
    %c0_i32 = arith.constant 0 : i32
    %c0_i32_0 = arith.constant 0 : i32
    %c0_i32_1 = arith.constant 0 : i32
    return %c0_i32, %c0_i32_0 : i32, i32
  }
  func.func @transform_5(%arg0: i32) -> (i32, i32) {
    %c0_i32 = arith.constant 0 : i32
    %c0_i32_0 = arith.constant 0 : i32
    %c0_i32_1 = arith.constant 0 : i32
    return %c0_i32, %c0_i32_0 : i32, i32
  }
  func.func @transform_6(%arg0: i32) -> (i32, i32) {
    %c0_i32 = arith.constant 0 : i32
    %c0_i32_0 = arith.constant 0 : i32
    %c0_i32_1 = arith.constant 0 : i32
    return %c0_i32, %c0_i32_0 : i32, i32
  }
  func.func @transform_7(%arg0: i32) -> (i32, i32) {
    %c0_i32 = arith.constant 0 : i32
    %c0_i32_0 = arith.constant 0 : i32
    %c0_i32_1 = arith.constant 0 : i32
    return %c0_i32, %c0_i32_0 : i32, i32
  }
  func.func @transform_8(%arg0: i32) -> (i32, i32) {
    %c0_i32 = arith.constant 0 : i32
    %c0_i32_0 = arith.constant 0 : i32
    %c0_i32_1 = arith.constant 0 : i32
    return %c0_i32, %c0_i32_0 : i32, i32
  }
  func.func @transform_9(%arg0: i32) -> (i32, i32) {
    %c0_i32 = arith.constant 0 : i32
    %c0_i32_0 = arith.constant 0 : i32
    %c0_i32_1 = arith.constant 0 : i32
    return %c0_i32, %c0_i32_0 : i32, i32
  }
  func.func @transform_10(%arg0: i32) -> (i32, i32) {
    %c0_i32 = arith.constant 0 : i32
    %c0_i32_0 = arith.constant 0 : i32
    %c0_i32_1 = arith.constant 0 : i32
    return %c0_i32, %c0_i32_0 : i32, i32
  }
  func.func @transform_11(%arg0: i32) -> (i32, i32) {
    %c0_i32 = arith.constant 0 : i32
    %c0_i32_0 = arith.constant 0 : i32
    %c0_i32_1 = arith.constant 0 : i32
    return %c0_i32, %c0_i32_0 : i32, i32
  }
  func.func @transform_12(%arg0: i32) -> (i32, i32) {
    %c0_i32 = arith.constant 0 : i32
    %c0_i32_0 = arith.constant 0 : i32
    %c0_i32_1 = arith.constant 0 : i32
    return %c0_i32, %c0_i32_0 : i32, i32
  }
  func.func @transform_13(%arg0: i32) -> (i32, i32) {
    %c0_i32 = arith.constant 0 : i32
    %c0_i32_0 = arith.constant 0 : i32
    %c0_i32_1 = arith.constant 0 : i32
    return %c0_i32, %c0_i32_0 : i32, i32
  }
  func.func @transform_14(%arg0: i32) -> (i32, i32) {
    %c0_i32 = arith.constant 0 : i32
    %c0_i32_0 = arith.constant 0 : i32
    %c0_i32_1 = arith.constant 0 : i32
    return %c0_i32, %c0_i32_0 : i32, i32
  }
  func.func @transform_15(%arg0: i32) -> (i32, i32) {
    %c0_i32 = arith.constant 0 : i32
    %c0_i32_0 = arith.constant 0 : i32
    %c0_i32_1 = arith.constant 0 : i32
    return %c0_i32, %c0_i32_0 : i32, i32
  }
  func.func @transform_16(%arg0: i32) -> (i32, i32) {
    %c0_i32 = arith.constant 0 : i32
    %c0_i32_0 = arith.constant 0 : i32
    %c0_i32_1 = arith.constant 0 : i32
    return %c0_i32, %c0_i32_0 : i32, i32
  }
  func.func @transform_17(%arg0: i32) -> (i32, i32) {
    %c0_i32 = arith.constant 0 : i32
    %c0_i32_0 = arith.constant 0 : i32
    %c0_i32_1 = arith.constant 0 : i32
    return %c0_i32, %c0_i32_0 : i32, i32
  }
  func.func @transform_18(%arg0: i32) -> (i32, i32) {
    %c0_i32 = arith.constant 0 : i32
    %c0_i32_0 = arith.constant 0 : i32
    %c0_i32_1 = arith.constant 0 : i32
    return %c0_i32, %c0_i32_0 : i32, i32
  }
  func.func @transform_19(%arg0: i32) -> (i32, i32, i32) {
    %c0_i32 = arith.constant 0 : i32
    %c0_i32_0 = arith.constant 0 : i32
    %c0_i32_1 = arith.constant 0 : i32
    return %arg0, %c0_i32, %c0_i32_0 : i32, i32, i32
  }
  func.func @transform_20(%arg0: i32) -> (i32, i32, i32) {
    %c0_i32 = arith.constant 0 : i32
    %c0_i32_0 = arith.constant 0 : i32
    %c0_i32_1 = arith.constant 0 : i32
    return %arg0, %c0_i32, %c0_i32_0 : i32, i32, i32
  }
  func.func @transform_21(%arg0: i32) -> (i32, i32, i32) {
    %c0_i32 = arith.constant 0 : i32
    %c0_i32_0 = arith.constant 0 : i32
    %c0_i32_1 = arith.constant 0 : i32
    return %arg0, %c0_i32, %c0_i32_0 : i32, i32, i32
  }
}

</mosaic_0001>

<bundles_post_ra>
// kernel: histnet_forward.1
= control target key start
LH: loop header
LB: loop body
LE: loop exit
PB: predicated region body
PF: predicated region fallthrough
CT: control target
= control target key end

     0   :  { %s5583_s0 = inlined_call_operand.vmem [shape: f32[2,9,256], index: 0, kind: input, shape index: {}]   ;;  %s5584_s1 = inlined_call_operand.vmem [shape: f32[16,9], index: 1, kind: input, shape index: {}]   ;;  %s5585_s2 = inlined_call_operand.vmem [shape: f32[16,1], index: 2, kind: input, shape index: {}]   ;;  %s5586_s3 = inlined_call_operand.vmem [shape: f32[16,1], index: 3, kind: input, shape index: {}]   ;;  %s5587_s4 = inlined_call_operand.vmem [shape: f32[16,1], index: 4, kind: input, shape index: {}]   ;;  %s5588_s5 = inlined_call_operand.vmem [shape: f32[48,16], index: 5, kind: input, shape index: {}]   ;;  %s5589_s6 = inlined_call_operand.vmem [shape: f32[48,1], index: 6, kind: input, shape index: {}]   ;;  %s5590_s7 = inlined_call_operand.vmem [shape: f32[16,16], index: 7, kind: input, shape index: {}]   ;;  %s5591_s8 = inlined_call_operand.vmem [shape: f32[16,1], index: 8, kind: input, shape index: {}]   ;;  %s5592_s9 = inlined_call_operand.vmem [shape: f32[16,1], index: 9, kind: input, shape index: {}]   ;;  %s5593_s10 = inlined_call_operand.vmem [shape: f32[16,1], index: 10, kind: input, shape index: {}]   ;;  %s5594_s11 = inlined_call_operand.vmem [shape: f32[32,16], index: 11, kind: input, shape index: {}]   ;;  %s5595_s12 = inlined_call_operand.vmem [shape: f32[32,1], index: 12, kind: input, shape index: {}]   ;;  %s5596_s13 = inlined_call_operand.vmem [shape: f32[16,32], index: 13, kind: input, shape index: {}]   ;;  %s5597_s14 = inlined_call_operand.vmem [shape: f32[16,1], index: 14, kind: input, shape index: {}]   ;;  %s5598_s15 = inlined_call_operand.vmem [shape: f32[3,16], index: 15, kind: input, shape index: {}]   ;;  %s5599_s16 = inlined_call_operand.vmem [shape: f32[3,1], index: 16, kind: input, shape index: {}]   ;;  %s5600_s17 = inlined_call_operand.vmem [shape: f32[3,16], index: 17, kind: input, shape index: {}]   ;;  %s5601_s18 = inlined_call_operand.vmem [shape: f32[3,1], index: 18, kind: input, shape index: {}]   ;;  %s5602_s19 = inlined_call_operand.vmem [shape: f32[2,3,256], index: 19, kind: output, shape index: {0}]   ;;  %s5603_s20 = inlined_call_operand.vmem [shape: f32[2,3,1], index: 20, kind: output, shape index: {1}]   ;;  %s5604_s21 = inlined_call_operand.vmem [shape: f32[2,16,256], index: 21, kind: output, shape index: {2}]  }
   0x1   :  { %5756 = sst [smem:[#allocation87_spill]] %s5583_s0 }
   0x2   :  { %5757 = sst [smem:[#allocation88_spill]] %s5584_s1 }
   0x3   :  { %5758 = sst [smem:[#allocation89_spill]] %s5585_s2  ;;  %s4149_s2 = smov 0  }
   0x4   :  { %5759 = sst [smem:[#allocation90_spill]] %s5586_s3 }
   0x5   :  { %5760 = sst [smem:[#allocation91_spill]] %s5587_s4 }
   0x6   :  { %5761 = sst [smem:[#allocation92_spill]] %s5588_s5 }
   0x7 LB: > { %s3540_s25 = sadd.s32 4294967295, %s4034_s2   ;;  %p3544_p0 = scmp.ge.s32.totalorder %s4034_s2, 1  ;;  %s4034_s2 = sphi %s4149_s2, %s32_s2  }
   0x8   : > { %p592_p1 = scmp.lt.s32.totalorder %s4034_s2, 3 }
   0xa   : > { %p593_p2 = pnand %p3544_p0, %p592_p1 }
   0xc   : > { %596 = sbr.rel (%p593_p2) target bundleno = 2901 (0xb55), region = 96 }
  0x11   : > { %p661_p3 = scmp.lt.s32.totalorder %s3540_s25, 1  ;;  %v5613_v0 = vmov 0.0   ;;  %s5762_s3 = sld [smem:[#allocation89_spill]]  ;;  %v5611_v2 = vmov 0   ;;  %vm706_vm0 = vcmask 1040384   ;;  %vm699_vm1 = vcmask 72704  }
  0x12   : > { %777 = vmatprep.mubr.f32.mxu0 %v5613_v0  ;;  %3618 = vset.pattern.permute.xlu0 %v5611_v2  ;;  %s5763_s0 = sld [smem:[#allocation90_spill]]  ;;  %v894_v14 = vld [vmem:[%s5589_s6] sm:$0xff]  ;;  %v895_v15 = vld [vmem:[%s5589_s6 + $0x8] sm:$0xff]  ;;  %v896_v16 = vld [vmem:[%s5589_s6 + $0x10] sm:$0xff]  ;;  %vm930_vm6 = vcmask 130048   ;;  %vm1138_vm7 = vcmask 1043456  }
  0x13   : > { %s6069_s25 = smov (!%p661_p3, %s3540_s25), 1  ;;  %3619 = vset.pattern.permute.xlu1 %v5611_v2  ;;  %972 = vmatprep.mubr.bf16.mxu1 %v5611_v2  ;;  %s5764_s1 = sld [smem:[#allocation87_spill]]  ;;  %v897_v17 = vld [vmem:[%s5589_s6 + $0x18] sm:$0xff]  ;;  %vm1089_vm8 = vcmask 64512   ;;  %vm3193_vm9 = vcmask 261120   ;;  %vm3409_vm10 = vcmask 1042432  }
  0x14   : > { %s5754_s4 = sshll.u32 %s6069_s25, 5  ;;  %s5765_s30 = sld [smem:[#allocation88_spill]]  ;;  %vm3419_vm11 = vcmask 2048  }
  0x15   : > { %s5766_s22 = sld [smem:[#allocation91_spill]]  ;;  %s4038_s26 = smov 120  }
  0x16   : > { %s5771_s28 = sld [smem:[#allocation92_spill]]  ;;  %s6067_s27 = sshll.u32 %s6069_s25, 5 }
  0x17   : > { %v687_v1 = vld [vmem:[%s5762_s3] sm:$0xff]  ;;  %v688_v4 = vld [vmem:[%s5762_s3 + $0x8] sm:$0xff]  ;;  %s679_s5 = scalar_lea.vmem %s5604_s21, %s6067_s27  ;;  %s3549_s29 = sshll.u32 %s6069_s25, 2 }
  0x18   : > { %691 = vperm.xlu0 %3618, %v687_v1   ;;  %v851_v3 = vld [vmem:[%s5763_s0] sm:$0xff]  ;;  %v852_v5 = vld [vmem:[%s5763_s0 + $0x8] sm:$0xff]  ;;  %s3605_s0 = sshll.u32 %s6069_s25, 3 }
  0x19   : > { %855 = vperm.xlu1 %3619, %v851_v3   ;;  %s665_s24 = scalar_lea.vmem %s5764_s1, %s5754_s4  ;;  %s670_s3 = scalar_lea.vmem %s5602_s19, %s3605_s0 }
  0x1a   : > { %v684_v6 = vld [vmem:[%s665_s24 + $0x18] sm:$0x1]  ;;  %v683_v7 = vld [vmem:[%s665_s24 + $0x10] sm:$0x1]  ;;  %v682_v8 = vld [vmem:[%s665_s24 + $0x8] sm:$0xff] }
  0x1b   : > { %3552 = vmatprep.subr.msk.mxu0 %vm706_vm0, %v684_v6  ;;  %v681_v9 = vld [vmem:[%s665_s24] sm:$0xff]  ;;  %v868_v12 = vld [vmem:[%s5766_s22 + $0x8] sm:$0xff]  ;;  %s674_s24 = scalar_lea.vmem %s5603_s20, %s3549_s29 }
  0x1c   : > { %696 = vperm.xlu0 %3618, %v688_v4   ;;  %3553 = vmatpush1.msk.msra.mxu0 %vm706_vm0, %v683_v7  ;;  %v685_v10 = vld [vmem:[%s5765_s30] sm:$0xff]  ;;  %v686_v13 = vld [vmem:[%s5765_s30 + $0x8] sm:$0xff] }
  0x1d   : > { %v867_v11 = vld [vmem:[%s5766_s22] sm:$0xff]  ;;  %860 = vperm.xlu1 %3619, %v852_v5   ;;  %743 = vmatprep.subr.mxu0 %v682_v8 }
  0x1e   : > { %744 = vmatpush1.msra.mxu0 %v681_v9 }
  0x1f   : > { %3554 = vmatmul.mubr.msk.f32.vlgmr.msra.gmra.mxu0 %vm699_vm1, %v685_v10 }
  0x20   : > { %871 = vperm.xlu0 %3618, %v867_v11   ;;  %783 = vmatprep.mubr.f32.mxu0 %v5613_v0 }
  0x21   : > { %876 = vperm.xlu1 %3619, %v868_v12  }
  0x23   : > { %3555 = vmatmul.mubr.msk.f32.gmra.mxu0 %vm699_vm1, %v686_v13 }
  0x24   : > { %902 = vperm.xlu0 %3618, %v894_v14   ;;  %1177 = vmatprep.mubr.bf16.mxu0 %v5611_v2 }
  0x25   : > { %907 = vperm.xlu1 %3619, %v895_v15  }
  0x28   : > { %912 = vperm.xlu0 %3618, %v896_v16  }
  0x2c   : > { %917 = vperm.xlu0 %3618, %v897_v17  }
  0x93   : > { %v692_v18 = vpop.permute.xlu0 %691 }
  0x94   : > { %v856_v16 = vpop.permute.xlu1 %855 }
  0x97   : > { %v697_v23 = vpop.permute.xlu0 %696 }
  0x98   : > { %v861_v17 = vpop.permute.xlu1 %860 }
  0xdf   : > { %v779_v19 = vpop.f32.mrf.mxu0 }
  0xe0   : > { %v780_v20 = vadd.f32 %v779_v19, %v692_v18 }
  0xe1   : > { %v781_v21 = vpop.f32.mrf.mxu0 }
  0xe2   : > { %v782_v22 = vadd.f32 %v781_v21, %v692_v18  ;;  %v794_v25 = vmul.f32 0.01, %v780_v20  ;;  %vm790_vm2 = vcmp.ge.f32.partialorder %v780_v20, 0.0 }
  0xe3   : > { %v785_v24 = vpop.f32.mrf.mxu0 }
  0xe4   : > { %v786_v26 = vadd.f32 %v785_v24, %v697_v23  ;;  %v795_v28 = vmul.f32 0.01, %v782_v22  ;;  %vm791_vm4 = vcmp.ge.f32.partialorder %v782_v22, 0.0  ;;  %v4207_v31 = vsel %vm790_vm2, %v780_v20, %v794_v25 }
  0xe5   : > { %v787_v27 = vpop.f32.mrf.mxu0  ;;  %5767 = vst [vmem:[#allocation2_spill] sm:$0xff] %v4207_v31 }
  0xe6   : > { %vm792_vm3 = vcmp.ge.f32.partialorder %v786_v26, 0.0  ;;  %v796_v29 = vmul.f32 0.01, %v786_v26  ;;  %v788_v30 = vadd.f32 %v787_v27, %v697_v23  ;;  %v4213_v35 = vsel %vm791_vm4, %v782_v22, %v795_v28 }
  0xe7   : > { %5769 = vst [vmem:[#allocation4_spill] sm:$0xff] %v4213_v35 }
  0xe8   : > { %v4209_v32 = vsel %vm792_vm3, %v786_v26, %v796_v29  ;;  %vm793_vm5 = vcmp.ge.f32.partialorder %v788_v30, 0.0  ;;  %v797_v33 = vmul.f32 0.01, %v788_v30  ;;  %v872_v26 = vpop.permute.xlu0 %871  ;;  %v877_v29 = vpop.permute.xlu1 %876 }
  0xe9   : > { %5768 = vst [vmem:[#allocation3_spill] sm:$0xff] %v4209_v32  ;;  %v802_v34 = vadd.f32 %v4209_v32, %v4207_v31 }
  0xea   : > { %v4215_v36 = vsel %vm793_vm5, %v788_v30, %v797_v33 }
  0xeb   : > { %5770 = vst [vmem:[#allocation5_spill] sm:$0xff] %v4215_v36  ;;  %v803_v37 = vrot.slane %v802_v34, 4  ;;  %v809_v38 = vadd.f32 %v4215_v36, %v4213_v35 }
  0xed   : > { %v804_v39 = vadd.f32 %v803_v37, %v802_v34  ;;  %v810_v40 = vrot.slane %v809_v38, 4 }
  0xef   : > { %v805_v41 = vrot.slane %v804_v39, 2  ;;  %v811_v42 = vadd.f32 %v810_v40, %v809_v38  ;;  %v883_v38 = vld [vmem:[%s5771_s28] sm:$0xff] }
  0xf1   : > { %v806_v43 = vadd.f32 %v805_v41, %v804_v39  ;;  %v812_v44 = vrot.slane %v811_v42, 2  ;;  %v884_v39 = vld [vmem:[%s5771_s28 + $0x8] sm:$0xff] }
  0xf3   : > { %v807_v45 = vrot.slane %v806_v43, 1  ;;  %v813_v46 = vadd.f32 %v812_v44, %v811_v42  ;;  %v889_v42 = vpack.c.bf16 %v884_v39, %v883_v38  ;;  %v886_v44 = vld [vmem:[%s5771_s28 + $0x18] sm:$0xff] }
  0xf5   : > { %v808_v47 = vadd.f32 %v807_v45, %v806_v43  ;;  %v814_v48 = vrot.slane %v813_v46, 1  ;;  %v885_v43 = vld [vmem:[%s5771_s28 + $0x10] sm:$0xff] }
  0xf6   : > { %v890_v45 = vpack.c.bf16 %v886_v44, %v885_v43 }
  0xf7   : > { %v817_v49 = vmul.f32 0.0625, %v808_v47  ;;  %v815_v50 = vadd.f32 %v814_v48, %v813_v46  ;;  %v903_v46 = vpop.permute.xlu0 %902 }
  0xf9   : > { %v821_v51 = vsub.f32 %v4209_v32, %v817_v49  ;;  %v818_v52 = vmul.f32 0.0625, %v815_v50  ;;  %v819_v53 = vsub.f32 %v4207_v31, %v817_v49 }
  0xfb   : > { %v825_v54 = vmul.f32 %v821_v51, %v821_v51  ;;  %v822_v55 = vsub.f32 %v4215_v36, %v818_v52  ;;  %v820_v56 = vsub.f32 %v4213_v35, %v818_v52  ;;  %v823_v57 = vmul.f32 %v819_v53, %v819_v53 }
  0xfd   : > { %v826_v58 = vmul.f32 %v822_v55, %v822_v55  ;;  %v824_v59 = vmul.f32 %v820_v56, %v820_v56  ;;  %v827_v60 = vadd.f32 %v825_v54, %v823_v57  ;;  %v913_v54 = vpop.permute.xlu0 %912 }
  0xff   : > { %v828_v61 = vrot.slane %v827_v60, 4  ;;  %v834_v62 = vadd.f32 %v826_v58, %v824_v59 }
 0x101   : > { %v829_v63 = vadd.f32 %v828_v61, %v827_v60  ;;  %v835_v1 = vrot.slane %v834_v62, 4 }
 0x103   : > { %v830_v3 = vrot.slane %v829_v63, 2  ;;  %v836_v4 = vadd.f32 %v835_v1, %v834_v62  ;;  %v918_v62 = vpop.permute.xlu0 %917 }
 0x105   : > { %v831_v5 = vadd.f32 %v830_v3, %v829_v63  ;;  %v837_v6 = vrot.slane %v836_v4, 2 }
 0x107   : > { %v832_v7 = vrot.slane %v831_v5, 1  ;;  %v838_v8 = vadd.f32 %v837_v6, %v836_v4 }
 0x109   : > { %v833_v9 = vadd.f32 %v832_v7, %v831_v5  ;;  %v839_v10 = vrot.slane %v838_v8, 1 }
 0x10b   : > { %v840_v11 = vadd.f32 %v839_v10, %v838_v8  ;;  %v841_v12 = vmul.f32 0.0625, %v833_v9 }
 0x10d   : > { %v842_v13 = vmul.f32 0.0625, %v840_v11  ;;  %v843_v14 = vadd.f32 1e-05, %v841_v12 }
 0x10f   : > { %v844_v15 = vadd.f32 1e-05, %v842_v13  ;;  %3620 = vrsqrt.f32 %v843_v14 }
 0x111   : > { %3622 = vrsqrt.f32 %v844_v15 }
 0x11c   : > { %v3621_v18 = vpop.eup %3620 }
 0x11d   : > { %v847_v19 = vmul.f32 %v3621_v18, %v819_v53  ;;  %v849_v20 = vmul.f32 %v3621_v18, %v821_v51  ;;  %v908_v51 = vpop.permute.xlu1 %907 }
 0x11e   : > { %v3623_v21 = vpop.eup %3622 }
 0x11f   : > { %v848_v22 = vmul.f32 %v3623_v21, %v820_v56  ;;  %v863_v23 = vmul.f32 %v856_v16, %v847_v19  ;;  %v850_v24 = vmul.f32 %v3623_v21, %v822_v55  ;;  %v865_v25 = vmul.f32 %v861_v17, %v849_v20 }
 0x121   : > { %v864_v27 = vmul.f32 %v856_v16, %v848_v22  ;;  %v866_v28 = vmul.f32 %v861_v17, %v850_v24  ;;  %v879_v30 = vadd.f32 %v872_v26, %v863_v23  ;;  %v881_v33 = vadd.f32 %v877_v29, %v865_v25 }
 0x123   : > { %v880_v34 = vadd.f32 %v872_v26, %v864_v27  ;;  %v882_v37 = vadd.f32 %v877_v29, %v866_v28  ;;  %v892_v41 = vpack.c.bf16 %v881_v33, %v879_v30 }
 0x125   : > { %v893_v40 = vpack.c.bf16 %v882_v37, %v880_v34 }
 0x127   : > { %954 = vmatprep.subr.bf16.mxu1 %v893_v40 }
 0x128   : > { %955 = vmatpush1.bf16.msra.mxu1 %v892_v41 }
 0x12b   : > { %3556 = vmatmul.mubr.msk.bf16.vlgmr.msra.gmra.mxu1 %vm930_vm6, %v889_v42 }
 0x12c   : > { %982 = vmatprep.mubr.bf16.mxu1 %v5611_v2 }
 0x133   : > { %3557 = vmatmul.mubr.msk.bf16.gmra.mxu1 %vm930_vm6, %v890_v45 }
 0x134   : > { %992 = vmatprep.mubr.bf16.mxu1 %v5611_v2 }
 0x1eb   : > { %v974_v47 = vpop.f32.mrf.mxu1 }
 0x1ec   : > { %v975_v48 = vadd.f32 %v974_v47, %v903_v46 }
 0x1ed   : > { %v976_v49 = vpop.f32.mrf.mxu1 }
 0x1ee   : > { %v977_v50 = vadd.f32 %v976_v49, %v903_v46  ;;  %1003 = vxpose.xlu1.b32.start [1/2] (short) %v975_v48, 128 }
 0x1ef   : > { %v978_v52 = vpop.f32.mrf.mxu1 }
 0x1f0   : > { %v979_v53 = vadd.f32 %v978_v52, %v908_v51  ;;  %1035 = vxpose.xlu0.b32.start [1/2] (short) %v977_v50, 128 }
 0x1f1   : > { %v980_v55 = vpop.f32.mrf.mxu1 }
 0x1f2   : > { %v981_v56 = vadd.f32 %v980_v55, %v908_v51  ;;  %1004 = vxpose.xlu1.b32.end [2/2] (short) %v979_v53, 128 }
 0x1f3   : > { %v984_v57 = vpop.f32.mrf.mxu1 }
 0x1f4   : > { %v985_v58 = vadd.f32 %v984_v57, %v913_v54  ;;  %1036 = vxpose.xlu0.b32.end [2/2] (short) %v981_v56, 128 }
 0x1f5   : > { %v986_v59 = vpop.f32.mrf.mxu1 }
 0x1f6   : > { %v1085_v60 = vpack.c.bf16 %v985_v58, %v985_v58  ;;  %v987_v61 = vadd.f32 %v986_v59, %v913_v54 }
 0x1f7   : > { %v988_v63 = vpop.f32.mrf.mxu1 }
 0x1f8   : > { %v1086_v1 = vpack.c.bf16 %v987_v61, %v987_v61  ;;  %v989_v3 = vadd.f32 %v988_v63, %v918_v62  ;;  %v1140_v5 = vsel %vm1138_vm7, %v1085_v60, 0 }
 0x1f9   : > { %v990_v4 = vpop.f32.mrf.mxu1 }
 0x1fa   : > { %v1891_v6 = vpack.c.bf16 %v989_v3, %v989_v3  ;;  %v991_v7 = vadd.f32 %v990_v4, %v918_v62  ;;  %3559 = vmatprep.subr.msk.bf16.mxu0 %vm1138_vm7, %v1086_v1 }
 0x1fb   : > { %1160 = vmatpush1.bf16.msra.mxu0 %v1140_v5 }
 0x1fc   : > { %v1992_v8 = vsel %vm1138_vm7, %v1891_v6, 0  ;;  %v1892_v9 = vpack.c.bf16 %v991_v7, %v991_v7 }
 0x1fe   : > { %3576 = vmatprep.subr.msk.bf16.mxu0 %vm1138_vm7, %v1892_v9 }
 0x26a   : > { %v1019_v10 = vpop.trf.xlu1 }
 0x26c   : > { %v1051_v11 = vpop.trf.xlu0 }
 0x26e   : > { %v1020_v12 = vpop.trf.xlu1 }
 0x26f   : > { %v1067_v13 = vpack.c.bf16 %v1020_v12, %v1019_v10 }
 0x270   : > { %v1052_v14 = vpop.trf.xlu0 }
 0x271   : > { %1911 = vrot.lane.b32.xlu1 %v1067_v13, %s4038_s26  ;;  %3560 = vmatmul.mubr.msk.bf16.vlgmr.msra.gmra.mxu0 %vm1089_vm8, %v1067_v13  ;;  %v1075_v49 = vpack.c.bf16 %v1052_v14, %v1051_v11 }
 0x272   : > { %2012 = vmatpush1.bf16.msra.mxu0 %v1992_v8  ;;  %v1021_v15 = vpop.trf.xlu1  ;;  %1187 = vmatprep.mubr.bf16.mxu0 %v5611_v2 }
 0x274   : > { %v1053_v16 = vpop.trf.xlu0 }
 0x276   : > { %v1022_v17 = vpop.trf.xlu1 }
 0x277   : > { %v1068_v18 = vpack.c.bf16 %v1022_v17, %v1021_v15 }
 0x278   : > { %v1054_v19 = vpop.trf.xlu0 }
 0x279   : > { %1913 = vrot.lane.b32.xlu1 %v1068_v18, %s4038_s26  ;;  %3561 = vmatmul.mubr.msk.bf16.gmra.mxu0 %vm1089_vm8, %v1068_v18  ;;  %v1076_v54 = vpack.c.bf16 %v1054_v19, %v1053_v16 }
 0x27a   : > { %v1023_v20 = vpop.trf.xlu1  ;;  %1197 = vmatprep.mubr.bf16.mxu0 %v5611_v2 }
 0x27c   : > { %v1055_v21 = vpop.trf.xlu0 }
 0x27e   : > { %v1024_v22 = vpop.trf.xlu1 }
 0x27f   : > { %v1069_v23 = vpack.c.bf16 %v1024_v22, %v1023_v20 }
 0x280   : > { %v1056_v24 = vpop.trf.xlu0 }
 0x281   : > { %1915 = vrot.lane.b32.xlu0 %v1069_v23, %s4038_s26  ;;  %3562 = vmatmul.mubr.msk.bf16.gmra.mxu0 %vm1089_vm8, %v1069_v23  ;;  %v1077_v52 = vpack.c.bf16 %v1056_v24, %v1055_v21 }
 0x282   : > { %v1025_v25 = vpop.trf.xlu1  ;;  %1207 = vmatprep.mubr.bf16.mxu0 %v5611_v2 }
 0x284   : > { %v1057_v26 = vpop.trf.xlu0 }
 0x286   : > { %v1026_v27 = vpop.trf.xlu1 }
 0x287   : > { %v1070_v28 = vpack.c.bf16 %v1026_v27, %v1025_v25 }
 0x288   : > { %v1058_v29 = vpop.trf.xlu0 }
 0x289   : > { %1917 = vrot.lane.b32.xlu1 %v1070_v28, %s4038_s26  ;;  %3563 = vmatmul.mubr.msk.bf16.gmra.mxu0 %vm1089_vm8, %v1070_v28  ;;  %v1078_v57 = vpack.c.bf16 %v1058_v29, %v1057_v26 }
 0x28a   : > { %v1027_v30 = vpop.trf.xlu1  ;;  %1217 = vmatprep.mubr.bf16.mxu0 %v5611_v2 }
 0x28c   : > { %v1059_v33 = vpop.trf.xlu0 }
 0x28e   : > { %v1028_v34 = vpop.trf.xlu1 }
 0x28f   : > { %v1071_v37 = vpack.c.bf16 %v1028_v34, %v1027_v30 }
 0x290   : > { %v1060_v38 = vpop.trf.xlu0 }
 0x291   : > { %1919 = vrot.lane.b32.xlu0 %v1071_v37, %s4038_s26  ;;  %3564 = vmatmul.mubr.msk.bf16.gmra.mxu0 %vm1089_vm8, %v1071_v37  ;;  %v1079_v55 = vpack.c.bf16 %v1060_v38, %v1059_v33 }
 0x292   : > { %v1029_v39 = vpop.trf.xlu1  ;;  %1227 = vmatprep.mubr.bf16.mxu0 %v5611_v2 }
 0x294   : > { %v1061_v41 = vpop.trf.xlu0 }
 0x296   : > { %v1030_v40 = vpop.trf.xlu1 }
 0x297   : > { %v1072_v42 = vpack.c.bf16 %v1030_v40, %v1029_v39 }
 0x298   : > { %v1062_v44 = vpop.trf.xlu0 }
 0x299   : > { %1921 = vrot.lane.b32.xlu1 %v1072_v42, %s4038_s26  ;;  %3565 = vmatmul.mubr.msk.bf16.gmra.mxu0 %vm1089_vm8, %v1072_v42  ;;  %v1080_v59 = vpack.c.bf16 %v1062_v44, %v1061_v41 }
 0x29a   : > { %v1031_v43 = vpop.trf.xlu1  ;;  %1237 = vmatprep.mubr.bf16.mxu0 %v5611_v2 }
 0x29c   : > { %v1063_v48 = vpop.trf.xlu0 }
 0x29e   : > { %v1032_v45 = vpop.trf.xlu1 }
 0x29f   : > { %v1073_v46 = vpack.c.bf16 %v1032_v45, %v1031_v43 }
 0x2a0   : > { %v1064_v53 = vpop.trf.xlu0 }
 0x2a1   : > { %1923 = vrot.lane.b32.xlu0 %v1073_v46, %s4038_s26  ;;  %3566 = vmatmul.mubr.msk.bf16.gmra.mxu0 %vm1089_vm8, %v1073_v46  ;;  %v1081_v58 = vpack.c.bf16 %v1064_v53, %v1063_v48 }
 0x2a2   : > { %v1033_v47 = vpop.trf.xlu1  ;;  %1247 = vmatprep.mubr.bf16.mxu0 %v5611_v2 }
 0x2a4   : > { %v1065_v56 = vpop.trf.xlu0 }
 0x2a5   : > { %1927 = vrot.lane.b32.xlu0 %v1075_v49, %s4038_s26 }
 0x2a6   : > { %v1034_v50 = vpop.trf.xlu1 }
 0x2a7   : > { %v1074_v51 = vpack.c.bf16 %v1034_v50, %v1033_v47 }
 0x2a8   : > { %v1066_v60 = vpop.trf.xlu0 }
 0x2a9   : > { %1925 = vrot.lane.b32.xlu1 %v1074_v51, %s4038_s26  ;;  %3567 = vmatmul.mubr.msk.bf16.gmra.mxu0 %vm1089_vm8, %v1074_v51  ;;  %v1082_v61 = vpack.c.bf16 %v1066_v60, %v1065_v56 }
 0x2aa   : > { %1257 = vmatprep.mubr.bf16.mxu0 %v5611_v2  ;;  %1931 = vrot.lane.b32.xlu0 %v1077_v52, %s4038_s26 }
 0x2ad   : > { %1929 = vrot.lane.b32.xlu1 %v1076_v54, %s4038_s26 }
 0x2ae   : > { %1935 = vrot.lane.b32.xlu0 %v1079_v55, %s4038_s26 }
 0x2b1   : > { %3568 = vmatmul.mubr.msk.bf16.gmra.mxu0 %vm1089_vm8, %v1075_v49  ;;  %1933 = vrot.lane.b32.xlu1 %v1078_v57, %s4038_s26 }
 0x2b2   : > { %1267 = vmatprep.mubr.bf16.mxu0 %v5611_v2  ;;  %1939 = vrot.lane.b32.xlu0 %v1081_v58, %s4038_s26 }
 0x2b5   : > { %1937 = vrot.lane.b32.xlu1 %v1080_v59, %s4038_s26 }
 0x2b9   : > { %3569 = vmatmul.mubr.msk.bf16.gmra.mxu0 %vm1089_vm8, %v1076_v54  ;;  %1941 = vrot.lane.b32.xlu1 %v1082_v61, %s4038_s26 }
 0x2ba   : > { %1277 = vmatprep.mubr.bf16.mxu0 %v5611_v2 }
 0x2c1   : > { %3570 = vmatmul.mubr.msk.bf16.gmra.mxu0 %vm1089_vm8, %v1077_v52 }
 0x2c2   : > { %1287 = vmatprep.mubr.bf16.mxu0 %v5611_v2 }
 0x2c9   : > { %3571 = vmatmul.mubr.msk.bf16.gmra.mxu0 %vm1089_vm8, %v1078_v57 }
 0x2ca   : > { %1297 = vmatprep.mubr.bf16.mxu0 %v5611_v2 }
 0x2d1   : > { %3572 = vmatmul.mubr.msk.bf16.gmra.mxu0 %vm1089_vm8, %v1079_v55 }
 0x2d2   : > { %1307 = vmatprep.mubr.bf16.mxu0 %v5611_v2 }
 0x2d9   : > { %3573 = vmatmul.mubr.msk.bf16.gmra.mxu0 %vm1089_vm8, %v1080_v59 }
 0x2da   : > { %1317 = vmatprep.mubr.bf16.mxu0 %v5611_v2 }
 0x2e1   : > { %3574 = vmatmul.mubr.msk.bf16.gmra.mxu0 %vm1089_vm8, %v1081_v58 }
 0x2e2   : > { %1327 = vmatprep.mubr.bf16.mxu0 %v5611_v2 }
 0x2e3   : > { %v1912_v62 = vpop.permute.xlu1 %1911 }
 0x2e9   : > { %3575 = vmatmul.mubr.msk.bf16.gmra.mxu0 %vm1089_vm8, %v1082_v61 }
 0x2ea   : > { %2029 = vmatprep.mubr.bf16.mxu0 %v5611_v2 }
 0x2eb   : > { %v1914_v63 = vpop.permute.xlu1 %1913 }
 0x2f1   : > { %3577 = vmatmul.mubr.msk.bf16.vlgmr.msra.gmra.mxu0 %vm1089_vm8, %v1912_v62 }
 0x2f2   : > { %2039 = vmatprep.mubr.bf16.mxu0 %v5611_v2 }
 0x2f3   : > { %v1916_v1 = vpop.permute.xlu0 %1915 }
 0x2f9   : > { %3578 = vmatmul.mubr.msk.bf16.gmra.mxu0 %vm1089_vm8, %v1914_v63 }
 0x2fa   : > { %2049 = vmatprep.mubr.bf16.mxu0 %v5611_v2 }
 0x2fb   : > { %v1918_v3 = vpop.permute.xlu1 %1917 }
 0x301   : > { %3579 = vmatmul.mubr.msk.bf16.gmra.mxu0 %vm1089_vm8, %v1916_v1 }
 0x302   : > { %2059 = vmatprep.mubr.bf16.mxu0 %v5611_v2 }
 0x303   : > { %v1920_v4 = vpop.permute.xlu0 %1919 }
 0x309   : > { %3580 = vmatmul.mubr.msk.bf16.gmra.mxu0 %vm1089_vm8, %v1918_v3 }
 0x30a   : > { %2069 = vmatprep.mubr.bf16.mxu0 %v5611_v2 }
 0x30b   : > { %v1922_v5 = vpop.permute.xlu1 %1921 }
 0x311   : > { %3581 = vmatmul.mubr.msk.bf16.gmra.mxu0 %vm1089_vm8, %v1920_v4 }
 0x312   : > { %2079 = vmatprep.mubr.bf16.mxu0 %v5611_v2 }
 0x313   : > { %v1924_v6 = vpop.permute.xlu0 %1923 }
 0x317   : > { %v1928_v8 = vpop.permute.xlu0 %1927 }
 0x319   : > { %3582 = vmatmul.mubr.msk.bf16.gmra.mxu0 %vm1089_vm8, %v1922_v5 }
 0x31a   : > { %2089 = vmatprep.mubr.bf16.mxu0 %v5611_v2 }
 0x31b   : > { %v1926_v7 = vpop.permute.xlu1 %1925 }
 0x31c   : > { %v1932_v17 = vpop.permute.xlu0 %1931 }
 0x31f   : > { %v1930_v12 = vpop.permute.xlu1 %1929 }
 0x320   : > { %v1936_v27 = vpop.permute.xlu0 %1935 }
 0x321   : > { %3583 = vmatmul.mubr.msk.bf16.gmra.mxu0 %vm1089_vm8, %v1924_v6 }
 0x322   : > { %2099 = vmatprep.mubr.bf16.mxu0 %v5611_v2 }
 0x323   : > { %v1934_v22 = vpop.permute.xlu1 %1933 }
 0x324   : > { %v1940_v41 = vpop.permute.xlu0 %1939 }
 0x327   : > { %v1938_v34 = vpop.permute.xlu1 %1937 }
 0x329   : > { %3584 = vmatmul.mubr.msk.bf16.gmra.mxu0 %vm1089_vm8, %v1926_v7 }
 0x32a   : > { %2109 = vmatprep.mubr.bf16.mxu0 %v5611_v2 }
 0x32b   : > { %v1942_v46 = vpop.permute.xlu1 %1941 }
 0x331   : > { %v4303_v9 = vpop.f32.mrf.mxu0  ;;  %3585 = vmatmul.mubr.msk.bf16.gmra.mxu0 %vm1089_vm8, %v1928_v8 }
 0x332   : > { %5772 = vst [vmem:[#allocation6_spill] sm:$0xff] %v4303_v9  ;;  %2119 = vmatprep.mubr.bf16.mxu0 %v5611_v2 }
 0x333   : > { %v4307_v10 = vpop.f32.mrf.mxu0 }
 0x334   : > { %5773 = vst [vmem:[#allocation7_spill] sm:$0xff] %v4307_v10 }
 0x335   : > { %v4309_v11 = vpop.f32.mrf.mxu0 }
 0x337   : > { %v4311_v13 = vpop.f32.mrf.mxu0 }
 0x338   : > { %5774 = vst [vmem:[#allocation8_spill] sm:$0xff] %v4311_v13 }
 0x339   : > { %v4313_v14 = vpop.f32.mrf.mxu0  ;;  %3586 = vmatmul.mubr.msk.bf16.gmra.mxu0 %vm1089_vm8, %v1930_v12 }
 0x33a   : > { %2129 = vmatprep.mubr.bf16.mxu0 %v5611_v2 }
 0x33b   : > { %v4317_v15 = vpop.f32.mrf.mxu0 }
 0x33d   : > { %v4319_v16 = vpop.f32.mrf.mxu0 }
 0x33f   : > { %v4321_v18 = vpop.f32.mrf.mxu0 }
 0x341   : > { %v4323_v19 = vpop.f32.mrf.mxu0  ;;  %3587 = vmatmul.mubr.msk.bf16.gmra.mxu0 %vm1089_vm8, %v1932_v17 }
 0x342   : > { %2139 = vmatprep.mubr.bf16.mxu0 %v5611_v2 }
 0x343   : > { %v4327_v20 = vpop.f32.mrf.mxu0 }
 0x344   : > { %v1350_v8 = vmax.f32 %v4323_v19, %v4327_v20 }
 0x345   : > { %v4329_v21 = vpop.f32.mrf.mxu0 }
 0x347   : > { %v4331_v23 = vpop.f32.mrf.mxu0 }
 0x349   : > { %v4333_v24 = vpop.f32.mrf.mxu0  ;;  %3588 = vmatmul.mubr.msk.bf16.gmra.mxu0 %vm1089_vm8, %v1934_v22  ;;  %v1353_v22 = vmax.f32 %v4329_v21, %v4331_v23 }
 0x34a   : > { %2149 = vmatprep.mubr.bf16.mxu0 %v5611_v2 }
 0x34b   : > { %v4337_v25 = vpop.f32.mrf.mxu0 }
 0x34c   : > { %v1356_v4 = vmax.f32 %v4333_v24, %v4337_v25 }
 0x34d   : > { %v4339_v26 = vpop.f32.mrf.mxu0 }
 0x34f   : > { %v4341_v28 = vpop.f32.mrf.mxu0 }
 0x350   : > { %v1359_v7 = vmax.f32 %v4339_v26, %v4341_v28 }
 0x351   : > { %v4343_v29 = vpop.f32.mrf.mxu0  ;;  %3589 = vmatmul.mubr.msk.bf16.gmra.mxu0 %vm1089_vm8, %v1936_v27  ;;  %v1344_v27 = vmax.f32 %v4313_v14, %v4317_v15 }
 0x352   : > { %2159 = vmatprep.mubr.bf16.mxu0 %v5611_v2 }
 0x353   : > { %v4347_v30 = vpop.f32.mrf.mxu0 }
 0x354   : > { %v1362_v62 = vmax.f32 %v4343_v29, %v4347_v30 }
 0x355   : > { %v4349_v33 = vpop.f32.mrf.mxu0 }
 0x357   : > { %v4351_v37 = vpop.f32.mrf.mxu0 }
 0x358   : > { %v1365_v3 = vmax.f32 %v4349_v33, %v4351_v37 }
 0x359   : > { %v4353_v38 = vpop.f32.mrf.mxu0  ;;  %3590 = vmatmul.mubr.msk.bf16.gmra.mxu0 %vm1089_vm8, %v1938_v34 }
 0x35a   : > { %2169 = vmatprep.mubr.bf16.mxu0 %v5611_v2 }
 0x35b   : > { %v4357_v39 = vpop.f32.mrf.mxu0 }
 0x35c   : > { %v1368_v58 = vmax.f32 %v4353_v38, %v4357_v39 }
 0x35d   : > { %v4359_v40 = vpop.f32.mrf.mxu0 }
 0x35f   : > { %v4361_v42 = vpop.f32.mrf.mxu0 }
 0x360   : > { %v1371_v61 = vmax.f32 %v4359_v40, %v4361_v42 }
 0x361   : > { %v4363_v43 = vpop.f32.mrf.mxu0  ;;  %3591 = vmatmul.mubr.msk.bf16.gmra.mxu0 %vm1089_vm8, %v1940_v41 }
 0x362   : > { %2179 = vmatprep.mubr.bf16.mxu0 %v5611_v2 }
 0x363   : > { %v4367_v44 = vpop.f32.mrf.mxu0 }
 0x364   : > { %v1374_v53 = vmax.f32 %v4363_v43, %v4367_v44 }
 0x365   : > { %v4369_v45 = vpop.f32.mrf.mxu0 }
 0x367   : > { %v4371_v47 = vpop.f32.mrf.mxu0 }
 0x368   : > { %v1377_v57 = vmax.f32 %v4369_v45, %v4371_v47 }
 0x369   : > { %v4373_v48 = vpop.f32.mrf.mxu0  ;;  %3592 = vmatmul.mubr.msk.bf16.gmra.mxu0 %vm1089_vm8, %v1942_v46  ;;  %v1347_v46 = vmax.f32 %v4319_v16, %v4321_v18 }
 0x36a   : > { %2817 = vmatprep.mubr.f32.mxu0 %v5613_v0 }
 0x36b   : > { %v4377_v49 = vpop.f32.mrf.mxu0 }
 0x36c   : > { %v1380_v50 = vmax.f32 %v4373_v48, %v4377_v49 }
 0x36d   : > { %v4381_v51 = vpop.f32.mrf.mxu0 }
 0x36e   : > { %1381 = vmax.xlane.f32.xlu0 %v1380_v50  ;;  %v1338_v50 = vmax.f32 %v4303_v9, %v4307_v10 }
 0x36f   : > { %v4383_v52 = vpop.f32.mrf.mxu0 }
 0x370   : > { %v1383_v54 = vmax.f32 %v4381_v51, %v4383_v52 }
 0x371   : > { %v4389_v55 = vpop.f32.mrf.mxu0 }
 0x372   : > { %1375 = vmax.xlane.f32.xlu0 %v1374_v53  ;;  %1384 = vmax.xlane.f32.xlu1 %v1383_v54 }
 0x373   : > { %v4391_v56 = vpop.f32.mrf.mxu0 }
 0x375   : > { %v4397_v59 = vpop.f32.mrf.mxu0 }
 0x376   : > { %1378 = vmax.xlane.f32.xlu0 %v1377_v57  ;;  %1369 = vmax.xlane.f32.xlu1 %v1368_v58  ;;  %v1341_v57 = vmax.f32 %v4309_v11, %v4311_v13 }
 0x377   : > { %v4399_v60 = vpop.f32.mrf.mxu0 }
 0x379   : > { %v4405_v63 = vpop.f32.mrf.mxu0 }
 0x37a   : > { %1372 = vmax.xlane.f32.xlu0 %v1371_v61  ;;  %1363 = vmax.xlane.f32.xlu1 %v1362_v62 }
 0x37b   : > { %v4407_v1 = vpop.f32.mrf.mxu0 }
 0x37d   : > { %v4413_v5 = vpop.f32.mrf.mxu0 }
 0x37e   : > { %1366 = vmax.xlane.f32.xlu0 %v1365_v3  ;;  %1357 = vmax.xlane.f32.xlu1 %v1356_v4 }
 0x37f   : > { %v4415_v6 = vpop.f32.mrf.mxu0 }
 0x381   : > { %v4421_v12 = vpop.f32.mrf.mxu0 }
 0x382   : > { %5775 = vst [vmem:[#allocation9_spill] sm:$0xff] %v4421_v12  ;;  %1360 = vmax.xlane.f32.xlu0 %v1359_v7  ;;  %1351 = vmax.xlane.f32.xlu1 %v1350_v8 }
 0x383   : > { %v4423_v17 = vpop.f32.mrf.mxu0 }
 0x384   : > { %5776 = vst [vmem:[#allocation10_spill] sm:$0xff] %v4423_v17 }
 0x385   : > { %v4429_v34 = vpop.f32.mrf.mxu0 }
 0x386   : > { %5777 = vst [vmem:[#allocation11_spill] sm:$0xff] %v4429_v34  ;;  %1354 = vmax.xlane.f32.xlu0 %v1353_v22  ;;  %1345 = vmax.xlane.f32.xlu1 %v1344_v27 }
 0x387   : > { %v4431_v41 = vpop.f32.mrf.mxu0 }
 0x388   : > { %5778 = vst [vmem:[#allocation12_spill] sm:$0xff] %v4431_v41 }
 0x389   : > { %v4437_v53 = vpop.f32.mrf.mxu0 }
 0x38a   : > { %5779 = vst [vmem:[#allocation13_spill] sm:$0xff] %v4437_v53  ;;  %1348 = vmax.xlane.f32.xlu0 %v1347_v46  ;;  %1339 = vmax.xlane.f32.xlu1 %v1338_v50 }
 0x38b   : > { %v4439_v54 = vpop.f32.mrf.mxu0 }
 0x38c   : > { %5780 = vst [vmem:[#allocation14_spill] sm:$0xff] %v4439_v54 }
 0x38d   : > { %v4443_v58 = vpop.f32.mrf.mxu0 }
 0x38e   : > { %5781 = vst [vmem:[#allocation15_spill] sm:$0xff] %v4443_v58  ;;  %1342 = vmax.xlane.f32.xlu0 %v1341_v57 }
 0x38f   : > { %v4445_v61 = vpop.f32.mrf.mxu0 }
 0x390   : > { %5782 = vst [vmem:[#allocation16_spill] sm:$0xff] %v4445_v61 }
 0x391   : > { %v4447_v62 = vpop.f32.mrf.mxu0 }
 0x392   : > { %5783 = vst [vmem:[#allocation17_spill] sm:$0xff] %v4447_v62 }
 0x393   : > { %v4449_v3 = vpop.f32.mrf.mxu0 }
 0x394   : > { %5784 = vst [vmem:[#allocation18_spill] sm:$0xff] %v4449_v3 }
 0x395   : > { %v4451_v4 = vpop.f32.mrf.mxu0 }
 0x396   : > { %5785 = vst [vmem:[#allocation19_spill] sm:$0xff] %v4451_v4 }
 0x397   : > { %v4453_v7 = vpop.f32.mrf.mxu0 }
 0x398   : > { %5786 = vst [vmem:[#allocation20_spill] sm:$0xff] %v4453_v7 }
 0x399   : > { %v4455_v8 = vpop.f32.mrf.mxu0 }
 0x39b   : > { %v4457_v22 = vpop.f32.mrf.mxu0 }
 0x39c   : > { %5787 = vst [vmem:[#allocation21_spill] sm:$0xff] %v4457_v22  ;;  %v1416_v9 = vmax.f32 %v4455_v8, %v4457_v22  ;;  %v1404_v22 = vmax.f32 %v4437_v53, %v4439_v54 }
 0x39d   : > { %v4459_v27 = vpop.f32.mrf.mxu0 }
 0x39e   : > { %5788 = vst [vmem:[#allocation22_spill] sm:$0xff] %v4459_v27 }
 0x39f   : > { %v4461_v46 = vpop.f32.mrf.mxu0 }
 0x3a0   : > { %5789 = vst [vmem:[#allocation23_spill] sm:$0xff] %v4461_v46 }
 0x3a1   : > { %v4463_v50 = vpop.f32.mrf.mxu0 }
 0x3a2   : > { %5790 = vst [vmem:[#allocation24_spill] sm:$0xff] %v4463_v50 }
 0x3a3   : > { %v4465_v57 = vpop.f32.mrf.mxu0 }
 0x3a4   : > { %5791 = vst [vmem:[#allocation25_spill] sm:$0xff] %v4465_v57  ;;  %v1422_v2 = vmax.f32 %v4463_v50, %v4465_v57  ;;  %v1410_v50 = vmax.f32 %v4447_v62, %v4449_v3  ;;  %v1398_v3 = vmax.f32 %v4421_v12, %v4423_v17 }
 0x3a5   : > { %v4469_v0 = vpop.f32.mrf.mxu0 }
 0x3a6   : > { %5792 = vst [vmem:[#allocation26_spill] sm:$0xff] %v4469_v0  ;;  %1423 = vmax.xlane.f32.xlu1 %v1422_v2 }
 0x3a7   : > { %v4471_v36 = vpop.f32.mrf.mxu0 }
 0x3a8   : > { %5793 = vst [vmem:[#allocation27_spill] sm:$0xff] %v4471_v36 }
 0x3a9   : > { %v4473_v35 = vpop.f32.mrf.mxu0 }
 0x3aa   : > { %5794 = vst [vmem:[#allocation28_spill] sm:$0xff] %v4473_v35 }
 0x3ab   : > { %v4475_v32 = vpop.f32.mrf.mxu0 }
 0x3ac   : > { %5795 = vst [vmem:[#allocation29_spill] sm:$0xff] %v4475_v32  ;;  %v1428_v31 = vmax.f32 %v4473_v35, %v4475_v32  ;;  %v1425_v32 = vmax.f32 %v4469_v0, %v4471_v36 }
 0x3ad   : > { %v4479_v10 = vpop.f32.mrf.mxu0 }
 0x3ae   : > { %1429 = vmax.xlane.f32.xlu1 %v1428_v31 }
 0x3af   : > { %v4483_v13 = vpop.f32.mrf.mxu0 }
 0x3b0   : > { %5796 = vst [vmem:[#allocation30_spill] sm:$0xff] %v4483_v13  ;;  %v1431_v2 = vmax.f32 %v4479_v10, %v4483_v13 }
 0x3b1   : > { %v4487_v57 = vpop.f32.mrf.mxu0 }
 0x3b2   : > { %5797 = vst [vmem:[#allocation31_spill] sm:$0xff] %v4487_v57  ;;  %1417 = vmax.xlane.f32.xlu1 %v1416_v9  ;;  %1432 = vmax.xlane.f32.xlu0 %v1431_v2  ;;  %v1419_v57 = vmax.f32 %v4459_v27, %v4461_v46 }
 0x3b3   : > { %v4493_v35 = vpop.f32.mrf.mxu0 }
 0x3b4   : > { %5798 = vst [vmem:[#allocation32_spill] sm:$0xff] %v4493_v35  ;;  %v1413_v35 = vmax.f32 %v4451_v4, %v4453_v7 }
 0x3b5   : > { %v4495_v31 = vpop.f32.mrf.mxu0 }
 0x3b6   : > { %5799 = vst [vmem:[#allocation33_spill] sm:$0xff] %v4495_v31  ;;  %1411 = vmax.xlane.f32.xlu1 %v1410_v50  ;;  %1426 = vmax.xlane.f32.xlu0 %v1425_v32  ;;  %v1407_v31 = vmax.f32 %v4443_v58, %v4445_v61 }
 0x3b7   : > { %v4501_v9 = vpop.f32.mrf.mxu0 }
 0x3b8   : > { %5800 = vst [vmem:[#allocation34_spill] sm:$0xff] %v4501_v9 }
 0x3b9   : > { %v4503_v2 = vpop.f32.mrf.mxu0 }
 0x3ba   : > { %5801 = vst [vmem:[#allocation35_spill] sm:$0xff] %v4503_v2  ;;  %1405 = vmax.xlane.f32.xlu1 %v1404_v22  ;;  %1420 = vmax.xlane.f32.xlu0 %v1419_v57  ;;  %v1401_v57 = vmax.f32 %v4429_v34, %v4431_v41 }
 0x3bb   : > { %v4509_v50 = vpop.f32.mrf.mxu0 }
 0x3bc   : > { %5802 = vst [vmem:[#allocation36_spill] sm:$0xff] %v4509_v50 }
 0x3bd   : > { %v4511_v32 = vpop.f32.mrf.mxu0 }
 0x3be   : > { %5803 = vst [vmem:[#allocation37_spill] sm:$0xff] %v4511_v32  ;;  %1399 = vmax.xlane.f32.xlu1 %v1398_v3  ;;  %1414 = vmax.xlane.f32.xlu0 %v1413_v35 }
 0x3bf   : > { %v4515_v9 = vpop.f32.mrf.mxu0 }
 0x3c0   : > { %5804 = vst [vmem:[#allocation38_spill] sm:$0xff] %v4515_v9 }
 0x3c1   : > { %v4517_v2 = vpop.f32.mrf.mxu0 }
 0x3c2   : > { %5805 = vst [vmem:[#allocation39_spill] sm:$0xff] %v4517_v2  ;;  %1408 = vmax.xlane.f32.xlu0 %v1407_v31 }
 0x3c3   : > { %v4519_v22 = vpop.f32.mrf.mxu0 }
 0x3c4   : > { %5806 = vst [vmem:[#allocation40_spill] sm:$0xff] %v4519_v22 }
 0x3c5   : > { %v4523_v17 = vpop.f32.mrf.mxu0 }
 0x3c6   : > { %5807 = vst [vmem:[#allocation41_spill] sm:$0xff] %v4523_v17  ;;  %1402 = vmax.xlane.f32.xlu0 %v1401_v57 }
 0x3c7   : > { %v4525_v50 = vpop.f32.mrf.mxu0 }
 0x3c8   : > { %5808 = vst [vmem:[#allocation42_spill] sm:$0xff] %v4525_v50 }
 0x3c9   : > { %v4527_v3 = vpop.f32.mrf.mxu0 }
 0x3ca   : > { %5809 = vst [vmem:[#allocation43_spill] sm:$0xff] %v4527_v3 }
 0x3cb   : > { %v4529_v35 = vpop.f32.mrf.mxu0 }
 0x3cc   : > { %5810 = vst [vmem:[#allocation44_spill] sm:$0xff] %v4529_v35 }
 0x3cd   : > { %v4531_v32 = vpop.f32.mrf.mxu0 }
 0x3ce   : > { %5811 = vst [vmem:[#allocation45_spill] sm:$0xff] %v4531_v32 }
 0x3cf   : > { %v4533_v9 = vpop.f32.mrf.mxu0 }
 0x3d0   : > { %5812 = vst [vmem:[#allocation46_spill] sm:$0xff] %v4533_v9 }
 0x3d1   : > { %v4535_v12 = vpop.f32.mrf.mxu0 }
 0x3d2   : > { %5813 = vst [vmem:[#allocation47_spill] sm:$0xff] %v4535_v12 }
 0x3d3   : > { %v4537_v31 = vpop.f32.mrf.mxu0 }
 0x3d4   : > { %5814 = vst [vmem:[#allocation48_spill] sm:$0xff] %v4537_v31 }
 0x3d5   : > { %v4539_v54 = vpop.f32.mrf.mxu0 }
 0x3d6   : > { %5815 = vst [vmem:[#allocation49_spill] sm:$0xff] %v4539_v54 }
 0x3d7   : > { %v4541_v41 = vpop.f32.mrf.mxu0 }
 0x3d8   : > { %5816 = vst [vmem:[#allocation50_spill] sm:$0xff] %v4541_v41 }
 0x3d9   : > { %v4543_v34 = vpop.f32.mrf.mxu0 }
 0x3da   : > { %5817 = vst [vmem:[#allocation51_spill] sm:$0xff] %v4543_v34 }
 0x3db   : > { %v4545_v57 = vpop.f32.mrf.mxu0 }
 0x3dc   : > { %5818 = vst [vmem:[#allocation52_spill] sm:$0xff] %v4545_v57 }
 0x3dd   : > { %v4547_v53 = vpop.f32.mrf.mxu0 }
 0x3de   : > { %5819 = vst [vmem:[#allocation53_spill] sm:$0xff] %v4547_v53 }
 0x3df   : > { %v4549_v61 = vpop.f32.mrf.mxu0 }
 0x3e1   : > { %v4551_v58 = vpop.f32.mrf.mxu0 }
 0x3e3   : > { %v4553_v2 = vpop.f32.mrf.mxu0 }
 0x3e4   : > { %5820 = vst [vmem:[#allocation54_spill] sm:$0xff] %v4553_v2 }
 0x3e5   : > { %v4555_v22 = vpop.f32.mrf.mxu0 }
 0x3e7   : > { %v4557_v17 = vpop.f32.mrf.mxu0 }
 0x3e9   : > { %v4559_v50 = vpop.f32.mrf.mxu0 }
 0x3eb   : > { %v4561_v3 = vpop.f32.mrf.mxu0 }
 0x3ec   : > { %5821 = vst [vmem:[#allocation55_spill] sm:$0xff] %v4561_v3 }
 0x3ed   : > { %v4563_v35 = vpop.f32.mrf.mxu0 }
 0x3ef   : > { %v4565_v62 = vpop.f32.mrf.mxu0 }
 0x3f1   : > { %v4567_v7 = vpop.f32.mrf.mxu0 }
 0x3f2   : > { %5822 = vst [vmem:[#allocation56_spill] sm:$0xff] %v4567_v7 }
 0x3f3   : > { %v4569_v32 = vpop.f32.mrf.mxu0 }
 0x3f4   : > { %5823 = vst [vmem:[#allocation57_spill] sm:$0xff] %v4569_v32 }
 0x3f5   : > { %v4571_v4 = vpop.f32.mrf.mxu0 }
 0x3f6   : > { %5824 = vst [vmem:[#allocation58_spill] sm:$0xff] %v4571_v4 }
 0x3f7   : > { %v1382_v9 = vpop.xlane.xlu0 %1381  ;;  %v4574_v41 = vpop.f32.mrf.mxu0 }
 0x3f8   : > { %5825 = vst [vmem:[#allocation59_spill] sm:$0xff] %v4574_v41 }
 0x3f9   : > { %v4581_v13 = vpop.f32.mrf.mxu0 }
 0x3fa   : > { %5826 = vst [vmem:[#allocation60_spill] sm:$0xff] %v4581_v13 }
 0x3fb   : > { %v1376_v12 = vpop.xlane.xlu0 %1375  ;;  %v1385_v31 = vpop.xlane.xlu1 %1384 }
 0x3fc   : > { %v1464_v54 = vsub.f32 %v4381_v51, %v1385_v31  ;;  %v1465_v46 = vsub.f32 %v4383_v52, %v1385_v31  ;;  %v1458_v0 = vsub.f32 %v4363_v43, %v1376_v12  ;;  %v1459_v51 = vsub.f32 %v4367_v44, %v1376_v12 }
 0x3fd   : > { %v1462_v31 = vsub.f32 %v4373_v48, %v1382_v9  ;;  %v1463_v44 = vsub.f32 %v4377_v49, %v1382_v9 }
 0x3fe   : > { %v1558_v27 = vmul.f32 1.442695, %v1464_v54  ;;  %v1560_v34 = vmul.f32 1.442695, %v1465_v46 }
 0x3ff   : > { %v1379_v57 = vpop.xlane.xlu0 %1378  ;;  %v1370_v36 = vpop.xlane.xlu1 %1369 }
 0x400   : > { %v1460_v7 = vsub.f32 %v4369_v45, %v1379_v57  ;;  %v1461_v32 = vsub.f32 %v4371_v47, %v1379_v57  ;;  %v1454_v4 = vsub.f32 %v4353_v38, %v1370_v36  ;;  %v1455_v41 = vsub.f32 %v4357_v39, %v1370_v36  ;;  %v4588_v57 = vpop.f32.mrf.mxu0 }
 0x401   : > { %3624 = vpow2.f32 %v1558_v27  ;;  %v1546_v45 = vmul.f32 1.442695, %v1458_v0  ;;  %5827 = vst [vmem:[#allocation61_spill] sm:$0xff] %v4588_v57  ;;  %v1548_v36 = vmul.f32 1.442695, %v1459_v51 }
 0x402   : > { %v1550_v52 = vmul.f32 1.442695, %v1460_v7  ;;  %v1552_v54 = vmul.f32 1.442695, %v1461_v32  ;;  %v1538_v46 = vmul.f32 1.442695, %v1454_v4  ;;  %3626 = vpow2.f32 %v1560_v34 }
 0x403   : > { %v1540_v43 = vmul.f32 1.442695, %v1455_v41  ;;  %v1373_v53 = vpop.xlane.xlu0 %1372  ;;  %v1554_v34 = vmul.f32 1.442695, %v1462_v31  ;;  %v4591_v41 = vpop.f32.mrf.mxu0  ;;  %v1556_v0 = vmul.f32 1.442695, %v1463_v44 }
 0x404   : > { %3628 = vpow2.f32 %v1550_v52  ;;  %v1456_v47 = vsub.f32 %v4359_v40, %v1373_v53  ;;  %v1457_v38 = vsub.f32 %v4361_v42, %v1373_v53  ;;  %5828 = vst [vmem:[#allocation62_spill] sm:$0xff] %v4591_v41  ;;  %v1364_v40 = vpop.xlane.xlu1 %1363  ;;  %v5843_v41 = vld [vmem:[#allocation6_spill] sm:$0xff] }
 0x405   : > { %3630 = vpow2.f32 %v1552_v54  ;;  %v1450_v53 = vsub.f32 %v4343_v29, %v1364_v40  ;;  %v4596_v4 = vpop.f32.mrf.mxu0  ;;  %v1451_v7 = vsub.f32 %v4347_v30, %v1364_v40 }
 0x406   : > { %3632 = vpow2.f32 %v1538_v46  ;;  %v1542_v39 = vmul.f32 1.442695, %v1456_v47  ;;  %v1544_v12 = vmul.f32 1.442695, %v1457_v38  ;;  %5829 = vst [vmem:[#allocation63_spill] sm:$0xff] %v4596_v4 }
 0x407   : > { %3634 = vpow2.f32 %v1540_v43  ;;  %v1367_v48 = vpop.xlane.xlu0 %1366  ;;  %v1530_v54 = vmul.f32 1.442695, %v1450_v53 }
 0x408   : > { %3636 = vpow2.f32 %v1546_v45  ;;  %v1452_v42 = vsub.f32 %v4349_v33, %v1367_v48  ;;  %v1453_v49 = vsub.f32 %v4351_v37, %v1367_v48  ;;  %v4603_v33 = vpop.f32.mrf.mxu0  ;;  %v1532_v37 = vmul.f32 1.442695, %v1451_v7  ;;  %v1358_v31 = vpop.xlane.xlu1 %1357 }
 0x409   : > { %3638 = vpow2.f32 %v1548_v36  ;;  %5830 = vst [vmem:[#allocation64_spill] sm:$0xff] %v4603_v33  ;;  %v1446_v44 = vsub.f32 %v4333_v24, %v1358_v31 }
 0x40a   : > { %3640 = vpow2.f32 %v1542_v39  ;;  %v1534_v27 = vmul.f32 1.442695, %v1452_v42  ;;  %v1536_v32 = vmul.f32 1.442695, %v1453_v49  ;;  %v4618_v36 = vpop.f32.mrf.mxu0 }
 0x40b   : > { %3642 = vpow2.f32 %v1544_v12  ;;  %v1361_v51 = vpop.xlane.xlu0 %1360  ;;  %5831 = vst [vmem:[#allocation65_spill] sm:$0xff] %v4618_v36  ;;  %v1522_v49 = vmul.f32 1.442695, %v1446_v44 }
 0x40c   : > { %3644 = vpow2.f32 %v1554_v34  ;;  %v1448_v43 = vsub.f32 %v4339_v26, %v1361_v51  ;;  %v1449_v45 = vsub.f32 %v4341_v28, %v1361_v51  ;;  %v1447_v26 = vsub.f32 %v4337_v25, %v1358_v31  ;;  %v4633_v53 = vpop.f32.mrf.mxu0 }
 0x40d   : > { %3646 = vpow2.f32 %v1556_v0  ;;  %5832 = vst [vmem:[#allocation66_spill] sm:$0xff] %v4633_v53 }
 0x40e   : > { %v4599_v9 = vpop.eup %3624  ;;  %3648 = vpow2.f32 %v1534_v27  ;;  %v1526_v48 = vmul.f32 1.442695, %v1448_v43  ;;  %v1528_v0 = vmul.f32 1.442695, %v1449_v45  ;;  %v1524_v7 = vmul.f32 1.442695, %v1447_v26  ;;  %v1352_v27 = vpop.xlane.xlu1 %1351 }
 0x40f   : > { %v4601_v52 = vpop.eup %3626  ;;  %3650 = vpow2.f32 %v1536_v32  ;;  %v1355_v40 = vpop.xlane.xlu0 %1354  ;;  %v1442_v43 = vsub.f32 %v4323_v19, %v1352_v27 }
 0x410   : > { %3652 = vpow2.f32 %v1530_v54  ;;  %v1671_v24 = vadd.f32 %v4601_v52, %v4599_v9  ;;  %v1444_v54 = vsub.f32 %v4329_v21, %v1355_v40  ;;  %v4646_v45 = vpop.f32.mrf.mxu0 }
 0x411   : > { %v4605_v46 = vpop.eup %3628  ;;  %3654 = vpow2.f32 %v1532_v37  ;;  %v1445_v37 = vsub.f32 %v4331_v23, %v1355_v40  ;;  %5833 = vst [vmem:[#allocation67_spill] sm:$0xff] %v4646_v45  ;;  %v1514_v19 = vmul.f32 1.442695, %v1442_v43 }
 0x412   : > { %v4607_v29 = vpop.eup %3630  ;;  %3656 = vpow2.f32 %v1526_v48  ;;  %v1518_v21 = vmul.f32 1.442695, %v1444_v54  ;;  %v1395_v48 = vmax.f32 %v4413_v5, %v4415_v6  ;;  %v4657_v40 = vpop.f32.mrf.mxu0 }
 0x413   : > { %v4610_v30 = vpop.eup %3632  ;;  %v1665_v47 = vadd.f32 %v4607_v29, %v4605_v46  ;;  %3658 = vpow2.f32 %v1528_v0  ;;  %v1520_v23 = vmul.f32 1.442695, %v1445_v37  ;;  %5835 = vst [vmem:[#allocation69_spill] sm:$0xff] %v4657_v40 }
 0x414   : > { %v4615_v38 = vpop.eup %3634  ;;  %3660 = vpow2.f32 %v1522_v49  ;;  %v1346_v49 = vpop.xlane.xlu1 %1345 }
 0x415   : > { %v4620_v39 = vpop.eup %3636  ;;  %1666 = vadd.xlane.f32.xlu0 %v1665_v47  ;;  %v1656_v12 = vadd.f32 %v4615_v38, %v4610_v30  ;;  %3662 = vpow2.f32 %v1524_v7  ;;  %v1443_v47 = vsub.f32 %v4327_v20, %v1352_v27  ;;  %v1392_v7 = vmax.f32 %v4405_v63, %v4407_v1  ;;  %v4670_v43 = vpop.f32.mrf.mxu0 }
 0x416   : > { %v4625_v28 = vpop.eup %3638  ;;  %3664 = vpow2.f32 %v1518_v21  ;;  %5837 = vst [vmem:[#allocation71_spill] sm:$0xff] %v4670_v43  ;;  %v5863_v43 = vld [vmem:[#allocation52_spill] sm:$0xff] }
 0x417   : > { %v4627_v34 = vpop.eup %3640  ;;  %1657 = vadd.xlane.f32.xlu1 %v1656_v12  ;;  %v1662_v32 = vadd.f32 %v4625_v28, %v4620_v39  ;;  %v1349_v12 = vpop.xlane.xlu0 %1348  ;;  %v1516_v20 = vmul.f32 1.442695, %v1443_v47  ;;  %3666 = vpow2.f32 %v1520_v23  ;;  %v1439_v47 = vsub.f32 %v4317_v15, %v1346_v49 }
 0x418   : > { %v4631_v42 = vpop.eup %3642  ;;  %v1441_v54 = vsub.f32 %v4321_v18, %v1349_v12  ;;  %3668 = vpow2.f32 %v1514_v19  ;;  %v1389_v18 = vmax.f32 %v4397_v59, %v4399_v60  ;;  %v4681_v19 = vpop.f32.mrf.mxu0 }
 0x419   : > { %v4635_v25 = vpop.eup %3644  ;;  %1672 = vadd.xlane.f32.xlu0 %v1671_v24  ;;  %v1659_v31 = vadd.f32 %v4631_v42, %v4627_v34  ;;  %3670 = vpow2.f32 %v1516_v20  ;;  %v1508_v15 = vmul.f32 1.442695, %v1439_v47 }
 0x41a   : > { %v4639_v51 = vpop.eup %3646  ;;  %v1512_v23 = vmul.f32 1.442695, %v1441_v54  ;;  %v4694_v4 = vpop.f32.mrf.mxu0 }
 0x41b   : > { %1663 = vadd.xlane.f32.xlu1 %v1662_v32  ;;  %v1668_v44 = vadd.f32 %v4639_v51, %v4635_v25  ;;  %v4651_v26 = vpop.eup %3648  ;;  %v1440_v32 = vsub.f32 %v4319_v16, %v1349_v12  ;;  %v1343_v12 = vpop.xlane.xlu0 %1342 }
 0x41c   : > { %5834 = vst [vmem:[#allocation68_spill] sm:$0xff] %v4651_v26  ;;  %v4655_v0 = vpop.eup %3650  ;;  %v1436_v54 = vsub.f32 %v4309_v11, %v1343_v12 }
 0x41d   : > { %1660 = vadd.xlane.f32.xlu0 %v1659_v31  ;;  %v4659_v24 = vpop.eup %3652  ;;  %v1653_v37 = vadd.f32 %v4655_v0, %v4651_v26  ;;  %v1438_v31 = vsub.f32 %v4313_v14, %v1346_v49  ;;  %v1510_v16 = vmul.f32 1.442695, %v1440_v32  ;;  %v1340_v49 = vpop.xlane.xlu1 %1339 }
 0x41e   : > { %5836 = vst [vmem:[#allocation70_spill] sm:$0xff] %v4659_v24  ;;  %v4663_v27 = vpop.eup %3654  ;;  %v1434_v47 = vsub.f32 %v5843_v41, %v1340_v49  ;;  %v1502_v11 = vmul.f32 1.442695, %v1436_v54 }
 0x41f   : > { %1669 = vadd.xlane.f32.xlu1 %v1668_v44  ;;  %v1650_v44 = vadd.f32 %v4663_v27, %v4659_v24  ;;  %v4675_v21 = vpop.eup %3656  ;;  %v1506_v14 = vmul.f32 1.442695, %v1438_v31  ;;  %3672 = vpow2.f32 %v1510_v16 }
 0x420   : > { %5838 = vst [vmem:[#allocation72_spill] sm:$0xff] %v4675_v21  ;;  %3674 = vpow2.f32 %v1512_v23  ;;  %v1498_v41 = vmul.f32 1.442695, %v1434_v47 }
 0x421   : > { %1396 = vmax.xlane.f32.xlu0 %v1395_v48  ;;  %v4679_v48 = vpop.eup %3658  ;;  %3676 = vpow2.f32 %v1506_v14 }
 0x422   : > { %5839 = vst [vmem:[#allocation73_spill] sm:$0xff] %v4679_v48  ;;  %v4683_v20 = vpop.eup %3660  ;;  %v1647_v31 = vadd.f32 %v4679_v48, %v4675_v21  ;;  %3678 = vpow2.f32 %v1508_v15 }
 0x423   : > { %1393 = vmax.xlane.f32.xlu1 %v1392_v7  ;;  %5840 = vst [vmem:[#allocation74_spill] sm:$0xff] %v4683_v20  ;;  %v1386_v7 = vmax.f32 %v4389_v55, %v4391_v56  ;;  %v4687_v32 = vpop.eup %3662  ;;  %3680 = vpow2.f32 %v1502_v11 }
 0x424   : > { %5841 = vst [vmem:[#allocation75_spill] sm:$0xff] %v4687_v32  ;;  %v1644_v16 = vadd.f32 %v4687_v32, %v4683_v20  ;;  %v4699_v23 = vpop.eup %3664  ;;  %v5864_v32 = vld [vmem:[#allocation51_spill] sm:$0xff] }
 0x425   : > { %1654 = vadd.xlane.f32.xlu0 %v1653_v37  ;;  %v5842_v37 = vld [vmem:[#allocation8_spill] sm:$0xff]  ;;  %v4703_v14 = vpop.eup %3666  ;;  %v2220_v48 = vmax.f32 %v5864_v32, %v5863_v43 }
 0x426   : > { %5845 = vst [vmem:[#allocation8_spill] sm:$0xff] %v4699_v23  ;;  %5846 = vst [vmem:[#allocation6_spill] sm:$0xff] %v4703_v14  ;;  %v4707_v15 = vpop.eup %3668  ;;  %v5867_v43 = vld [vmem:[#allocation28_spill] sm:$0xff] }
 0x427   : > { %1651 = vadd.xlane.f32.xlu1 %v1650_v44  ;;  %v1437_v44 = vsub.f32 %v5842_v37, %v1343_v12  ;;  %v2235_v12 = vmax.f32 %v4563_v35, %v4565_v62  ;;  %v4705_v37 = vpop.f32.mrf.mxu0  ;;  %5848 = vst [vmem:[#allocation76_spill] sm:$0xff] %v4707_v15  ;;  %v4711_v54 = vpop.eup %3670 }
 0x428   : > { %5849 = vst [vmem:[#allocation77_spill] sm:$0xff] %v4711_v54  ;;  %v1638_v11 = vadd.f32 %v4711_v54, %v4707_v15 }
 0x429   : > { %1390 = vmax.xlane.f32.xlu0 %v1389_v18  ;;  %v5844_v18 = vld [vmem:[#allocation7_spill] sm:$0xff]  ;;  %v4717_v47 = vpop.f32.mrf.mxu0 }
 0x42a   : > { %v1435_v13 = vsub.f32 %v5844_v18, %v1340_v49  ;;  %5847 = vst [vmem:[#allocation7_spill] sm:$0xff] %v4705_v37  ;;  %v2232_v49 = vmax.f32 %v4559_v50, %v4561_v3 }
 0x42b   : > { %1387 = vmax.xlane.f32.xlu1 %v1386_v7  ;;  %v1504_v7 = vmul.f32 1.442695, %v1437_v44  ;;  %v1641_v44 = vadd.f32 %v4703_v14, %v4699_v23  ;;  %v4736_v23 = vpop.f32.mrf.mxu0  ;;  %v5854_v14 = vld [vmem:[#allocation21_spill] sm:$0xff] }
 0x42d   : > { %1648 = vadd.xlane.f32.xlu0 %v1647_v31  ;;  %v1500_v31 = vmul.f32 1.442695, %v1435_v13  ;;  %3682 = vpow2.f32 %v1504_v7  ;;  %v888_v13 = vld [vmem:[%s5771_s28 + $0x28] sm:$0xff]  ;;  %v4727_v7 = vpop.eup %3672  ;;  %v4747_v54 = vpop.f32.mrf.mxu0 }
 0x42e   : > { %3684 = vpow2.f32 %v1498_v41  ;;  %5850 = vst [vmem:[#allocation78_spill] sm:$0xff] %v4727_v7  ;;  %v2229_v41 = vmax.f32 %v4555_v22, %v4557_v17  ;;  %v4734_v57 = vpop.eup %3674 }
 0x42f   : > { %1645 = vadd.xlane.f32.xlu1 %v1644_v16  ;;  %v4713_v18 = vpop.xlane.xlu1 %1423  ;;  %v887_v16 = vld [vmem:[%s5771_s28 + $0x20] sm:$0xff]  ;;  %3686 = vpow2.f32 %v1500_v31  ;;  %5851 = vst [vmem:[#allocation79_spill] sm:$0xff] %v4734_v57  ;;  %v4738_v31 = vpop.eup %3676 }
 0x430   : > { %5852 = vst [vmem:[#allocation80_spill] sm:$0xff] %v4738_v31 }
 0x431   : > { %2236 = vmax.xlane.f32.xlu0 %v2235_v12  ;;  %v891_v12 = vpack.c.bf16 %v888_v13, %v887_v16  ;;  %v4742_v16 = vpop.eup %3678 }
 0x432   : > { %5853 = vst [vmem:[#allocation81_spill] sm:$0xff] %v4742_v16  ;;  %v1632_v21 = vadd.f32 %v4742_v16, %v4738_v31  ;;  %v4753_v36 = vpop.eup %3680  ;;  %v5861_v16 = vld [vmem:[#allocation27_spill] sm:$0xff] }
 0x433   : > { %2233 = vmax.xlane.f32.xlu1 %v2232_v49  ;;  %3558 = vmatmul.mubr.msk.bf16.gmra.mxu1 %vm930_vm6, %v891_v12  ;;  %5855 = vst [vmem:[#allocation21_spill] sm:$0xff] %v4753_v36 }
 0x435   : > { %1642 = vadd.xlane.f32.xlu0 %v1641_v44  ;;  %v2226_v44 = vmax.f32 %v4551_v58, %v4553_v2 }
 0x437   : > { %1639 = vadd.xlane.f32.xlu1 %v1638_v11  ;;  %v4731_v49 = vpop.xlane.xlu1 %1429  ;;  %v1635_v11 = vadd.f32 %v4734_v57, %v4727_v7  ;;  %v5857_v7 = vld [vmem:[#allocation24_spill] sm:$0xff] }
 0x438   : > { %v1490_v57 = vsub.f32 %v5857_v7, %v4713_v18  ;;  %v5865_v7 = vld [vmem:[#allocation25_spill] sm:$0xff]  ;;  %v1494_v32 = vsub.f32 %v5867_v43, %v4731_v49 }
 0x439   : > { %2230 = vmax.xlane.f32.xlu0 %v2229_v41  ;;  %v1491_v24 = vsub.f32 %v5865_v7, %v4713_v18  ;;  %v5868_v18 = vld [vmem:[#allocation22_spill] sm:$0xff]  ;;  %v5869_v7 = vld [vmem:[#allocation23_spill] sm:$0xff]  ;;  %v5872_v43 = vld [vmem:[#allocation49_spill] sm:$0xff] }
 0x43b   : > { %2227 = vmax.xlane.f32.xlu1 %v2226_v44  ;;  %v1433_v13 = vpop.xlane.xlu0 %1432  ;;  %v1418_v15 = vpop.xlane.xlu1 %1417  ;;  %v5856_v44 = vld [vmem:[#allocation53_spill] sm:$0xff] }
 0x43c   : > { %v1486_v12 = vsub.f32 %v4455_v8, %v1418_v15  ;;  %v1487_v20 = vsub.f32 %v5854_v14, %v1418_v15  ;;  %v1496_v41 = vsub.f32 %v4479_v10, %v1433_v13  ;;  %v2223_v53 = vmax.f32 %v5856_v44, %v4549_v61  ;;  %v5858_v8 = vld [vmem:[#allocation30_spill] sm:$0xff]  ;;  %v4760_v15 = vpop.eup %3682 }
 0x43d   : > { %1636 = vadd.xlane.f32.xlu0 %v1635_v11  ;;  %v1497_v45 = vsub.f32 %v5858_v8, %v1433_v13  ;;  %5859 = vst [vmem:[#allocation53_spill] sm:$0xff] %v4760_v15  ;;  %v5860_v11 = vld [vmem:[#allocation26_spill] sm:$0xff]  ;;  %v4766_v40 = vpop.eup %3684 }
 0x43e   : > { %v1602_v33 = vmul.f32 1.442695, %v1486_v12  ;;  %v1604_v3 = vmul.f32 1.442695, %v1487_v20  ;;  %v4764_v12 = vpop.f32.mrf.mxu0  ;;  %5862 = vst [vmem:[#allocation24_spill] sm:$0xff] %v4766_v40  ;;  %v4772_v20 = vpop.eup %3686 }
 0x43f   : > { %1633 = vadd.xlane.f32.xlu1 %v1632_v21  ;;  %v1427_v14 = vpop.xlane.xlu0 %1426  ;;  %5866 = vst [vmem:[#allocation30_spill] sm:$0xff] %v4772_v20  ;;  %v1622_v21 = vmul.f32 1.442695, %v1496_v41  ;;  %v1624_v26 = vmul.f32 1.442695, %v1497_v45 }
 0x440   : > { %v1492_v31 = vsub.f32 %v5860_v11, %v1427_v14  ;;  %v1493_v10 = vsub.f32 %v5861_v16, %v1427_v14  ;;  %3688 = vpow2.f32 %v1602_v33  ;;  %v1610_v11 = vmul.f32 1.442695, %v1490_v57  ;;  %v4780_v41 = vpop.f32.mrf.mxu0  ;;  %v5870_v57 = vld [vmem:[#allocation29_spill] sm:$0xff] }
 0x441   : > { %2224 = vmax.xlane.f32.xlu0 %v2223_v53  ;;  %3690 = vpow2.f32 %v1604_v3  ;;  %v1629_v14 = vadd.f32 %v4760_v15, %v4753_v36  ;;  %v1612_v33 = vmul.f32 1.442695, %v1491_v24  ;;  %v1495_v45 = vsub.f32 %v5870_v57, %v4731_v49  ;;  %v5874_v49 = vld [vmem:[#allocation47_spill] sm:$0xff]  ;;  %v1412_v57 = vpop.xlane.xlu1 %1411  ;;  %v5876_v36 = vld [vmem:[#allocation46_spill] sm:$0xff] }
 0x442   : > { %v1614_v13 = vmul.f32 1.442695, %v1492_v31  ;;  %v1616_v8 = vmul.f32 1.442695, %v1493_v10  ;;  %v1626_v3 = vadd.f32 %v4772_v20, %v4766_v40  ;;  %v5871_v31 = vld [vmem:[#allocation50_spill] sm:$0xff]  ;;  %v4788_v24 = vpop.f32.mrf.mxu0  ;;  %v5877_v40 = vld [vmem:[#allocation45_spill] sm:$0xff] }
 0x443   : > { %2221 = vmax.xlane.f32.xlu1 %v2220_v48  ;;  %v1421_v16 = vpop.xlane.xlu0 %1420  ;;  %v2217_v10 = vmax.f32 %v5872_v43, %v5871_v31  ;;  %v5880_v20 = vld [vmem:[#allocation44_spill] sm:$0xff] }
 0x444   : > { %3692 = vpow2.f32 %v1614_v13  ;;  %v1488_v53 = vsub.f32 %v5868_v18, %v1421_v16  ;;  %v1489_v2 = vsub.f32 %v5869_v7, %v1421_v16  ;;  %v1618_v18 = vmul.f32 1.442695, %v1494_v32  ;;  %v5873_v7 = vld [vmem:[#allocation48_spill] sm:$0xff]  ;;  %v5879_v32 = vld [vmem:[#allocation17_spill] sm:$0xff]  ;;  %v4797_v15 = vpop.f32.mrf.mxu0 }
 0x445   : > { %3694 = vpow2.f32 %v1616_v8  ;;  %1630 = vadd.xlane.f32.xlu0 %v1629_v14  ;;  %v2214_v8 = vmax.f32 %v5874_v49, %v5873_v7  ;;  %v1620_v14 = vmul.f32 1.442695, %v1495_v45 }
 0x446   : > { %3696 = vpow2.f32 %v1622_v21  ;;  %v1606_v48 = vmul.f32 1.442695, %v1488_v53  ;;  %v1608_v13 = vmul.f32 1.442695, %v1489_v2  ;;  %v5875_v21 = vld [vmem:[#allocation19_spill] sm:$0xff]  ;;  %v5878_v2 = vld [vmem:[#allocation20_spill] sm:$0xff] }
 0x447   : > { %3698 = vpow2.f32 %v1624_v26  ;;  %1627 = vadd.xlane.f32.xlu1 %v1626_v3  ;;  %v1415_v16 = vpop.xlane.xlu0 %1414  ;;  %v2211_v26 = vmax.f32 %v5877_v40, %v5876_v36  ;;  %v5884_v36 = vld [vmem:[#allocation42_spill] sm:$0xff] }
 0x448   : > { %3700 = vpow2.f32 %v1610_v11  ;;  %v1484_v53 = vsub.f32 %v5875_v21, %v1415_v16  ;;  %v1485_v3 = vsub.f32 %v5878_v2, %v1415_v16  ;;  %v1482_v11 = vsub.f32 %v5879_v32, %v1412_v57  ;;  %v4808_v32 = vpop.f32.mrf.mxu0 }
 0x449   : > { %3702 = vpow2.f32 %v1612_v33  ;;  %2218 = vmax.xlane.f32.xlu0 %v2217_v10  ;;  %v5881_v33 = vld [vmem:[#allocation43_spill] sm:$0xff]  ;;  %v5882_v10 = vld [vmem:[#allocation18_spill] sm:$0xff]  ;;  %5887 = vst [vmem:[#allocation25_spill] sm:$0xff] %v4808_v32 }
 0x44a   : > { %3704 = vpow2.f32 %v1606_v48  ;;  %v2208_v45 = vmax.f32 %v5881_v33, %v5880_v20  ;;  %v1483_v48 = vsub.f32 %v5882_v10, %v1412_v57  ;;  %v1598_v21 = vmul.f32 1.442695, %v1484_v53  ;;  %v5890_v20 = vld [vmem:[#allocation39_spill] sm:$0xff]  ;;  %v1406_v53 = vpop.xlane.xlu1 %1405 }
 0x44b   : > { %3706 = vpow2.f32 %v1608_v13  ;;  %2215 = vmax.xlane.f32.xlu1 %v2214_v8  ;;  %v5885_v13 = vld [vmem:[#allocation41_spill] sm:$0xff]  ;;  %v1600_v16 = vmul.f32 1.442695, %v1485_v3  ;;  %v1409_v8 = vpop.xlane.xlu0 %1408  ;;  %v1594_v2 = vmul.f32 1.442695, %v1482_v11 }
 0x44c   : > { %3708 = vpow2.f32 %v1618_v18  ;;  %v2205_v40 = vmax.f32 %v5885_v13, %v5884_v36  ;;  %v5892_v36 = vld [vmem:[#allocation15_spill] sm:$0xff] }
 0x44d   : > { %3710 = vpow2.f32 %v1620_v14  ;;  %2212 = vmax.xlane.f32.xlu0 %v2211_v26  ;;  %v4802_v31 = vpop.eup %3688  ;;  %v5889_v14 = vld [vmem:[#allocation40_spill] sm:$0xff]  ;;  %v1596_v26 = vmul.f32 1.442695, %v1483_v48  ;;  %v1480_v3 = vsub.f32 %v5892_v36, %v1409_v8  ;;  %v5896_v48 = vld [vmem:[#allocation13_spill] sm:$0xff]  ;;  %v5899_v36 = vld [vmem:[#allocation14_spill] sm:$0xff] }
 0x44e   : > { %5883 = vst [vmem:[#allocation26_spill] sm:$0xff] %v4802_v31  ;;  %v4806_v18 = vpop.eup %3690  ;;  %v2202_v57 = vmax.f32 %v5890_v20, %v5889_v14  ;;  %3712 = vpow2.f32 %v1598_v21  ;;  %v1478_v14 = vsub.f32 %v5896_v48, %v1406_v53  ;;  %v1479_v21 = vsub.f32 %v5899_v36, %v1406_v53  ;;  %v1400_v36 = vpop.xlane.xlu1 %1399 }
 0x44f   : > { %2209 = vmax.xlane.f32.xlu1 %v2208_v45  ;;  %5886 = vst [vmem:[#allocation27_spill] sm:$0xff] %v4806_v18  ;;  %3714 = vpow2.f32 %v1600_v16  ;;  %v5894_v45 = vld [vmem:[#allocation16_spill] sm:$0xff]  ;;  %v1704_v16 = vadd.f32 %v4806_v18, %v4802_v31 }
 0x450   : > { %v1481_v11 = vsub.f32 %v5894_v45, %v1409_v8  ;;  %3716 = vpow2.f32 %v1594_v2  ;;  %v1403_v2 = vpop.xlane.xlu0 %1402  ;;  %v1588_v53 = vmul.f32 1.442695, %v1479_v21  ;;  %v5906_v18 = vld [vmem:[#allocation12_spill] sm:$0xff] }
 0x451   : > { %v4810_v7 = vpop.eup %3692  ;;  %2206 = vmax.xlane.f32.xlu0 %v2205_v40  ;;  %v4825_v40 = vpop.f32.mrf.mxu0  ;;  %3718 = vpow2.f32 %v1596_v26  ;;  %v1586_v26 = vmul.f32 1.442695, %v1478_v14 }
 0x452   : > { %5888 = vst [vmem:[#allocation28_spill] sm:$0xff] %v4810_v7  ;;  %v4814_v10 = vpop.eup %3694  ;;  %5897 = vst [vmem:[#allocation19_spill] sm:$0xff] %v4825_v40 }
 0x453   : > { %5891 = vst [vmem:[#allocation22_spill] sm:$0xff] %v4814_v10  ;;  %v4817_v13 = vpop.eup %3696  ;;  %2203 = vmax.xlane.f32.xlu1 %v2202_v57  ;;  %v1713_v33 = vadd.f32 %v4814_v10, %v4810_v7  ;;  %v1590_v57 = vmul.f32 1.442695, %v1480_v3  ;;  %v1592_v7 = vmul.f32 1.442695, %v1481_v11  ;;  %v4840_v43 = vpop.f32.mrf.mxu0  ;;  %v5905_v11 = vld [vmem:[#allocation11_spill] sm:$0xff] }
 0x454   : > { %5893 = vst [vmem:[#allocation23_spill] sm:$0xff] %v4817_v13  ;;  %v4822_v49 = vpop.eup %3698 }
 0x455   : > { %5895 = vst [vmem:[#allocation29_spill] sm:$0xff] %v4822_v49  ;;  %v4827_v20 = vpop.eup %3700  ;;  %1714 = vadd.xlane.f32.xlu0 %v1713_v33  ;;  %v1719_v48 = vadd.f32 %v4822_v49, %v4817_v13  ;;  %3720 = vpow2.f32 %v1590_v57  ;;  %v1477_v13 = vsub.f32 %v5906_v18, %v1403_v2  ;;  %v5907_v49 = vld [vmem:[#allocation9_spill] sm:$0xff]  ;;  %v4853_v37 = vpop.f32.mrf.mxu0  ;;  %v5910_v18 = vld [vmem:[#allocation38_spill] sm:$0xff] }
 0x456   : > { %5898 = vst [vmem:[#allocation20_spill] sm:$0xff] %v4827_v20  ;;  %v4832_v8 = vpop.eup %3702  ;;  %3722 = vpow2.f32 %v1592_v7  ;;  %v1474_v21 = vsub.f32 %v5907_v49, %v1400_v36 }
 0x457   : > { %5900 = vst [vmem:[#allocation17_spill] sm:$0xff] %v4832_v8  ;;  %v4834_v45 = vpop.eup %3704  ;;  %1705 = vadd.xlane.f32.xlu1 %v1704_v16  ;;  %v1710_v3 = vadd.f32 %v4832_v8, %v4827_v20  ;;  %v1476_v16 = vsub.f32 %v5905_v11, %v1403_v2  ;;  %3724 = vpow2.f32 %v1586_v26  ;;  %v5911_v2 = vld [vmem:[#allocation37_spill] sm:$0xff]  ;;  %v1584_v8 = vmul.f32 1.442695, %v1477_v13 }
 0x458   : > { %5901 = vst [vmem:[#allocation18_spill] sm:$0xff] %v4834_v45  ;;  %v4838_v10 = vpop.eup %3706  ;;  %3726 = vpow2.f32 %v1588_v53  ;;  %v1578_v49 = vmul.f32 1.442695, %v1474_v21 }
 0x459   : > { %5902 = vst [vmem:[#allocation15_spill] sm:$0xff] %v4838_v10  ;;  %v4842_v33 = vpop.eup %3708  ;;  %1720 = vadd.xlane.f32.xlu0 %v1719_v48  ;;  %v1707_v14 = vadd.f32 %v4838_v10, %v4834_v45  ;;  %v5908_v48 = vld [vmem:[#allocation10_spill] sm:$0xff]  ;;  %v1582_v11 = vmul.f32 1.442695, %v1476_v16  ;;  %v4864_v45 = vpop.f32.mrf.mxu0 }
 0x45a   : > { %5903 = vst [vmem:[#allocation16_spill] sm:$0xff] %v4842_v33  ;;  %v4846_v31 = vpop.eup %3710  ;;  %v1475_v20 = vsub.f32 %v5908_v48, %v1400_v36  ;;  %5913 = vst [vmem:[#allocation12_spill] sm:$0xff] %v4864_v45  ;;  %v5915_v36 = vld [vmem:[#allocation36_spill] sm:$0xff] }
 0x45b   : > { %5904 = vst [vmem:[#allocation13_spill] sm:$0xff] %v4846_v31  ;;  %1711 = vadd.xlane.f32.xlu1 %v1710_v3  ;;  %v1716_v57 = vadd.f32 %v4846_v31, %v4842_v33  ;;  %v4858_v7 = vpop.eup %3712  ;;  %v2199_v3 = vmax.f32 %v5911_v2, %v5910_v18  ;;  %3728 = vpow2.f32 %v1582_v11 }
 0x45c   : > { %5909 = vst [vmem:[#allocation14_spill] sm:$0xff] %v4858_v7  ;;  %v4862_v26 = vpop.eup %3714  ;;  %v1580_v10 = vmul.f32 1.442695, %v1475_v20  ;;  %3730 = vpow2.f32 %v1584_v8  ;;  %v5920_v20 = vld [vmem:[#allocation34_spill] sm:$0xff] }
 0x45d   : > { %1708 = vadd.xlane.f32.xlu0 %v1707_v14  ;;  %5912 = vst [vmem:[#allocation11_spill] sm:$0xff] %v4862_v26  ;;  %v4866_v53 = vpop.eup %3716  ;;  %v5916_v14 = vld [vmem:[#allocation35_spill] sm:$0xff]  ;;  %v1701_v13 = vadd.f32 %v4862_v26, %v4858_v7  ;;  %3732 = vpow2.f32 %v1578_v49  ;;  %v5924_v49 = vld [vmem:[#allocation32_spill] sm:$0xff] }
 0x45e   : > { %5914 = vst [vmem:[#allocation9_spill] sm:$0xff] %v4866_v53  ;;  %v2196_v48 = vmax.f32 %v5916_v14, %v5915_v36  ;;  %v4870_v16 = vpop.eup %3718  ;;  %3734 = vpow2.f32 %v1580_v10  ;;  %v5925_v7 = vld [vmem:[#allocation31_spill] sm:$0xff] }
 0x45f   : > { %1717 = vadd.xlane.f32.xlu1 %v1716_v57  ;;  %5917 = vst [vmem:[#allocation10_spill] sm:$0xff] %v4870_v16  ;;  %v4874_v57 = vpop.f32.mrf.mxu0  ;;  %v1698_v21 = vadd.f32 %v4870_v16, %v4866_v53  ;;  %v2190_v26 = vmax.f32 %v5925_v7, %v5924_v49 }
 0x460   : > { %5918 = vst [vmem:[#allocation38_spill] sm:$0xff] %v4874_v57 }
 0x461   : > { %2200 = vmax.xlane.f32.xlu0 %v2199_v3  ;;  %v5921_v3 = vld [vmem:[#allocation33_spill] sm:$0xff]  ;;  %v4884_v8 = vpop.f32.mrf.mxu0 }
 0x462   : > { %v4878_v33 = vpop.eup %3720  ;;  %v2193_v31 = vmax.f32 %v5921_v3, %v5920_v20 }
 0x463   : > { %2197 = vmax.xlane.f32.xlu1 %v2196_v48  ;;  %5919 = vst [vmem:[#allocation37_spill] sm:$0xff] %v4878_v33  ;;  %v4882_v11 = vpop.eup %3722  ;;  %v4894_v53 = vpop.f32.mrf.mxu0 }
 0x464   : > { %5922 = vst [vmem:[#allocation36_spill] sm:$0xff] %v4882_v11  ;;  %v4886_v48 = vpop.eup %3724  ;;  %v2283_v20 = vmax.f32 %v4884_v8, %v4894_v53 }
 0x465   : > { %1702 = vadd.xlane.f32.xlu0 %v1701_v13  ;;  %5923 = vst [vmem:[#allocation35_spill] sm:$0xff] %v4886_v48  ;;  %v4890_v10 = vpop.eup %3726  ;;  %v1695_v13 = vadd.f32 %v4882_v11, %v4878_v33  ;;  %v2274_v11 = vmax.f32 %v4808_v32, %v4825_v40 }
 0x466   : > { %5926 = vst [vmem:[#allocation32_spill] sm:$0xff] %v4890_v10 }
 0x467   : > { %1699 = vadd.xlane.f32.xlu1 %v1698_v21  ;;  %v1692_v21 = vadd.f32 %v4890_v10, %v4886_v48 }
 0x468   : > { %v4898_v16 = vpop.eup %3728 }
 0x469   : > { %2194 = vmax.xlane.f32.xlu0 %v2193_v31  ;;  %5927 = vst [vmem:[#allocation31_spill] sm:$0xff] %v4898_v16  ;;  %v4902_v3 = vpop.eup %3730 }
 0x46a   : > { %5928 = vst [vmem:[#allocation82_spill] sm:$0xff] %v4902_v3  ;;  %v4904_v31 = vpop.eup %3732 }
 0x46b   : > { %2191 = vmax.xlane.f32.xlu1 %v2190_v26  ;;  %5929 = vst [vmem:[#allocation83_spill] sm:$0xff] %v4904_v31  ;;  %v2280_v26 = vmax.f32 %v4864_v45, %v4874_v57  ;;  %v4908_v33 = vpop.eup %3734 }
 0x46c   : > { %5930 = vst [vmem:[#allocation84_spill] sm:$0xff] %v4908_v33  ;;  %v1686_v48 = vadd.f32 %v4908_v33, %v4904_v31 }
 0x46d   : > { %1696 = vadd.xlane.f32.xlu0 %v1695_v13  ;;  %v1689_v13 = vadd.f32 %v4902_v3, %v4898_v16 }
 0x46f   : > { %1693 = vadd.xlane.f32.xlu1 %v1692_v21  ;;  %v2277_v21 = vmax.f32 %v4840_v43, %v4853_v37 }
 0x471   : > { %2284 = vmax.xlane.f32.xlu0 %v2283_v20 }
 0x473   : > { %2281 = vmax.xlane.f32.xlu1 %v2280_v26 }
 0x475   : > { %1690 = vadd.xlane.f32.xlu0 %v1689_v13 }
 0x477   : > { %1687 = vadd.xlane.f32.xlu1 %v1686_v48 }
 0x479   : > { %2278 = vmax.xlane.f32.xlu0 %v2277_v21 }
 0x47b   : > { %2275 = vmax.xlane.f32.xlu1 %v2274_v11 }
 0x49e   : > { %v1667_v20 = vpop.xlane.xlu0 %1666 }
 0x4a0   : > { %v1658_v10 = vpop.xlane.xlu1 %1657 }
 0x4a2   : > { %v1673_v57 = vpop.xlane.xlu0 %1672 }
 0x4a3   : > { %3736 = vrcp.f32 %v1673_v57 }
 0x4a4   : > { %v1664_v26 = vpop.xlane.xlu1 %1663 }
 0x4a5   : > { %3738 = vrcp.f32 %v1664_v26 }
 0x4a6   : > { %v1661_v16 = vpop.xlane.xlu0 %1660  ;;  %3740 = vrcp.f32 %v1667_v20 }
 0x4a8   : > { %v1670_v13 = vpop.xlane.xlu1 %1669 }
 0x4a9   : > { %3742 = vrcp.f32 %v1670_v13 }
 0x4aa   : > { %v1397_v31 = vpop.xlane.xlu0 %1396  ;;  %3744 = vrcp.f32 %v1658_v10 }
 0x4ab   : > { %v1472_v3 = vsub.f32 %v4413_v5, %v1397_v31  ;;  %v1473_v48 = vsub.f32 %v4415_v6, %v1397_v31  ;;  %3746 = vrcp.f32 %v1661_v16 }
 0x4ac   : > { %v1394_v33 = vpop.xlane.xlu1 %1393 }
 0x4ad   : > { %v1574_v40 = vmul.f32 1.442695, %v1472_v3  ;;  %v1576_v21 = vmul.f32 1.442695, %v1473_v48  ;;  %v1470_v11 = vsub.f32 %v4405_v63, %v1394_v33  ;;  %v1471_v32 = vsub.f32 %v4407_v1, %v1394_v33 }
 0x4ae   : > { %v1655_v57 = vpop.xlane.xlu0 %1654 }
 0x4af   : > { %3748 = vpow2.f32 %v1574_v40  ;;  %v1570_v26 = vmul.f32 1.442695, %v1470_v11  ;;  %v1572_v20 = vmul.f32 1.442695, %v1471_v32 }
 0x4b0   : > { %3750 = vpow2.f32 %v1576_v21  ;;  %v1652_v13 = vpop.xlane.xlu1 %1651  ;;  %v3737_v45 = vpop.eup %3736 }
 0x4b1   : > { %3752 = vpow2.f32 %v1570_v26  ;;  %v1785_v21 = vmul.f32 %v3737_v45, %v4601_v52 }
 0x4b2   : > { %3754 = vpow2.f32 %v1572_v20  ;;  %v1391_v5 = vpop.xlane.xlu0 %1390  ;;  %v3739_v6 = vpop.eup %3738 }
 0x4b3   : > { %v1468_v10 = vsub.f32 %v4397_v59, %v1391_v5  ;;  %v1469_v3 = vsub.f32 %v4399_v60, %v1391_v5  ;;  %3756 = vrcp.f32 %v1655_v57  ;;  %v3741_v31 = vpop.eup %3740  ;;  %v1779_v11 = vmul.f32 %v3739_v6, %v4625_v28 }
 0x4b4   : > { %v1388_v63 = vpop.xlane.xlu1 %1387  ;;  %3758 = vrcp.f32 %v1652_v13  ;;  %v1781_v13 = vmul.f32 %v3741_v31, %v4607_v29 }
 0x4b5   : > { %v1566_v1 = vmul.f32 1.442695, %v1468_v10  ;;  %v1568_v33 = vmul.f32 1.442695, %v1469_v3  ;;  %v1466_v40 = vsub.f32 %v4389_v55, %v1388_v63  ;;  %v1467_v32 = vsub.f32 %v4391_v56, %v1388_v63 }
 0x4b6   : > { %v3743_v16 = vpop.eup %3742  ;;  %v1649_v48 = vpop.xlane.xlu0 %1648  ;;  %v1784_v55 = vmul.f32 %v3737_v45, %v4599_v9  ;;  %v1831_v3 = vpack.c.bf16 %v1781_v13, %v1779_v11 }
 0x4b7   : > { %3760 = vpow2.f32 %v1566_v1  ;;  %v1562_v59 = vmul.f32 1.442695, %v1466_v40  ;;  %v1564_v26 = vmul.f32 1.442695, %v1467_v32  ;;  %v1783_v60 = vmul.f32 %v3743_v16, %v4639_v51  ;;  %v4931_v5 = vpop.eup %3744 }
 0x4b8   : > { %3762 = vpow2.f32 %v1568_v33  ;;  %v1646_v57 = vpop.xlane.xlu1 %1645  ;;  %v1782_v20 = vmul.f32 %v3743_v16, %v4635_v25  ;;  %v3747_v10 = vpop.eup %3746  ;;  %v1778_v1 = vmul.f32 %v3739_v6, %v4620_v39  ;;  %v2271_v39 = vmax.f32 %v4788_v24, %v4797_v15 }
 0x4b9   : > { %3764 = vpow2.f32 %v1562_v59  ;;  %v1833_v56 = vpack.c.bf16 %v1785_v21, %v1783_v60  ;;  %v1777_v40 = vmul.f32 %v3747_v10, %v4631_v42  ;;  %v1780_v21 = vmul.f32 %v3741_v31, %v4605_v46 }
 0x4ba   : > { %3766 = vpow2.f32 %v1564_v26  ;;  %v2237_v52 = vpop.xlane.xlu0 %2236  ;;  %v1832_v28 = vpack.c.bf16 %v1784_v55, %v1782_v20  ;;  %v1775_v59 = vmul.f32 %v4931_v5, %v4615_v38  ;;  %v2268_v38 = vmax.f32 %v4764_v12, %v4780_v41 }
 0x4bb   : > { %1850 = vmatprep.subr.bf16.mxu1 %v1833_v56  ;;  %3768 = vrcp.f32 %v1649_v48  ;;  %v2316_v48 = vsub.f32 %v4563_v35, %v2237_v52  ;;  %v2317_v6 = vsub.f32 %v4565_v62, %v2237_v52  ;;  %v1830_v26 = vpack.c.bf16 %v1780_v21, %v1778_v1 }
 0x4bc   : > { %v4934_v63 = vpop.eup %3748  ;;  %1851 = vmatpush1.bf16.xpose.msra.mxu1 %v1832_v28  ;;  %v4936_v51 = vpop.xlane.xlu1 %2233  ;;  %3770 = vrcp.f32 %v1646_v57  ;;  %v1829_v31 = vpack.c.bf16 %v1777_v40, %v1775_v59  ;;  %v1774_v21 = vmul.f32 %v4931_v5, %v4610_v30 }
 0x4bd   : > { %v4938_v25 = vpop.eup %3750  ;;  %1852 = vmatprep.subr.bf16.mxu1 %v1831_v3  ;;  %v2314_v57 = vsub.f32 %v4559_v50, %v4936_v51  ;;  %v2410_v56 = vmul.f32 1.442695, %v2316_v48  ;;  %v1776_v3 = vmul.f32 %v3747_v10, %v4627_v34  ;;  %v2259_v34 = vmax.f32 %v4681_v19, %v4694_v4 }
 0x4be   : > { %v4940_v9 = vpop.eup %3752  ;;  %v1643_v45 = vpop.xlane.xlu0 %1642  ;;  %v1683_v29 = vadd.f32 %v4938_v25, %v4934_v63  ;;  %v2265_v10 = vmax.f32 %v4736_v23, %v4747_v54 }
 0x4bf   : > { %v4945_v33 = vpop.eup %3754  ;;  %3772 = vrcp.f32 %v1643_v45  ;;  %v2406_v1 = vmul.f32 1.442695, %v2314_v57  ;;  %v1828_v48 = vpack.c.bf16 %v1776_v3, %v1774_v21  ;;  %v5934_v57 = vld [vmem:[#allocation54_spill] sm:$0xff]  ;;  %v5941_v21 = vld [vmem:[#allocation71_spill] sm:$0xff] }
 0x4c0   : > { %v1640_v32 = vpop.xlane.xlu1 %1639  ;;  %1684 = vadd.xlane.f32.xlu0 %v1683_v29  ;;  %v1680_v16 = vadd.f32 %v4945_v33, %v4940_v9  ;;  %v3757_v11 = vpop.eup %3756  ;;  %v5938_v3 = vld [vmem:[#allocation70_spill] sm:$0xff] }
 0x4c1   : > { %v4957_v60 = vpop.eup %3758  ;;  %3774 = vrcp.f32 %v1640_v32  ;;  %v1773_v40 = vmul.f32 %v3757_v11, %v4655_v0 }
 0x4c2   : > { %1681 = vadd.xlane.f32.xlu1 %v1680_v16  ;;  %v2231_v42 = vpop.xlane.xlu0 %2230  ;;  %v1771_v45 = vmul.f32 %v4957_v60, %v4663_v27 }
 0x4c3   : > { %v2312_v46 = vsub.f32 %v4555_v22, %v2231_v42  ;;  %v2313_v35 = vsub.f32 %v4557_v17, %v2231_v42  ;;  %v2412_v17 = vmul.f32 1.442695, %v2317_v6  ;;  %v5933_v42 = vld [vmem:[#allocation7_spill] sm:$0xff] }
 0x4c4   : > { %v4963_v20 = vpop.eup %3760  ;;  %1853 = vmatpush1.bf16.xpose.msra.mxu1 %v1830_v26  ;;  %v4967_v62 = vpop.xlane.xlu1 %2227  ;;  %2272 = vmax.xlane.f32.xlu0 %v2271_v39  ;;  %v1827_v5 = vpack.c.bf16 %v1773_v40, %v1771_v45  ;;  %v2262_v26 = vmax.f32 %v5933_v42, %v4717_v47 }
 0x4c5   : > { %v4969_v55 = vpop.eup %3762  ;;  %v2402_v13 = vmul.f32 1.442695, %v2312_v46  ;;  %v2404_v50 = vmul.f32 1.442695, %v2313_v35  ;;  %1854 = vmatprep.subr.bf16.mxu1 %v1829_v31  ;;  %v2310_v0 = vsub.f32 %v4551_v58, %v4967_v62  ;;  %v2311_v46 = vsub.f32 %v5934_v57, %v4967_v62  ;;  %v5935_v35 = vld [vmem:[#allocation68_spill] sm:$0xff] }
 0x4c6   : > { %v4971_v22 = vpop.eup %3764  ;;  %2269 = vmax.xlane.f32.xlu1 %v2268_v38  ;;  %v1637_v52 = vpop.xlane.xlu0 %1636  ;;  %v1677_v28 = vadd.f32 %v4969_v55, %v4963_v20  ;;  %v1772_v31 = vmul.f32 %v3757_v11, %v5935_v35  ;;  %v1770_v62 = vmul.f32 %v4957_v60, %v5938_v3  ;;  %v5940_v11 = vld [vmem:[#allocation75_spill] sm:$0xff] }
 0x4c7   : > { %5931 = vst [vmem:[#allocation85_spill] sm:$0xff] %v4971_v22  ;;  %v4976_v29 = vpop.eup %3766  ;;  %3776 = vpow2.f32 %v2402_v13  ;;  %v5936_v13 = vld [vmem:[#allocation51_spill] sm:$0xff] }
 0x4c8   : > { %5932 = vst [vmem:[#allocation86_spill] sm:$0xff] %v4976_v29  ;;  %3778 = vpow2.f32 %v2404_v50  ;;  %v1634_v16 = vpop.xlane.xlu1 %1633  ;;  %1678 = vadd.xlane.f32.xlu0 %v1677_v28  ;;  %v1674_v32 = vadd.f32 %v4976_v29, %v4971_v22  ;;  %v3769_v59 = vpop.eup %3768  ;;  %v5937_v50 = vld [vmem:[#allocation52_spill] sm:$0xff]  ;;  %v5944_v60 = vld [vmem:[#allocation67_spill] sm:$0xff] }
 0x4c9   : > { %3780 = vpow2.f32 %v2410_v56  ;;  %v3771_v6 = vpop.eup %3770 }
 0x4ca   : > { %3782 = vpow2.f32 %v2412_v17  ;;  %1675 = vadd.xlane.f32.xlu1 %v1674_v32  ;;  %v2225_v27 = vpop.xlane.xlu0 %2224  ;;  %v2398_v17 = vmul.f32 1.442695, %v2310_v0  ;;  %v1767_v32 = vmul.f32 %v3771_v6, %v5940_v11  ;;  %v2400_v0 = vmul.f32 1.442695, %v2311_v46  ;;  %v5948_v46 = vld [vmem:[#allocation64_spill] sm:$0xff] }
 0x4cb   : > { %3784 = vpow2.f32 %v2406_v1  ;;  %v2308_v39 = vsub.f32 %v5856_v44, %v2225_v27  ;;  %v2309_v30 = vsub.f32 %v4549_v61, %v2225_v27 }
 0x4cc   : > { %3786 = vrcp.f32 %v1637_v52  ;;  %1855 = vmatpush1.bf16.xpose.msra.mxu1 %v1828_v48  ;;  %v2222_v58 = vpop.xlane.xlu1 %2221  ;;  %2266 = vmax.xlane.f32.xlu0 %v2265_v10  ;;  %v5939_v52 = vld [vmem:[#allocation73_spill] sm:$0xff]  ;;  %v5943_v48 = vld [vmem:[#allocation55_spill] sm:$0xff] }
 0x4cd   : > { %v2394_v38 = vmul.f32 1.442695, %v2308_v39  ;;  %v2396_v56 = vmul.f32 1.442695, %v2309_v30  ;;  %v2306_v44 = vsub.f32 %v5936_v13, %v2222_v58  ;;  %v2307_v61 = vsub.f32 %v5937_v50, %v2222_v58  ;;  %1856 = vmatprep.subr.bf16.mxu1 %v1827_v5  ;;  %v5942_v10 = vld [vmem:[#allocation69_spill] sm:$0xff]  ;;  %v5008_v30 = vpop.eup %3772  ;;  %v5945_v5 = vld [vmem:[#allocation66_spill] sm:$0xff] }
 0x4ce   : > { %3788 = vrcp.f32 %v1634_v16  ;;  %2263 = vmax.xlane.f32.xlu1 %v2262_v26  ;;  %v1631_v28 = vpop.xlane.xlu0 %1630  ;;  %v1769_v1 = vmul.f32 %v3769_v59, %v5939_v52  ;;  %v2256_v27 = vmax.f32 %v5942_v10, %v5941_v21  ;;  %v2315_v39 = vsub.f32 %v5943_v48, %v4936_v51  ;;  %v3775_v35 = vpop.eup %3774  ;;  %v5947_v51 = vld [vmem:[#allocation65_spill] sm:$0xff]  ;;  %v5949_v50 = vld [vmem:[#allocation72_spill] sm:$0xff] }
 0x4cf   : > { %3790 = vpow2.f32 %v2394_v38  ;;  %v2390_v45 = vmul.f32 1.442695, %v2306_v44  ;;  %v2392_v40 = vmul.f32 1.442695, %v2307_v61  ;;  %v2253_v26 = vmax.f32 %v5945_v5, %v5944_v60  ;;  %v5951_v52 = vld [vmem:[#allocation49_spill] sm:$0xff] }
 0x4d0   : > { %3792 = vpow2.f32 %v2396_v56  ;;  %v1628_v16 = vpop.xlane.xlu1 %1627  ;;  %2260 = vmax.xlane.f32.xlu0 %v2259_v34  ;;  %v1826_v58 = vpack.c.bf16 %v1772_v31, %v1770_v62  ;;  %v1825_v38 = vpack.c.bf16 %v1769_v1, %v1767_v32  ;;  %v2250_v56 = vmax.f32 %v5948_v46, %v5947_v51  ;;  %v5952_v31 = vld [vmem:[#allocation47_spill] sm:$0xff] }
 0x4d1   : > { %3794 = vpow2.f32 %v2390_v45  ;;  %v2408_v44 = vmul.f32 1.442695, %v2315_v39  ;;  %v1768_v61 = vmul.f32 %v3769_v59, %v5949_v50 }
 0x4d2   : > { %3796 = vpow2.f32 %v2392_v40  ;;  %2257 = vmax.xlane.f32.xlu1 %v2256_v27  ;;  %v2219_v57 = vpop.xlane.xlu0 %2218  ;;  %v5954_v40 = vld [vmem:[#allocation74_spill] sm:$0xff] }
 0x4d3   : > { %3798 = vpow2.f32 %v2398_v17  ;;  %v2304_v45 = vsub.f32 %v5951_v52, %v2219_v57  ;;  %v5953_v17 = vld [vmem:[#allocation48_spill] sm:$0xff]  ;;  %v1766_v11 = vmul.f32 %v3771_v6, %v5954_v40  ;;  %v5956_v27 = vld [vmem:[#allocation50_spill] sm:$0xff]  ;;  %v5959_v6 = vld [vmem:[#allocation77_spill] sm:$0xff] }
 0x4d4   : > { %v5012_v13 = vpop.eup %3776  ;;  %3800 = vpow2.f32 %v2400_v0  ;;  %1857 = vmatpush1.bf16.xpose.msra.mxu1 %v1826_v58  ;;  %v2216_v34 = vpop.xlane.xlu1 %2215  ;;  %2254 = vmax.xlane.f32.xlu0 %v2253_v26  ;;  %v2305_v48 = vsub.f32 %v5956_v27, %v2219_v57  ;;  %v5957_v0 = vld [vmem:[#allocation6_spill] sm:$0xff]  ;;  %v1763_v50 = vmul.f32 %v3775_v35, %v5959_v6 }
 0x4d5   : > { %5946 = vst [vmem:[#allocation7_spill] sm:$0xff] %v5012_v13  ;;  %v5017_v3 = vpop.eup %3778  ;;  %v2302_v62 = vsub.f32 %v5952_v31, %v2216_v34  ;;  %v2303_v1 = vsub.f32 %v5953_v17, %v2216_v34  ;;  %1858 = vmatprep.subr.bf16.mxu1 %v1825_v38  ;;  %3802 = vrcp.f32 %v1631_v28  ;;  %v1765_v26 = vmul.f32 %v5008_v30, %v5957_v0 }
 0x4d6   : > { %5950 = vst [vmem:[#allocation54_spill] sm:$0xff] %v5017_v3  ;;  %v5023_v32 = vpop.eup %3780  ;;  %2251 = vmax.xlane.f32.xlu1 %v2250_v56  ;;  %v5026_v39 = vpop.xlane.xlu0 %2212  ;;  %v2517_v59 = vadd.f32 %v5017_v3, %v5012_v13  ;;  %3804 = vrcp.f32 %v1628_v16  ;;  %v2386_v56 = vmul.f32 1.442695, %v2304_v45  ;;  %v2388_v31 = vmul.f32 1.442695, %v2305_v48  ;;  %v5969_v3 = vld [vmem:[#allocation81_spill] sm:$0xff] }
 0x4d7   : > { %5955 = vst [vmem:[#allocation68_spill] sm:$0xff] %v5023_v32  ;;  %v5032_v58 = vpop.eup %3782  ;;  %v2382_v38 = vmul.f32 1.442695, %v2302_v62  ;;  %v2384_v34 = vmul.f32 1.442695, %v2303_v1  ;;  %3806 = vpow2.f32 %v2408_v44  ;;  %v1824_v40 = vpack.c.bf16 %v1768_v61, %v1766_v11  ;;  %v5960_v1 = vld [vmem:[#allocation45_spill] sm:$0xff] }
 0x4d8   : > { %5958 = vst [vmem:[#allocation51_spill] sm:$0xff] %v5032_v58  ;;  %v5035_v52 = vpop.eup %3784  ;;  %v2210_v28 = vpop.xlane.xlu1 %2209  ;;  %2518 = vadd.xlane.f32.xlu0 %v2517_v59  ;;  %v2523_v16 = vadd.f32 %v5032_v58, %v5023_v32  ;;  %v2300_v27 = vsub.f32 %v5960_v1, %v5026_v39  ;;  %v1823_v0 = vpack.c.bf16 %v1765_v26, %v1763_v50  ;;  %v5962_v59 = vld [vmem:[#allocation43_spill] sm:$0xff]  ;;  %v5964_v61 = vld [vmem:[#allocation44_spill] sm:$0xff] }
 0x4d9   : > { %v5037_v57 = vpop.eup %3786  ;;  %3808 = vpow2.f32 %v2382_v38  ;;  %v2298_v6 = vsub.f32 %v5962_v59, %v2210_v28  ;;  %v2299_v11 = vsub.f32 %v5964_v61, %v2210_v28  ;;  %v5966_v50 = vld [vmem:[#allocation76_spill] sm:$0xff]  ;;  %v5970_v32 = vld [vmem:[#allocation79_spill] sm:$0xff] }
 0x4da   : > { %3810 = vpow2.f32 %v2384_v34  ;;  %v5039_v17 = vpop.xlane.xlu0 %2206  ;;  %v1762_v1 = vmul.f32 %v3775_v35, %v5966_v50  ;;  %v5967_v59 = vld [vmem:[#allocation8_spill] sm:$0xff]  ;;  %v1761_v28 = vmul.f32 %v5037_v57, %v5970_v32 }
 0x4db   : > { %v3789_v62 = vpop.eup %3788  ;;  %3812 = vpow2.f32 %v2386_v56 }
 0x4dc   : > { %v5045_v44 = vpop.eup %3790  ;;  %1859 = vmatpush1.bf16.xpose.msra.mxu1 %v1824_v40  ;;  %v5048_v45 = vpop.xlane.xlu1 %2203  ;;  %2524 = vadd.xlane.f32.xlu0 %v2523_v16  ;;  %3814 = vpow2.f32 %v2388_v31  ;;  %v1764_v40 = vmul.f32 %v5008_v30, %v5967_v59  ;;  %v2378_v16 = vmul.f32 1.442695, %v2300_v27  ;;  %v1759_v56 = vmul.f32 %v3789_v62, %v5969_v3  ;;  %v5973_v30 = vld [vmem:[#allocation46_spill] sm:$0xff]  ;;  %v5975_v3 = vld [vmem:[#allocation60_spill] sm:$0xff] }
 0x4dd   : > { %5961 = vst [vmem:[#allocation52_spill] sm:$0xff] %v5045_v44  ;;  %v5050_v48 = vpop.eup %3792  ;;  %1860 = vmatprep.subr.bf16.mxu1 %v1823_v0  ;;  %v2374_v31 = vmul.f32 1.442695, %v2298_v6  ;;  %v2301_v59 = vsub.f32 %v5973_v30, %v5026_v39  ;;  %v2376_v27 = vmul.f32 1.442695, %v2299_v11  ;;  %v5976_v39 = vld [vmem:[#allocation63_spill] sm:$0xff] }
 0x4de   : > { %5963 = vst [vmem:[#allocation70_spill] sm:$0xff] %v5050_v48  ;;  %v5053_v38 = vpop.eup %3794  ;;  %v1715_v34 = vpop.xlane.xlu0 %1714  ;;  %v2511_v26 = vadd.f32 %v5050_v48, %v5045_v44  ;;  %v5974_v44 = vld [vmem:[#allocation61_spill] sm:$0xff]  ;;  %v1822_v58 = vpack.c.bf16 %v1764_v40, %v1762_v1  ;;  %3816 = vpow2.f32 %v2378_v16  ;;  %v1821_v6 = vpack.c.bf16 %v1761_v28, %v1759_v56  ;;  %v5977_v11 = vld [vmem:[#allocation62_spill] sm:$0xff]  ;;  %v5978_v1 = vld [vmem:[#allocation39_spill] sm:$0xff] }
 0x4df   : > { %5965 = vst [vmem:[#allocation73_spill] sm:$0xff] %v5053_v38  ;;  %v5060_v13 = vpop.eup %3796  ;;  %v2244_v48 = vmax.f32 %v5975_v3, %v5974_v44  ;;  %3818 = vpow2.f32 %v2374_v31  ;;  %v2247_v30 = vmax.f32 %v5977_v11, %v5976_v39  ;;  %v2380_v44 = vmul.f32 1.442695, %v2301_v59  ;;  %v5981_v28 = vld [vmem:[#allocation80_spill] sm:$0xff]  ;;  %v5984_v59 = vld [vmem:[#allocation30_spill] sm:$0xff]  ;;  %v5986_v39 = vld [vmem:[#allocation41_spill] sm:$0xff] }
 0x4e0   : > { %5968 = vst [vmem:[#allocation75_spill] sm:$0xff] %v5060_v13  ;;  %v5065_v0 = vpop.eup %3798  ;;  %v5067_v61 = vpop.xlane.xlu1 %1705  ;;  %2512 = vadd.xlane.f32.xlu0 %v2511_v26  ;;  %v2508_v35 = vadd.f32 %v5060_v13, %v5053_v38  ;;  %3820 = vpow2.f32 %v2376_v27  ;;  %v2294_v40 = vsub.f32 %v5978_v1, %v5048_v45  ;;  %v1758_v31 = vmul.f32 %v3789_v62, %v5981_v28  ;;  %v5985_v1 = vld [vmem:[#allocation53_spill] sm:$0xff]  ;;  %v5987_v62 = vld [vmem:[#allocation42_spill] sm:$0xff] }
 0x4e1   : > { %5971 = vst [vmem:[#allocation71_spill] sm:$0xff] %v5065_v0  ;;  %v5071_v50 = vpop.eup %3800  ;;  %v2296_v11 = vsub.f32 %v5986_v39, %v5039_v17 }
 0x4e2   : > { %5972 = vst [vmem:[#allocation69_spill] sm:$0xff] %v5071_v50  ;;  %2509 = vadd.xlane.f32.xlu1 %v2508_v35  ;;  %v1721_v32 = vpop.xlane.xlu0 %1720  ;;  %v3803_v22 = vpop.eup %3802  ;;  %v2514_v38 = vadd.f32 %v5071_v50, %v5065_v0  ;;  %v5982_v35 = vld [vmem:[#allocation78_spill] sm:$0xff] }
 0x4e3   : > { %v3805_v29 = vpop.eup %3804  ;;  %3822 = vrcp.f32 %v1721_v32  ;;  %v1760_v0 = vmul.f32 %v5037_v57, %v5982_v35  ;;  %v2297_v32 = vsub.f32 %v5987_v62, %v5039_v17  ;;  %v2366_v57 = vmul.f32 1.442695, %v2294_v40 }
 0x4e4   : > { %1861 = vmatpush1.bf16.xpose.msra.mxu1 %v1822_v58  ;;  %v1712_v26 = vpop.xlane.xlu1 %1711  ;;  %2245 = vmax.xlane.f32.xlu0 %v2244_v48  ;;  %v5079_v13 = vpop.eup %3806  ;;  %v5980_v58 = vld [vmem:[#allocation40_spill] sm:$0xff]  ;;  %v1755_v27 = vmul.f32 %v3805_v29, %v5984_v59  ;;  %v2370_v59 = vmul.f32 1.442695, %v2296_v11 }
 0x4e5   : > { %1862 = vmatprep.subr.bf16.mxu1 %v1821_v6  ;;  %v2295_v56 = vsub.f32 %v5980_v58, %v5048_v45  ;;  %3824 = vrcp.f32 %v1712_v26  ;;  %v1757_v6 = vmul.f32 %v3803_v22, %v5985_v1  ;;  %v1820_v35 = vpack.c.bf16 %v1760_v0, %v1758_v31  ;;  %v5990_v31 = vld [vmem:[#allocation24_spill] sm:$0xff] }
 0x4e6   : > { %v5085_v16 = vpop.eup %3808  ;;  %2515 = vadd.xlane.f32.xlu1 %v2514_v38  ;;  %v1709_v48 = vpop.xlane.xlu0 %1708  ;;  %3826 = vrcp.f32 %v1715_v34  ;;  %v2520_v38 = vadd.f32 %v5079_v13, %v5035_v52  ;;  %v2372_v17 = vmul.f32 1.442695, %v2297_v32 }
 0x4e7   : > { %5979 = vst [vmem:[#allocation55_spill] sm:$0xff] %v5085_v16  ;;  %v5092_v50 = vpop.eup %3810  ;;  %v2368_v26 = vmul.f32 1.442695, %v2295_v56 }
 0x4e8   : > { %5983 = vst [vmem:[#allocation67_spill] sm:$0xff] %v5092_v50  ;;  %v1718_v45 = vpop.xlane.xlu1 %1717  ;;  %2248 = vmax.xlane.f32.xlu0 %v2247_v30  ;;  %v5102_v58 = vpop.eup %3812  ;;  %v2502_v34 = vadd.f32 %v5092_v50, %v5085_v16  ;;  %v1819_v30 = vpack.c.bf16 %v1757_v6, %v1755_v27  ;;  %v6002_v16 = vld [vmem:[#allocation22_spill] sm:$0xff] }
 0x4e9   : > { %3828 = vrcp.f32 %v1718_v45  ;;  %5988 = vst [vmem:[#allocation66_spill] sm:$0xff] %v5102_v58  ;;  %v5106_v39 = vpop.eup %3814  ;;  %v1754_v45 = vmul.f32 %v3805_v29, %v5990_v31  ;;  %v5995_v29 = vld [vmem:[#allocation58_spill] sm:$0xff] }
 0x4ea   : > { %3830 = vpow2.f32 %v2380_v44  ;;  %2521 = vadd.xlane.f32.xlu1 %v2520_v38  ;;  %v2201_v28 = vpop.xlane.xlu0 %2200  ;;  %5989 = vst [vmem:[#allocation65_spill] sm:$0xff] %v5106_v39  ;;  %v2505_v0 = vadd.f32 %v5106_v39, %v5102_v58  ;;  %v5991_v38 = vld [vmem:[#allocation21_spill] sm:$0xff] }
 0x4eb   : > { %3832 = vpow2.f32 %v2366_v57  ;;  %v1756_v27 = vmul.f32 %v3803_v22, %v5991_v38  ;;  %v5114_v11 = vpop.eup %3816  ;;  %v2292_v6 = vsub.f32 %v5911_v2, %v2201_v28  ;;  %v2293_v22 = vsub.f32 %v5910_v18, %v2201_v28 }
 0x4ec   : > { %1863 = vmatpush1.bf16.xpose.msra.mxu1 %v1820_v35  ;;  %v2198_v1 = vpop.xlane.xlu1 %2197  ;;  %2503 = vadd.xlane.f32.xlu0 %v2502_v34  ;;  %3834 = vpow2.f32 %v2368_v26  ;;  %v5994_v26 = vld [vmem:[#allocation59_spill] sm:$0xff] }
 0x4ed   : > { %v2290_v40 = vsub.f32 %v5916_v14, %v2198_v1  ;;  %v2291_v44 = vsub.f32 %v5915_v36, %v2198_v1  ;;  %1864 = vmatprep.subr.bf16.mxu1 %v1819_v30  ;;  %3836 = vrcp.f32 %v1709_v48  ;;  %v5117_v36 = vpop.eup %3818  ;;  %v2241_v35 = vmax.f32 %v5995_v29, %v5994_v26 }
 0x4ee   : > { %v1703_v56 = vpop.xlane.xlu0 %1702  ;;  %3838 = vpow2.f32 %v2370_v59  ;;  %5992 = vst [vmem:[#allocation64_spill] sm:$0xff] %v5117_v36  ;;  %v5120_v57 = vpop.eup %3820  ;;  %v1818_v34 = vpack.c.bf16 %v1756_v27, %v1754_v45  ;;  %v2362_v59 = vmul.f32 1.442695, %v2292_v6  ;;  %v2364_v31 = vmul.f32 1.442695, %v2293_v22  ;;  %v5996_v45 = vld [vmem:[#allocation13_spill] sm:$0xff] }
 0x4ef   : > { %v2358_v62 = vmul.f32 1.442695, %v2290_v40  ;;  %3840 = vrcp.f32 %v5067_v61  ;;  %v2360_v32 = vmul.f32 1.442695, %v2291_v44  ;;  %5993 = vst [vmem:[#allocation72_spill] sm:$0xff] %v5120_v57  ;;  %v2496_v18 = vadd.f32 %v5120_v57, %v5117_v36  ;;  %v5997_v27 = vld [vmem:[#allocation29_spill] sm:$0xff] }
 0x4f0   : > { %v1700_v14 = vpop.xlane.xlu1 %1699  ;;  %2506 = vadd.xlane.f32.xlu0 %v2505_v0  ;;  %3842 = vpow2.f32 %v2372_v17  ;;  %v3823_v30 = vpop.eup %3822  ;;  %v6001_v36 = vld [vmem:[#allocation33_spill] sm:$0xff] }
 0x4f1   : > { %3844 = vpow2.f32 %v2358_v62  ;;  %v1817_v6 = vmul.f32 %v3823_v30, %v5997_v27  ;;  %v5998_v62 = vld [vmem:[#allocation17_spill] sm:$0xff] }
 0x4f2   : > { %v2195_v48 = vpop.xlane.xlu0 %2194  ;;  %v3825_v2 = vpop.eup %3824  ;;  %3846 = vpow2.f32 %v2360_v32 }
 0x4f3   : > { %v3827_v40 = vpop.eup %3826  ;;  %3848 = vrcp.f32 %v1703_v56  ;;  %v1811_v32 = vmul.f32 %v3825_v2, %v5998_v62  ;;  %v5999_v56 = vld [vmem:[#allocation16_spill] sm:$0xff] }
 0x4f4   : > { %1865 = vmatpush1.bf16.xpose.msra.mxu1 %v1818_v34  ;;  %v2192_v1 = vpop.xlane.xlu1 %2191  ;;  %2242 = vmax.xlane.f32.xlu0 %v2241_v35  ;;  %3850 = vrcp.f32 %v1700_v14  ;;  %v6000_v34 = vld [vmem:[#allocation23_spill] sm:$0xff]  ;;  %v2288_v14 = vsub.f32 %v6001_v36, %v2195_v48  ;;  %v1813_v27 = vmul.f32 %v3827_v40, %v6002_v16 }
 0x4f5   : > { %v2286_v61 = vsub.f32 %v5925_v7, %v2192_v1  ;;  %v2287_v44 = vsub.f32 %v5924_v49, %v2192_v1  ;;  %3852 = vpow2.f32 %v2362_v59  ;;  %v898_v49 = vld [vmem:[%s5589_s6 + $0x20] sm:$0xff]  ;;  %v1816_v1 = vmul.f32 %v3823_v30, %v6000_v34 }
 0x4f6   : > { %v3829_v0 = vpop.eup %3828  ;;  %v1697_v17 = vpop.xlane.xlu0 %1696  ;;  %3854 = vpow2.f32 %v2364_v31  ;;  %v6003_v59 = vld [vmem:[#allocation34_spill] sm:$0xff]  ;;  %v1847_v30 = vpack.c.bf16 %v1813_v27, %v1811_v32 }
 0x4f7   : > { %v5129_v28 = vpop.eup %3830  ;;  %v1815_v38 = vmul.f32 %v3829_v0, %v5996_v45  ;;  %v2350_v7 = vmul.f32 1.442695, %v2286_v61  ;;  %v1814_v22 = vmul.f32 %v3829_v0, %v5999_v56  ;;  %v2352_v57 = vmul.f32 1.442695, %v2287_v44 }
 0x4f8   : > { %v1694_v35 = vpop.xlane.xlu1 %1693  ;;  %2497 = vadd.xlane.f32.xlu0 %v2496_v18  ;;  %v5141_v58 = vpop.eup %3832  ;;  %v2289_v61 = vsub.f32 %v6003_v59, %v2195_v48  ;;  %v2499_v50 = vadd.f32 %v5129_v28, %v5114_v11  ;;  %v2354_v0 = vmul.f32 1.442695, %v2288_v14 }
 0x4f9   : > { %v1849_v45 = vpack.c.bf16 %v1817_v6, %v1815_v38  ;;  %v1848_v62 = vpack.c.bf16 %v1816_v1, %v1814_v22  ;;  %v5146_v39 = vpop.eup %3834  ;;  %3856 = vpow2.f32 %v2350_v7  ;;  %v6004_v7 = vld [vmem:[#allocation20_spill] sm:$0xff] }
 0x4fa   : > { %v2285_v18 = vpop.xlane.xlu0 %2284  ;;  %v3837_v36 = vpop.eup %3836  ;;  %3858 = vpow2.f32 %v2352_v57  ;;  %v2356_v6 = vmul.f32 1.442695, %v2289_v61  ;;  %v2490_v32 = vadd.f32 %v5146_v39, %v5141_v58  ;;  %v1810_v56 = vmul.f32 %v3825_v2, %v6004_v7  ;;  %v6006_v57 = vld [vmem:[#allocation28_spill] sm:$0xff]  ;;  %v6008_v7 = vld [vmem:[#allocation18_spill] sm:$0xff] }
 0x4fb   : > { %922 = vperm.xlu1 %3619, %v898_v49   ;;  %1866 = vmatprep.subr.bf16.mxu1 %v1849_v45  ;;  %v2348_v44 = vsub.f32 %v4884_v8, %v2285_v18  ;;  %v5149_v16 = vpop.eup %3838  ;;  %v2349_v48 = vsub.f32 %v4894_v53, %v2285_v18  ;;  %3860 = vrcp.f32 %v1697_v17  ;;  %v1812_v53 = vmul.f32 %v3827_v40, %v6006_v57  ;;  %v6007_v17 = vld [vmem:[#allocation27_spill] sm:$0xff]  ;;  %v6011_v57 = vld [vmem:[#allocation12_spill] sm:$0xff] }
 0x4fc   : > { %1867 = vmatpush2.bf16.xpose.msra.mxu1 %v1848_v62  ;;  %2500 = vadd.xlane.f32.xlu0 %v2499_v50  ;;  %v2282_v31 = vpop.xlane.xlu1 %2281  ;;  %v3841_v38 = vpop.eup %3840  ;;  %3862 = vrcp.f32 %v1694_v35  ;;  %v6005_v50 = vld [vmem:[#allocation15_spill] sm:$0xff] }
 0x4fd   : > { %1868 = vmatprep.subr.bf16.mxu1 %v1847_v30  ;;  %v5155_v8 = vpop.eup %3842  ;;  %v1809_v22 = vmul.f32 %v3837_v36, %v6005_v50  ;;  %v2474_v34 = vmul.f32 1.442695, %v2348_v44  ;;  %3864 = vpow2.f32 %v2354_v0  ;;  %v2476_v14 = vmul.f32 1.442695, %v2349_v48 }
 0x4fe   : > { %v1691_v49 = vpop.xlane.xlu0 %1690  ;;  %v5159_v1 = vpop.eup %3844  ;;  %v1807_v45 = vmul.f32 %v3841_v38, %v6007_v17  ;;  %3866 = vpow2.f32 %v2356_v6  ;;  %v1846_v2 = vpack.c.bf16 %v1812_v53, %v1810_v56  ;;  %v2493_v35 = vadd.f32 %v5155_v8, %v5149_v16 }
 0x4ff   : > { %v5162_v27 = vpop.eup %3846  ;;  %3868 = vpow2.f32 %v2474_v34  ;;  %v1808_v56 = vmul.f32 %v3837_v36, %v6008_v7  ;;  %v2346_v53 = vsub.f32 %v6011_v57, %v2282_v31 }
 0x500   : > { %2491 = vadd.xlane.f32.xlu0 %v2490_v32  ;;  %v3849_v61 = vpop.eup %3848  ;;  %v1688_v18 = vpop.xlane.xlu1 %1687  ;;  %v1845_v30 = vpack.c.bf16 %v1809_v22, %v1807_v45  ;;  %3870 = vpow2.f32 %v2476_v14  ;;  %v2484_v32 = vadd.f32 %v5162_v27, %v5159_v1  ;;  %v6010_v22 = vld [vmem:[#allocation11_spill] sm:$0xff]  ;;  %v6012_v14 = vld [vmem:[#allocation26_spill] sm:$0xff] }
 0x501   : > { %v3851_v44 = vpop.eup %3850  ;;  %3872 = vrcp.f32 %v1691_v49  ;;  %v1805_v34 = vmul.f32 %v3849_v61, %v6010_v22  ;;  %v1806_v17 = vmul.f32 %v3841_v38, %v6012_v14  ;;  %v6013_v49 = vld [vmem:[#allocation38_spill] sm:$0xff]  ;;  %v2470_v7 = vmul.f32 1.442695, %v2346_v53  ;;  %v6015_v22 = vld [vmem:[#allocation19_spill] sm:$0xff] }
 0x502   : > { %v2279_v59 = vpop.xlane.xlu0 %2278  ;;  %v5168_v0 = vpop.eup %3852  ;;  %3874 = vrcp.f32 %v1688_v18  ;;  %v6017_v14 = vld [vmem:[#allocation14_spill] sm:$0xff] }
 0x503   : > { %v2344_v62 = vsub.f32 %v4840_v43, %v2279_v59  ;;  %v2345_v40 = vsub.f32 %v4853_v37, %v2279_v59  ;;  %v5173_v43 = vpop.eup %3854  ;;  %v6009_v37 = vld [vmem:[#allocation10_spill] sm:$0xff]  ;;  %v2347_v59 = vsub.f32 %v6013_v49, %v2282_v31  ;;  %v1844_v36 = vpack.c.bf16 %v1808_v56, %v1806_v17  ;;  %v6016_v56 = vld [vmem:[#allocation9_spill] sm:$0xff]  ;;  %v6019_v49 = vld [vmem:[#allocation36_spill] sm:$0xff] }
 0x504   : > { %1869 = vmatpush2.bf16.xpose.msra.mxu1 %v1846_v2  ;;  %2494 = vadd.xlane.f32.xlu0 %v2493_v35  ;;  %v1803_v50 = vmul.f32 %v3851_v44, %v6009_v37  ;;  %v2276_v2 = vpop.xlane.xlu1 %2275  ;;  %v2487_v18 = vadd.f32 %v5173_v43, %v5168_v0  ;;  %v1802_v57 = vmul.f32 %v3851_v44, %v6016_v56 }
 0x505   : > { %v2466_v48 = vmul.f32 1.442695, %v2344_v62  ;;  %1870 = vmatprep.subr.bf16.mxu1 %v1845_v30  ;;  %v2468_v6 = vmul.f32 1.442695, %v2345_v40  ;;  %v2472_v38 = vmul.f32 1.442695, %v2347_v59  ;;  %v2343_v31 = vsub.f32 %v6015_v22, %v2276_v2 }
 0x506   : > { %v5179_v45 = vpop.eup %3856  ;;  %v1843_v40 = vpack.c.bf16 %v1805_v34, %v1803_v50  ;;  %v1804_v17 = vmul.f32 %v3849_v61, %v6017_v14  ;;  %v6018_v34 = vld [vmem:[#allocation32_spill] sm:$0xff] }
 0x507   : > { %3876 = vpow2.f32 %v2466_v48  ;;  %v5182_v35 = vpop.eup %3858 }
 0x508   : > { %2485 = vadd.xlane.f32.xlu0 %v2484_v32  ;;  %3878 = vpow2.f32 %v2468_v6  ;;  %v3861_v62 = vpop.eup %3860  ;;  %v6014_v32 = vld [vmem:[#allocation25_spill] sm:$0xff]  ;;  %v2478_v6 = vadd.f32 %v5182_v35, %v5179_v45 }
 0x509   : > { %v3863_v30 = vpop.eup %3862  ;;  %v2342_v37 = vsub.f32 %v6014_v32, %v2276_v2  ;;  %3880 = vpow2.f32 %v2470_v7  ;;  %v1842_v32 = vpack.c.bf16 %v1804_v17, %v1802_v57  ;;  %v6022_v17 = vld [vmem:[#allocation84_spill] sm:$0xff] }
 0x50a   : > { %v5188_v48 = vpop.eup %3864  ;;  %v1799_v53 = vmul.f32 %v3863_v30, %v6018_v34  ;;  %3882 = vpow2.f32 %v2472_v38  ;;  %v6020_v38 = vld [vmem:[#allocation35_spill] sm:$0xff] }
 0x50b   : > { %v5194_v50 = vpop.eup %3866  ;;  %v2462_v59 = vmul.f32 1.442695, %v2342_v37 }
 0x50c   : > { %1871 = vmatpush2.bf16.xpose.msra.mxu1 %v1844_v36  ;;  %2488 = vadd.xlane.f32.xlu0 %v2487_v18  ;;  %v1801_v36 = vmul.f32 %v3861_v62, %v6019_v49  ;;  %v5198_v2 = vpop.eup %3868  ;;  %v2464_v18 = vmul.f32 1.442695, %v2343_v31  ;;  %v2481_v44 = vadd.f32 %v5194_v50, %v5188_v48  ;;  %v1798_v31 = vmul.f32 %v3863_v30, %v6020_v38  ;;  %v6025_v30 = vld [vmem:[#allocation56_spill] sm:$0xff]  ;;  %v6026_v38 = vld [vmem:[#allocation83_spill] sm:$0xff] }
 0x50d   : > { %1872 = vmatprep.subr.bf16.mxu1 %v1843_v40  ;;  %v5200_v40 = vpop.eup %3870  ;;  %3884 = vpow2.f32 %v2462_v59 }
 0x50e   : > { %v3873_v61 = vpop.eup %3872  ;;  %v1841_v22 = vpack.c.bf16 %v1801_v36, %v1799_v53  ;;  %3886 = vpow2.f32 %v2464_v18  ;;  %v2571_v37 = vadd.f32 %v5200_v40, %v5198_v2  ;;  %v6023_v53 = vld [vmem:[#allocation82_spill] sm:$0xff] }
 0x50f   : > { %v3875_v56 = vpop.eup %3874  ;;  %v1797_v49 = vmul.f32 %v3873_v61, %v6023_v53 }
 0x510   : > { %2479 = vadd.xlane.f32.xlu0 %v2478_v6  ;;  %v6021_v6 = vld [vmem:[#allocation37_spill] sm:$0xff]  ;;  %v1795_v34 = vmul.f32 %v3875_v56, %v6022_v17  ;;  %v6027_v17 = vld [vmem:[#allocation31_spill] sm:$0xff] }
 0x511   : > { %v1800_v57 = vmul.f32 %v3861_v62, %v6021_v6  ;;  %v1794_v6 = vmul.f32 %v3875_v56, %v6026_v38  ;;  %v1796_v53 = vmul.f32 %v3873_v61, %v6027_v17 }
 0x512   : > { %v1839_v18 = vpack.c.bf16 %v1797_v49, %v1795_v34 }
 0x513   : > { %v1840_v36 = vpack.c.bf16 %v1800_v57, %v1798_v31  ;;  %v1838_v34 = vpack.c.bf16 %v1796_v53, %v1794_v6 }
 0x514   : > { %1873 = vmatpush2.bf16.xpose.msra.mxu1 %v1842_v32  ;;  %2482 = vadd.xlane.f32.xlu0 %v2481_v44  ;;  %v5204_v7 = vpop.eup %3876  ;;  %v6024_v44 = vld [vmem:[#allocation57_spill] sm:$0xff] }
 0x515   : > { %1874 = vmatprep.subr.bf16.mxu1 %v1841_v22  ;;  %v5210_v14 = vpop.eup %3878  ;;  %v2238_v22 = vmax.f32 %v6025_v30, %v6024_v44 }
 0x516   : > { %v2565_v59 = vadd.f32 %v5210_v14, %v5204_v7  ;;  %v5216_v32 = vpop.eup %3880 }
 0x517   : > { %v5220_v62 = vpop.eup %3882 }
 0x518   : > { %2572 = vadd.xlane.f32.xlu0 %v2571_v37  ;;  %v2568_v31 = vadd.f32 %v5220_v62, %v5216_v32 }
 0x51a   : > { %v5224_v37 = vpop.eup %3884 }
 0x51b   : > { %v5228_v57 = vpop.eup %3886 }
 0x51c   : > { %1875 = vmatpush2.bf16.xpose.msra.mxu1 %v1840_v36  ;;  %2566 = vadd.xlane.f32.xlu0 %v2565_v59  ;;  %v2562_v49 = vadd.f32 %v5228_v57, %v5224_v37 }
 0x51d   : > { %1876 = vmatprep.subr.bf16.mxu1 %v1839_v18 }
 0x51f   : > { %2239 = vmax.xlane.f32.xlu1 %v2238_v22 }
 0x523   : > { %2569 = vadd.xlane.f32.xlu1 %v2568_v31 }
 0x524   : > { %1877 = vmatpush2.bf16.xpose.msra.mxu1 %v1838_v34 }
 0x527   : > { %2563 = vadd.xlane.f32.xlu1 %v2562_v49 }
 0x549   : > { %v1685_v36 = vpop.xlane.xlu0 %1684 }
 0x54a   : > { %3888 = vrcp.f32 %v1685_v36 }
 0x54b   : > { %v1682_v56 = vpop.xlane.xlu1 %1681 }
 0x54c   : > { %3890 = vrcp.f32 %v1682_v56 }
 0x54d   : > { %v2273_v61 = vpop.xlane.xlu0 %2272 }
 0x54e   : > { %v2340_v59 = vsub.f32 %v4788_v24, %v2273_v61  ;;  %v2341_v18 = vsub.f32 %v4797_v15, %v2273_v61 }
 0x54f   : > { %v2270_v22 = vpop.xlane.xlu1 %2269 }
 0x550   : > { %v2458_v38 = vmul.f32 1.442695, %v2340_v59  ;;  %v2460_v17 = vmul.f32 1.442695, %v2341_v18  ;;  %v2338_v6 = vsub.f32 %v4764_v12, %v2270_v22  ;;  %v2339_v53 = vsub.f32 %v4780_v41, %v2270_v22 }
 0x551   : > { %v1679_v31 = vpop.xlane.xlu0 %1678 }
 0x552   : > { %3892 = vpow2.f32 %v2458_v38  ;;  %v2454_v34 = vmul.f32 1.442695, %v2338_v6  ;;  %v2456_v49 = vmul.f32 1.442695, %v2339_v53 }
 0x553   : > { %3894 = vpow2.f32 %v2460_v17  ;;  %v1676_v36 = vpop.xlane.xlu1 %1675 }
 0x554   : > { %3896 = vpow2.f32 %v2454_v34 }
 0x555   : > { %3898 = vpow2.f32 %v2456_v49  ;;  %v2267_v56 = vpop.xlane.xlu0 %2266 }
 0x556   : > { %3900 = vrcp.f32 %v1679_v31  ;;  %v2336_v24 = vsub.f32 %v4736_v23, %v2267_v56  ;;  %v2337_v15 = vsub.f32 %v4747_v54, %v2267_v56 }
 0x557   : > { %v3889_v61 = vpop.eup %3888  ;;  %3902 = vrcp.f32 %v1676_v36  ;;  %v2264_v59 = vpop.xlane.xlu1 %2263 }
 0x558   : > { %v2450_v12 = vmul.f32 1.442695, %v2336_v24  ;;  %v2452_v18 = vmul.f32 1.442695, %v2337_v15  ;;  %v2334_v41 = vsub.f32 %v5933_v42, %v2264_v59  ;;  %v2335_v22 = vsub.f32 %v4717_v47, %v2264_v59 }
 0x559   : > { %v3891_v38 = vpop.eup %3890  ;;  %v2261_v17 = vpop.xlane.xlu0 %2260  ;;  %v1793_v6 = vmul.f32 %v3889_v61, %v4938_v25  ;;  %v1792_v53 = vmul.f32 %v3889_v61, %v4934_v63 }
 0x55a   : > { %3904 = vpow2.f32 %v2450_v12  ;;  %v2446_v31 = vmul.f32 1.442695, %v2334_v41  ;;  %v2448_v23 = vmul.f32 1.442695, %v2335_v22  ;;  %v2332_v54 = vsub.f32 %v4681_v19, %v2261_v17 }
 0x55b   : > { %3906 = vpow2.f32 %v2452_v18  ;;  %v2333_v34 = vsub.f32 %v4694_v4, %v2261_v17  ;;  %v2258_v49 = vpop.xlane.xlu1 %2257  ;;  %v1791_v36 = vmul.f32 %v3891_v38, %v4945_v33  ;;  %v1790_v42 = vmul.f32 %v3891_v38, %v4940_v9 }
 0x55c   : > { %3908 = vpow2.f32 %v2446_v31  ;;  %v2442_v47 = vmul.f32 1.442695, %v2332_v54  ;;  %v2330_v56 = vsub.f32 %v5942_v10, %v2258_v49  ;;  %v2331_v25 = vsub.f32 %v5941_v21, %v2258_v49 }
 0x55d   : > { %3910 = vpow2.f32 %v2448_v23  ;;  %v2444_v63 = vmul.f32 1.442695, %v2333_v34  ;;  %v1837_v24 = vpack.c.bf16 %v1793_v6, %v1791_v36  ;;  %v2255_v15 = vpop.xlane.xlu0 %2254  ;;  %v1836_v61 = vpack.c.bf16 %v1792_v53, %v1790_v42  ;;  %v6028_v34 = vld [vmem:[#allocation86_spill] sm:$0xff]  ;;  %v6029_v42 = vld [vmem:[#allocation85_spill] sm:$0xff] }
 0x55e   : > { %3912 = vpow2.f32 %v2442_v47  ;;  %v2438_v19 = vmul.f32 1.442695, %v2330_v56  ;;  %v2440_v59 = vmul.f32 1.442695, %v2331_v25  ;;  %v2328_v4 = vsub.f32 %v5945_v5, %v2255_v15 }
 0x55f   : > { %v5249_v12 = vpop.eup %3892  ;;  %3914 = vpow2.f32 %v2444_v63  ;;  %1878 = vmatprep.subr.bf16.mxu1 %v1837_v24  ;;  %v2329_v9 = vsub.f32 %v5944_v60, %v2255_v15  ;;  %v2252_v33 = vpop.xlane.xlu1 %2251 }
 0x560   : > { %v5252_v10 = vpop.eup %3894  ;;  %3916 = vpow2.f32 %v2438_v19  ;;  %v2434_v21 = vmul.f32 1.442695, %v2328_v4  ;;  %1879 = vmatpush2.bf16.xpose.msra.mxu1 %v1836_v61  ;;  %v2326_v18 = vsub.f32 %v5948_v46, %v2252_v33  ;;  %v2327_v41 = vsub.f32 %v5947_v51, %v2252_v33 }
 0x561   : > { %v5256_v22 = vpop.eup %3896  ;;  %3918 = vpow2.f32 %v2440_v59  ;;  %v2436_v5 = vmul.f32 1.442695, %v2329_v9  ;;  %v2519_v38 = vpop.xlane.xlu0 %2518  ;;  %v2559_v17 = vadd.f32 %v5252_v10, %v5249_v12 }
 0x562   : > { %v5260_v6 = vpop.eup %3898  ;;  %3920 = vpow2.f32 %v2434_v21  ;;  %v2430_v60 = vmul.f32 1.442695, %v2326_v18  ;;  %v2432_v53 = vmul.f32 1.442695, %v2327_v41 }
 0x563   : > { %v3901_v31 = vpop.eup %3900  ;;  %3922 = vpow2.f32 %v2436_v5  ;;  %2560 = vadd.xlane.f32.xlu0 %v2559_v17  ;;  %v2556_v46 = vadd.f32 %v5260_v6, %v5256_v22  ;;  %v6030_v17 = vld [vmem:[#allocation61_spill] sm:$0xff] }
 0x564   : > { %v3903_v51 = vpop.eup %3902  ;;  %3924 = vpow2.f32 %v2430_v60  ;;  %v1789_v23 = vmul.f32 %v3901_v31, %v4969_v55  ;;  %v1788_v54 = vmul.f32 %v3901_v31, %v4963_v20 }
 0x565   : > { %3926 = vpow2.f32 %v2432_v53  ;;  %2557 = vadd.xlane.f32.xlu1 %v2556_v46  ;;  %v1787_v49 = vmul.f32 %v3903_v51, %v6028_v34  ;;  %v2525_v36 = vpop.xlane.xlu0 %2524  ;;  %v1786_v47 = vmul.f32 %v3903_v51, %v6029_v42  ;;  %v994_v42 = vpop.f32.mrf.mxu1 }
 0x566   : > { %3928 = vrcp.f32 %v2519_v38 }
 0x567   : > { %v5268_v56 = vpop.eup %3904  ;;  %v1835_v25 = vpack.c.bf16 %v1789_v23, %v1787_v49  ;;  %v1834_v63 = vpack.c.bf16 %v1788_v54, %v1786_v47  ;;  %3930 = vrcp.f32 %v2525_v36  ;;  %v6032_v47 = vld [vmem:[#allocation62_spill] sm:$0xff] }
 0x568   : > { %v5270_v24 = vpop.eup %3906 }
 0x569   : > { %v5272_v15 = vpop.eup %3908  ;;  %1880 = vmatprep.subr.bf16.mxu1 %v1835_v25  ;;  %v2513_v61 = vpop.xlane.xlu0 %2512  ;;  %v2553_v20 = vadd.f32 %v5270_v24, %v5268_v56 }
 0x56a   : > { %v5276_v55 = vpop.eup %3910  ;;  %1881 = vmatpush2.bf16.xpose.msra.mxu1 %v1834_v63  ;;  %v6033_v63 = vld [vmem:[#allocation63_spill] sm:$0xff] }
 0x56b   : > { %v5278_v19 = vpop.eup %3912  ;;  %v2510_v59 = vpop.xlane.xlu1 %2509  ;;  %2554 = vadd.xlane.f32.xlu0 %v2553_v20  ;;  %v2550_v4 = vadd.f32 %v5276_v55, %v5272_v15 }
 0x56c   : > { %v5282_v9 = vpop.eup %3914 }
 0x56d   : > { %v5284_v33 = vpop.eup %3916  ;;  %2551 = vadd.xlane.f32.xlu1 %v2550_v4  ;;  %v2246_v21 = vpop.xlane.xlu0 %2245  ;;  %v2547_v18 = vadd.f32 %v5282_v9, %v5278_v19 }
 0x56e   : > { %v5288_v41 = vpop.eup %3918  ;;  %v2322_v5 = vsub.f32 %v5975_v3, %v2246_v21  ;;  %v2323_v60 = vsub.f32 %v6030_v17, %v2246_v21 }
 0x56f   : > { %v5292_v53 = vpop.eup %3920  ;;  %v2516_v31 = vpop.xlane.xlu1 %2515  ;;  %2548 = vadd.xlane.f32.xlu0 %v2547_v18  ;;  %v2544_v46 = vadd.f32 %v5288_v41, %v5284_v33 }
 0x570   : > { %6031 = vst [vmem:[#allocation49_spill] sm:$0xff] %v5292_v53  ;;  %v5296_v51 = vpop.eup %3922  ;;  %v2422_v23 = vmul.f32 1.442695, %v2322_v5  ;;  %v2424_v54 = vmul.f32 1.442695, %v2323_v60  ;;  %3932 = vrcp.f32 %v2516_v31  ;;  %v996_v5 = vpop.f32.mrf.mxu1 }
 0x571   : > { %v5298_v34 = vpop.eup %3924  ;;  %2545 = vadd.xlane.f32.xlu1 %v2544_v46  ;;  %v2249_v3 = vpop.xlane.xlu0 %2248  ;;  %v2541_v49 = vadd.f32 %v5296_v51, %v5292_v53 }
 0x572   : > { %v5302_v38 = vpop.eup %3926  ;;  %3934 = vpow2.f32 %v2422_v23  ;;  %v2324_v25 = vsub.f32 %v6032_v47, %v2249_v3  ;;  %v2325_v20 = vsub.f32 %v6033_v63, %v2249_v3 }
 0x573   : > { %3936 = vpow2.f32 %v2424_v54  ;;  %v2522_v36 = vpop.xlane.xlu1 %2521  ;;  %2542 = vadd.xlane.f32.xlu0 %v2541_v49  ;;  %v2538_v4 = vadd.f32 %v5302_v38, %v5298_v34  ;;  %v3929_v49 = vpop.eup %3928 }
 0x574   : > { %v2426_v21 = vmul.f32 1.442695, %v2324_v25  ;;  %v2428_v18 = vmul.f32 1.442695, %v2325_v20  ;;  %3938 = vrcp.f32 %v2522_v36  ;;  %v3931_v47 = vpop.eup %3930 }
 0x575   : > { %2539 = vadd.xlane.f32.xlu1 %v2538_v4  ;;  %v2504_v17 = vpop.xlane.xlu0 %2503 }
 0x576   : > { %3940 = vpow2.f32 %v2426_v21 }
 0x577   : > { %3942 = vpow2.f32 %v2428_v18  ;;  %v923_v60 = vpop.permute.xlu1 %922 }
 0x578   : > { %v995_v31 = vadd.f32 %v994_v42, %v923_v60  ;;  %v997_v46 = vadd.f32 %v996_v5, %v923_v60  ;;  %3944 = vrcp.f32 %v2513_v61  ;;  %v6036_v60 = vld [vmem:[#allocation51_spill] sm:$0xff] }
 0x579   : > { %v2507_v23 = vpop.xlane.xlu0 %2506  ;;  %3946 = vrcp.f32 %v2510_v59 }
 0x57a   : > { %v1087_v54 = vpack.c.bf16 %v995_v31, %v995_v31  ;;  %v1088_v3 = vpack.c.bf16 %v997_v46, %v997_v46  ;;  %3948 = vrcp.f32 %v2507_v23  ;;  %v2637_v31 = vmul.f32 %v3931_v47, %v6036_v60  ;;  %v6037_v46 = vld [vmem:[#allocation68_spill] sm:$0xff] }
 0x57c   : > { %1882 = vmatprep.mubr.bf16.mxu1 %v1088_v3  ;;  %v6038_v3 = vld [vmem:[#allocation69_spill] sm:$0xff] }
 0x57d   : > { %1883 = vmatmul.mubr.bf16.vlgmr.msra.gmra.mxu1 %v1087_v54  ;;  %v2243_v25 = vpop.xlane.xlu0 %2242  ;;  %v3933_v63 = vpop.eup %3932  ;;  %v2636_v54 = vmul.f32 %v3931_v47, %v6037_v46  ;;  %v6043_v46 = vld [vmem:[#allocation70_spill] sm:$0xff] }
 0x57e   : > { %v2320_v20 = vsub.f32 %v5995_v29, %v2243_v25  ;;  %v2321_v36 = vsub.f32 %v5994_v26, %v2243_v25  ;;  %v2631_v25 = vmul.f32 %v3933_v63, %v6038_v3 }
 0x57f   : > { %v5310_v4 = vpop.eup %3934 }
 0x580   : > { %6034 = vst [vmem:[#allocation47_spill] sm:$0xff] %v5310_v4  ;;  %v5312_v21 = vpop.eup %3936  ;;  %v2418_v42 = vmul.f32 1.442695, %v2320_v20  ;;  %v2420_v61 = vmul.f32 1.442695, %v2321_v36 }
 0x581   : > { %6035 = vst [vmem:[#allocation48_spill] sm:$0xff] %v5312_v21  ;;  %v3939_v18 = vpop.eup %3938  ;;  %v2498_v59 = vpop.xlane.xlu0 %2497  ;;  %v2532_v5 = vadd.f32 %v5312_v21, %v5310_v4  ;;  %v6040_v4 = vld [vmem:[#allocation54_spill] sm:$0xff] }
 0x582   : > { %3950 = vpow2.f32 %v2418_v42  ;;  %v2635_v29 = vmul.f32 %v3939_v18, %v5079_v13  ;;  %v2634_v26 = vmul.f32 %v3939_v18, %v5035_v52  ;;  %v2633_v60 = vmul.f32 %v3929_v49, %v6040_v4  ;;  %v6041_v18 = vld [vmem:[#allocation71_spill] sm:$0xff] }
 0x583   : > { %v5321_v53 = vpop.eup %3940  ;;  %3952 = vpow2.f32 %v2420_v61  ;;  %2533 = vadd.xlane.f32.xlu1 %v2532_v5  ;;  %v2630_v5 = vmul.f32 %v3933_v63, %v6041_v18  ;;  %v6044_v4 = vld [vmem:[#allocation7_spill] sm:$0xff]  ;;  %v6048_v18 = vld [vmem:[#allocation52_spill] sm:$0xff] }
 0x584   : > { %6039 = vst [vmem:[#allocation74_spill] sm:$0xff] %v5321_v53  ;;  %v5323_v23 = vpop.eup %3942  ;;  %3954 = vrcp.f32 %v2504_v17  ;;  %v2685_v20 = vpack.c.bf16 %v2637_v31, %v2635_v29  ;;  %v2684_v36 = vpack.c.bf16 %v2636_v54, %v2634_v26  ;;  %v2683_v52 = vpack.c.bf16 %v2633_v60, %v2631_v25  ;;  %v6042_v17 = vld [vmem:[#allocation75_spill] sm:$0xff] }
 0x585   : > { %v2501_v21 = vpop.xlane.xlu0 %2500  ;;  %v2535_v47 = vadd.f32 %v5323_v23, %v5321_v53  ;;  %v3945_v13 = vpop.eup %3944  ;;  %v2632_v29 = vmul.f32 %v3929_v49, %v6044_v4 }
 0x586   : > { %2702 = vmatprep.subr.bf16.mxu1 %v2685_v20  ;;  %v3947_v42 = vpop.eup %3946  ;;  %3956 = vrcp.f32 %v2501_v21  ;;  %v2629_v54 = vmul.f32 %v3945_v13, %v6043_v46  ;;  %v2628_v49 = vmul.f32 %v3945_v13, %v6048_v18 }
 0x587   : > { %2703 = vmatpush1.bf16.xpose.msra.mxu1 %v2684_v36  ;;  %2536 = vadd.xlane.f32.xlu0 %v2535_v47  ;;  %v2627_v31 = vmul.f32 %v3947_v42, %v6042_v17  ;;  %3958 = vrcp.f32 %v2498_v59  ;;  %v2682_v3 = vpack.c.bf16 %v2632_v29, %v2630_v5  ;;  %v3949_v53 = vpop.eup %3948  ;;  %v6047_v47 = vld [vmem:[#allocation73_spill] sm:$0xff]  ;;  %v6050_v17 = vld [vmem:[#allocation67_spill] sm:$0xff] }
 0x588   : > { %2704 = vmatprep.subr.bf16.mxu1 %v2683_v52  ;;  %v2626_v52 = vmul.f32 %v3947_v42, %v6047_v47  ;;  %v6049_v59 = vld [vmem:[#allocation65_spill] sm:$0xff]  ;;  %v6052_v42 = vld [vmem:[#allocation55_spill] sm:$0xff] }
 0x589   : > { %v2492_v61 = vpop.xlane.xlu0 %2491  ;;  %v2681_v20 = vpack.c.bf16 %v2629_v54, %v2627_v31  ;;  %v2625_v5 = vmul.f32 %v3949_v53, %v6049_v59 }
 0x58a   : > { %v2680_v54 = vpack.c.bf16 %v2628_v49, %v2626_v52 }
 0x58d   : > { %v2495_v26 = vpop.xlane.xlu0 %2494 }
 0x58e   : > { %3960 = vrcp.f32 %v2495_v26 }
 0x58f   : > { %v5332_v25 = vpop.eup %3950  ;;  %2705 = vmatpush1.bf16.xpose.msra.mxu1 %v2682_v3  ;;  %3962 = vrcp.f32 %v2492_v61 }
 0x590   : > { %6045 = vst [vmem:[#allocation50_spill] sm:$0xff] %v5332_v25  ;;  %v5334_v36 = vpop.eup %3952  ;;  %2706 = vmatprep.subr.bf16.mxu1 %v2681_v20 }
 0x591   : > { %6046 = vst [vmem:[#allocation6_spill] sm:$0xff] %v5334_v36  ;;  %v3955_v60 = vpop.eup %3954  ;;  %v2486_v63 = vpop.xlane.xlu0 %2485  ;;  %v2529_v21 = vadd.f32 %v5334_v36, %v5332_v25  ;;  %v6051_v25 = vld [vmem:[#allocation66_spill] sm:$0xff] }
 0x592   : > { %v2623_v31 = vmul.f32 %v3955_v60, %v6050_v17  ;;  %v2624_v36 = vmul.f32 %v3949_v53, %v6051_v25  ;;  %v2622_v26 = vmul.f32 %v3955_v60, %v6052_v42  ;;  %v6054_v25 = vld [vmem:[#allocation64_spill] sm:$0xff] }
 0x593   : > { %2530 = vadd.xlane.f32.xlu0 %v2529_v21  ;;  %v3957_v29 = vpop.eup %3956  ;;  %v6053_v21 = vld [vmem:[#allocation72_spill] sm:$0xff] }
 0x594   : > { %v2679_v4 = vpack.c.bf16 %v2625_v5, %v2623_v31  ;;  %v3959_v3 = vpop.eup %3958  ;;  %v2621_v13 = vmul.f32 %v3957_v29, %v5129_v28  ;;  %v2678_v47 = vpack.c.bf16 %v2624_v36, %v2622_v26  ;;  %v2620_v5 = vmul.f32 %v3957_v29, %v5114_v11  ;;  %v5353_v36 = vld [vmem:[%s5590_s7] sm:$0xff]  ;;  %v2912_v29 = vld [vmem:[%s5591_s8 + $0x8] sm:$0xff] }
 0x595   : > { %v2489_v46 = vpop.xlane.xlu0 %2488  ;;  %v2619_v61 = vmul.f32 %v3959_v3, %v6053_v21  ;;  %v2618_v17 = vmul.f32 %v3959_v3, %v6054_v25  ;;  %v3022_v25 = vld [vmem:[%s5595_s12 + $0x18] sm:$0xff] }
 0x596   : > { %3964 = vrcp.f32 %v2489_v46 }
 0x597   : > { %2707 = vmatpush1.bf16.xpose.msra.mxu1 %v2680_v54  ;;  %3966 = vrcp.f32 %v2486_v63  ;;  %v2677_v18 = vpack.c.bf16 %v2621_v13, %v2619_v61  ;;  %v2676_v60 = vpack.c.bf16 %v2620_v5, %v2618_v17 }
 0x598   : > { %2708 = vmatprep.subr.bf16.mxu1 %v2679_v4 }
 0x599   : > { %v2480_v20 = vpop.xlane.xlu0 %2479 }
 0x59b   : > { %v3961_v59 = vpop.eup %3960 }
 0x59c   : > { %v3963_v49 = vpop.eup %3962  ;;  %v2617_v53 = vmul.f32 %v3961_v59, %v5155_v8 }
 0x59d   : > { %v2483_v52 = vpop.xlane.xlu0 %2482  ;;  %v2615_v28 = vmul.f32 %v3963_v49, %v5146_v39  ;;  %v2616_v39 = vmul.f32 %v3961_v59, %v5149_v16  ;;  %v2614_v42 = vmul.f32 %v3963_v49, %v5141_v58  ;;  %v2980_v16 = vld [vmem:[%s5592_s9 + $0x8] sm:$0xff] }
 0x59e   : > { %3968 = vrcp.f32 %v2483_v52 }
 0x59f   : > { %2709 = vmatpush1.bf16.xpose.msra.mxu1 %v2678_v47  ;;  %3970 = vrcp.f32 %v2480_v20  ;;  %v2675_v63 = vpack.c.bf16 %v2617_v53, %v2615_v28 }
 0x5a0   : > { %2710 = vmatprep.subr.bf16.mxu1 %v2677_v18 }
 0x5a1   : > { %v2573_v54 = vpop.xlane.xlu0 %2572 }
 0x5a2   : > { %3972 = vrcp.f32 %v2573_v54 }
 0x5a3   : > { %v3965_v31 = vpop.eup %3964 }
 0x5a4   : > { %v3967_v11 = vpop.eup %3966  ;;  %v2613_v3 = vmul.f32 %v3965_v31, %v5173_v43  ;;  %v2612_v18 = vmul.f32 %v3965_v31, %v5168_v0 }
 0x5a5   : > { %v2567_v58 = vpop.xlane.xlu0 %2566  ;;  %v2610_v52 = vmul.f32 %v3967_v11, %v5159_v1  ;;  %v3020_v1 = vld [vmem:[%s5595_s12 + $0x8] sm:$0xff] }
 0x5a7   : > { %2711 = vmatpush1.bf16.xpose.msra.mxu1 %v2676_v60  ;;  %v2672_v5 = vpack.c.bf16 %v2612_v18, %v2610_v52 }
 0x5a8   : > { %2712 = vmatprep.subr.bf16.mxu1 %v2675_v63  ;;  %v2240_v46 = vpop.xlane.xlu1 %2239 }
 0x5a9   : > { %v2318_v8 = vsub.f32 %v6025_v30, %v2240_v46  ;;  %v2319_v4 = vsub.f32 %v6024_v44, %v2240_v46  ;;  %2745 = vrot.lane.b32.xlu0 %v5353_v36, %s4038_s26  ;;  %v2611_v30 = vmul.f32 %v3967_v11, %v5162_v27  ;;  %v2674_v44 = vpack.c.bf16 %v2616_v39, %v2614_v42  ;;  %v2996_v27 = vld [vmem:[%s5593_s10 + $0x8] sm:$0xff]  ;;  %v3181_v11 = vld [vmem:[%s5597_s14] sm:$0xff] }
 0x5aa   : > { %v3249_v39 = vld [vmem:[%s5599_s16] sm:$0x7] }
 0x5ab   : > { %v2414_v20 = vmul.f32 1.442695, %v2318_v8  ;;  %v2416_v13 = vmul.f32 1.442695, %v2319_v4  ;;  %v2673_v21 = vpack.c.bf16 %v2613_v3, %v2611_v30  ;;  %v3969_v61 = vpop.eup %3968  ;;  %v3019_v30 = vld [vmem:[%s5595_s12] sm:$0xff] }
 0x5ac   : > { %v2570_v26 = vpop.xlane.xlu1 %2569  ;;  %v3971_v47 = vpop.eup %3970  ;;  %v2609_v59 = vmul.f32 %v3969_v61, %v5194_v50  ;;  %v2608_v17 = vmul.f32 %v3969_v61, %v5188_v48 }
 0x5ad   : > { %3974 = vpow2.f32 %v2414_v20  ;;  %2920 = vperm.xlu0 %3618, %v2912_v29   ;;  %v2607_v49 = vmul.f32 %v3971_v47, %v5182_v35  ;;  %v2606_v50 = vmul.f32 %v3971_v47, %v5179_v45 }
 0x5ae   : > { %3976 = vpow2.f32 %v2416_v13 }
 0x5af   : > { %3978 = vrcp.f32 %v2570_v26  ;;  %2713 = vmatpush1.bf16.xpose.msra.mxu1 %v2674_v44  ;;  %v2671_v53 = vpack.c.bf16 %v2609_v59, %v2607_v49  ;;  %v3973_v0 = vpop.eup %3972  ;;  %v2670_v31 = vpack.c.bf16 %v2608_v17, %v2606_v50  ;;  %v3182_v44 = vld [vmem:[%s5597_s14 + $0x8] sm:$0xff] }
 0x5b0   : > { %2714 = vmatprep.subr.bf16.mxu1 %v2673_v21  ;;  %v2564_v43 = vpop.xlane.xlu1 %2563  ;;  %v2669_v48 = vmul.f32 %v3973_v0, %v5200_v40  ;;  %v2668_v40 = vmul.f32 %v3973_v0, %v5198_v2  ;;  %v5410_v2 = vld [vmem:[%s5590_s7 + $0x8] sm:$0xff] }
 0x5b1   : > { %2988 = vperm.xlu0 %3618, %v2980_v16   ;;  %3980 = vrcp.f32 %v2564_v43 }
 0x5b2   : > { %3982 = vrcp.f32 %v2567_v58 }
 0x5b5   : > { %3004 = vperm.xlu0 %3618, %v2996_v27  }
 0x5b7   : > { %2715 = vmatpush1.bf16.xpose.msra.mxu1 %v2672_v5 }
 0x5b8   : > { %2716 = vmatprep.subr.bf16.mxu1 %v2671_v53 }
 0x5b9   : > { %3040 = vperm.xlu0 %3618, %v3022_v25  }
 0x5ba   : > { %v5380_v28 = vpop.eup %3974 }
 0x5bb   : > { %v5385_v35 = vpop.eup %3976 }
 0x5bc   : > { %v3979_v60 = vpop.eup %3978  ;;  %v2526_v63 = vadd.f32 %v5385_v35, %v5380_v28 }
 0x5bd   : > { %3030 = vperm.xlu0 %3618, %v3020_v1   ;;  %v2667_v46 = vmul.f32 %v3979_v60, %v5220_v62  ;;  %v2666_v45 = vmul.f32 %v3979_v60, %v5216_v32  ;;  %v899_v32 = vld [vmem:[%s5589_s6 + $0x28] sm:$0xff] }
 0x5be   : > { %2527 = vadd.xlane.f32.xlu1 %v2526_v63  ;;  %v3981_v54 = vpop.eup %3980 }
 0x5bf   : > { %2717 = vmatpush1.bf16.xpose.msra.mxu1 %v2670_v31  ;;  %v2701_v8 = vpack.c.bf16 %v2669_v48, %v2667_v46  ;;  %v3983_v4 = vpop.eup %3982  ;;  %v2663_v62 = vmul.f32 %v3981_v54, %v5228_v57  ;;  %v2700_v3 = vpack.c.bf16 %v2668_v40, %v2666_v45  ;;  %v2662_v13 = vmul.f32 %v3981_v54, %v5224_v37  ;;  %v2995_v37 = vld [vmem:[%s5593_s10] sm:$0xff]  ;;  %v3021_v57 = vld [vmem:[%s5595_s12 + $0x10] sm:$0xff]  ;;  %v6055_v40 = vld [vmem:[#allocation49_spill] sm:$0xff] }
 0x5c0   : > { %v2665_v29 = vmul.f32 %v3983_v4, %v5210_v14  ;;  %v2664_v42 = vmul.f32 %v3983_v4, %v5204_v7  ;;  %v2911_v14 = vld [vmem:[%s5591_s8] sm:$0xff] }
 0x5c1   : > { %2718 = vmatprep.subr.bf16.mxu1 %v2701_v8  ;;  %3185 = vperm.xlu0 %3618, %v3181_v11   ;;  %v2979_v7 = vld [vmem:[%s5592_s9] sm:$0xff] }
 0x5c2   : > { %v2699_v20 = vpack.c.bf16 %v2665_v29, %v2663_v62  ;;  %v2698_v26 = vpack.c.bf16 %v2664_v42, %v2662_v13 }
 0x5c5   : > { %3252 = vperm.xlu0 %3618, %v3249_v39  }
 0x5c7   : > { %2719 = vmatpush2.bf16.xpose.msra.mxu1 %v2700_v3 }
 0x5c8   : > { %2720 = vmatprep.subr.bf16.mxu1 %v2699_v20  ;;  %v6056_v20 = vld [vmem:[#allocation48_spill] sm:$0xff] }
 0x5cf   : > { %927 = vperm.xlu1 %3619, %v899_v32   ;;  %2721 = vmatpush2.bf16.xpose.msra.mxu1 %v2698_v26  ;;  %v6058_v32 = vld [vmem:[#allocation74_spill] sm:$0xff] }
 0x5d3   : > { %2747 = vrot.lane.b32.xlu1 %v5410_v2, %s4038_s26 }
 0x5d7   : > { %2915 = vperm.xlu1 %3619, %v2911_v14  }
 0x5db   : > { %2983 = vperm.xlu1 %3619, %v2979_v7  }
 0x5df   : > { %2999 = vperm.xlu1 %3619, %v2995_v37   ;;  %v998_v37 = vpop.f32.mrf.mxu1 }
 0x5e3   : > { %3035 = vperm.xlu1 %3619, %v3021_v57  }
 0x5e7   : > { %3025 = vperm.xlu1 %3619, %v3019_v30  }
 0x5eb   : > { %3190 = vperm.xlu1 %3619, %v3182_v44  }
 0x5ec   : > { %v2561_v21 = vpop.xlane.xlu0 %2560 }
 0x5ed   : > { %3984 = vrcp.f32 %v2561_v21 }
 0x5ee   : > { %v2558_v16 = vpop.xlane.xlu1 %2557 }
 0x5ef   : > { %3986 = vrcp.f32 %v2558_v16 }
 0x5f4   : > { %v2555_v61 = vpop.xlane.xlu0 %2554 }
 0x5f5   : > { %3988 = vrcp.f32 %v2555_v61 }
 0x5f6   : > { %v2552_v43 = vpop.xlane.xlu1 %2551 }
 0x5f7   : > { %3990 = vrcp.f32 %v2552_v43 }
 0x5f8   : > { %v2549_v47 = vpop.xlane.xlu0 %2548 }
 0x5f9   : > { %3992 = vrcp.f32 %v2549_v47 }
 0x5fa   : > { %v3985_v58 = vpop.eup %3984  ;;  %v2546_v18 = vpop.xlane.xlu1 %2545 }
 0x5fb   : > { %3994 = vrcp.f32 %v2546_v18  ;;  %v2661_v27 = vmul.f32 %v3985_v58, %v5252_v10  ;;  %v2660_v59 = vmul.f32 %v3985_v58, %v5249_v12 }
 0x5fc   : > { %v3987_v52 = vpop.eup %3986  ;;  %v2543_v49 = vpop.xlane.xlu0 %2542 }
 0x5fd   : > { %3996 = vrcp.f32 %v2543_v49  ;;  %v2659_v5 = vmul.f32 %v3987_v52, %v5260_v6  ;;  %v2658_v53 = vmul.f32 %v3987_v52, %v5256_v22 }
 0x5fe   : > { %v2540_v25 = vpop.xlane.xlu1 %2539 }
 0x5ff   : > { %3998 = vrcp.f32 %v2540_v25  ;;  %v2697_v0 = vpack.c.bf16 %v2661_v27, %v2659_v5  ;;  %v2696_v17 = vpack.c.bf16 %v2660_v59, %v2658_v53  ;;  %v6059_v59 = vld [vmem:[#allocation6_spill] sm:$0xff] }
 0x600   : > { %v6060_v5 = vld [vmem:[#allocation50_spill] sm:$0xff] }
 0x601   : > { %2722 = vmatprep.subr.bf16.mxu1 %v2697_v0 }
 0x602   : > { %v3989_v1 = vpop.eup %3988  ;;  %2723 = vmatpush2.bf16.xpose.msra.mxu1 %v2696_v17 }
 0x603   : > { %v2657_v50 = vmul.f32 %v3989_v1, %v5270_v24  ;;  %v2656_v10 = vmul.f32 %v3989_v1, %v5268_v56 }
 0x604   : > { %v3991_v60 = vpop.eup %3990 }
 0x605   : > { %v2655_v12 = vmul.f32 %v3991_v60, %v5276_v55  ;;  %v2654_v63 = vmul.f32 %v3991_v60, %v5272_v15 }
 0x606   : > { %v3993_v31 = vpop.eup %3992 }
 0x607   : > { %v2695_v6 = vpack.c.bf16 %v2657_v50, %v2655_v12  ;;  %v2694_v46 = vpack.c.bf16 %v2656_v10, %v2654_v63  ;;  %v2653_v22 = vmul.f32 %v3993_v31, %v5282_v9  ;;  %v2652_v55 = vmul.f32 %v3993_v31, %v5278_v19 }
 0x608   : > { %v3995_v48 = vpop.eup %3994  ;;  %v6061_v50 = vmov 0.0  }
 0x609   : > { %2724 = vmatprep.subr.bf16.mxu1 %v2695_v6  ;;  %v2651_v11 = vmul.f32 %v3995_v48, %v5288_v41  ;;  %v2650_v56 = vmul.f32 %v3995_v48, %v5284_v33 }
 0x60a   : > { %v3997_v54 = vpop.eup %3996  ;;  %2725 = vmatpush2.bf16.xpose.msra.mxu1 %v2694_v46 }
 0x60b   : > { %v2693_v8 = vpack.c.bf16 %v2653_v22, %v2651_v11  ;;  %v2649_v45 = vmul.f32 %v3997_v54, %v5296_v51  ;;  %v2692_v39 = vpack.c.bf16 %v2652_v55, %v2650_v56  ;;  %v2648_v29 = vmul.f32 %v3997_v54, %v6055_v40  ;;  %v6057_v51 = vld [vmem:[#allocation47_spill] sm:$0xff] }
 0x60c   : > { %v3999_v24 = vpop.eup %3998  ;;  %v2534_v4 = vpop.xlane.xlu1 %2533  ;;  %v6064_v40 = vld [vmem:[#allocation3_spill] sm:$0xff] }
 0x60d   : > { %2726 = vmatprep.subr.bf16.mxu1 %v2693_v8  ;;  %v2647_v15 = vmul.f32 %v3999_v24, %v5302_v38  ;;  %4000 = vrcp.f32 %v2534_v4  ;;  %v2646_v41 = vmul.f32 %v3999_v24, %v5298_v34  ;;  %v1000_v34 = vpop.f32.mrf.mxu1 }
 0x60f   : > { %v2691_v62 = vpack.c.bf16 %v2649_v45, %v2647_v15  ;;  %v2690_v3 = vpack.c.bf16 %v2648_v29, %v2646_v41 }
 0x610   : > { %v2537_v9 = vpop.xlane.xlu0 %2536 }
 0x611   : > { %4002 = vrcp.f32 %v2537_v9 }
 0x612   : > { %2727 = vmatpush2.bf16.xpose.msra.mxu1 %v2692_v39 }
 0x613   : > { %2728 = vmatprep.subr.bf16.mxu1 %v2691_v62  ;;  %v6063_v62 = vld [vmem:[#allocation2_spill] sm:$0xff] }
 0x61a   : > { %2729 = vmatpush2.bf16.xpose.msra.mxu1 %v2690_v3  ;;  %v4001_v33 = vpop.eup %4000 }
 0x61b   : > { %v2643_v13 = vmul.f32 %v4001_v33, %v6056_v20  ;;  %v2642_v42 = vmul.f32 %v4001_v33, %v6057_v51  ;;  %v6065_v33 = vld [vmem:[#allocation4_spill] sm:$0xff] }
 0x61c   : > { %v2531_v21 = vpop.xlane.xlu0 %2530 }
 0x61d   : > { %4004 = vrcp.f32 %v2531_v21 }
 0x61e   : > { %v4003_v19 = vpop.eup %4002 }
 0x61f   : > { %v2645_v38 = vmul.f32 %v4003_v19, %v5323_v23  ;;  %v2644_v26 = vmul.f32 %v4003_v19, %v6058_v32 }
 0x620   : > { %v2746_v60 = vpop.permute.xlu0 %2745 }
 0x621   : > { %v2689_v14 = vpack.c.bf16 %v2645_v38, %v2643_v13  ;;  %v2688_v7 = vpack.c.bf16 %v2644_v26, %v2642_v42  ;;  %v6066_v13 = vld [vmem:[#allocation5_spill] sm:$0xff] }
 0x623   : > { %2730 = vmatprep.subr.bf16.mxu1 %v2689_v14 }
 0x624   : > { %2731 = vmatpush2.bf16.xpose.msra.mxu1 %v2688_v7 }
 0x628   : > { %v2921_v24 = vpop.permute.xlu0 %2920 }
 0x62a   : > { %v4005_v58 = vpop.eup %4004 }
 0x62b   : > { %v2641_v52 = vmul.f32 %v4005_v58, %v6059_v59  ;;  %v2640_v53 = vmul.f32 %v4005_v58, %v6060_v5 }
 0x63d   : > { %v1884_v57 = vpop.f32.mrf.mxu1 }
 0x63f   : > { %v1886_v30 = vpop.f32.mrf.mxu1 }
 0x641   : > { %v1888_v44 = vpop.f32.mrf.mxu1 }
 0x643   : > { %v1889_v16 = vpop.f32.mrf.mxu1 }
 0x647   : > { %v2528_v61 = vpop.xlane.xlu1 %2527 }
 0x648   : > { %4006 = vrcp.f32 %v2528_v61 }
 0x64b   : > { %v928_v43 = vpop.permute.xlu1 %927 }
 0x64c   : > { %v1001_v23 = vadd.f32 %v1000_v34, %v928_v43  ;;  %v999_v17 = vadd.f32 %v998_v37, %v928_v43 }
 0x64e   : > { %v1894_v47 = vpack.c.bf16 %v1001_v23, %v1001_v23  ;;  %v1893_v1 = vpack.c.bf16 %v999_v17, %v999_v17 }
 0x64f   : > { %v2748_v31 = vpop.permute.xlu1 %2747 }
 0x650   : > { %2734 = vmatprep.mubr.bf16.mxu1 %v1894_v47 }
 0x653   : > { %v2916_v54 = vpop.permute.xlu1 %2915 }
 0x655   : > { %v4007_v18 = vpop.eup %4006 }
 0x656   : > { %v2639_v27 = vmul.f32 %v4007_v18, %v5385_v35  ;;  %v2638_v49 = vmul.f32 %v4007_v18, %v5380_v28  ;;  %v6062_v28 = vmov 0  }
 0x658   : > { %v2687_v25 = vpack.c.bf16 %v2641_v52, %v2639_v27  ;;  %v2686_v0 = vpack.c.bf16 %v2640_v53, %v2638_v49 }
 0x65a   : > { %2732 = vmatprep.subr.bf16.mxu1 %v2687_v25 }
 0x65b   : > { %2733 = vmatpush2.bf16.xpose.msra.mxu1 %v2686_v0 }
 0x65c   : > { %2864 = vmatprep.subr.mxu1 %v1886_v30 }
 0x662   : > { %2735 = vmatmul.mubr.bf16.vlgmr.msra.gmra.mxu1 %v1893_v1 }
 0x663   : > { %2865 = vmatpush1.msra.mxu1 %v1884_v57  ;;  %2898 = vmatprep.mubr.f32.mxu1 %v6061_v50 }
 0x66a   : > { %3595 = vmatmul.mubr.msk.f32.vlgmr.msra.gmra.mxu1 %vm1089_vm8, %v5353_v36 }
 0x66b   : > { %2904 = vmatprep.mubr.f32.mxu1 %v6061_v50 }
 0x66e   : > { %3596 = vmatmul.mubr.msk.f32.gmra.mxu1 %vm1089_vm8, %v5410_v2 }
 0x66f   : > { %3229 = vmatprep.mubr.bf16.mxu1 %v6062_v28 }
 0x722   : > { %v2736_v35 = vpop.f32.mrf.mxu1 }
 0x724   : > { %v2738_v10 = vpop.f32.mrf.mxu1 }
 0x725   : > { %2783 = vmatprep.subr.mxu0 %v2738_v10 }
 0x726   : > { %v2740_v12 = vpop.f32.mrf.mxu1  ;;  %2784 = vmatpush1.msra.mxu0 %v2736_v35 }
 0x727   : > { %3593 = vmatmul.mubr.msk.f32.vlgmr.msra.gmra.mxu0 %vm1089_vm8, %v2746_v60 }
 0x728   : > { %v2741_v63 = vpop.f32.mrf.mxu1  ;;  %2823 = vmatprep.mubr.f32.mxu0 %v6061_v50 }
 0x72a   : > { %v2900_v36 = vpop.f32.mrf.mxu1 }
 0x72b   : > { %3594 = vmatmul.mubr.msk.f32.gmra.mxu0 %vm1089_vm8, %v2748_v31 }
 0x72c   : > { %3081 = vmatprep.mubr.bf16.mxu0 %v6062_v28  ;;  %v2902_v2 = vpop.f32.mrf.mxu1 }
 0x72e   : > { %v2906_v48 = vpop.f32.mrf.mxu1 }
 0x730   : > { %v2908_v15 = vpop.f32.mrf.mxu1 }
 0x7e7   : > { %v2819_v6 = vpop.f32.mrf.mxu0 }
 0x7e8   : > { %v2901_v46 = vadd.f32 %v2900_v36, %v2819_v6 }
 0x7e9   : > { %v2821_v22 = vpop.f32.mrf.mxu0 }
 0x7ea   : > { %v2903_v11 = vadd.f32 %v2902_v2, %v2821_v22  ;;  %v2923_v4 = vadd.f32 %v2916_v54, %v2901_v46 }
 0x7eb   : > { %v2825_v8 = vpop.f32.mrf.mxu0 }
 0x7ec   : > { %v2907_v56 = vadd.f32 %v2906_v48, %v2825_v8  ;;  %v2924_v45 = vadd.f32 %v2916_v54, %v2903_v11  ;;  %v5468_v41 = vadd.f32 %v2923_v4, %v6063_v62  ;;  %v2989_v11 = vpop.permute.xlu0 %2988  ;;  %v2984_v54 = vpop.permute.xlu1 %2983 }
 0x7ed   : > { %v2827_v55 = vpop.f32.mrf.mxu0 }
 0x7ee   : > { %v2925_v9 = vadd.f32 %v2921_v24, %v2907_v56  ;;  %v2909_v39 = vadd.f32 %v2908_v15, %v2827_v55  ;;  %v5474_v19 = vadd.f32 %v2924_v45, %v6065_v33 }
 0x7f0   : > { %v5471_v29 = vadd.f32 %v2925_v9, %v6064_v40  ;;  %v2926_v3 = vadd.f32 %v2921_v24, %v2909_v39  ;;  %v3005_v39 = vpop.permute.xlu0 %3004  ;;  %v3000_v62 = vpop.permute.xlu1 %2999 }
 0x7f2   : > { %v2931_v20 = vadd.f32 %v5471_v29, %v5468_v41  ;;  %v5479_v38 = vadd.f32 %v2926_v3, %v6066_v13 }
 0x7f4   : > { %v2932_v51 = vrot.slane %v2931_v20, 4  ;;  %v2938_v42 = vadd.f32 %v5479_v38, %v5474_v19 }
 0x7f6   : > { %v2933_v32 = vadd.f32 %v2932_v51, %v2931_v20  ;;  %v2939_v26 = vrot.slane %v2938_v42, 4 }
 0x7f8   : > { %v2934_v14 = vrot.slane %v2933_v32, 2  ;;  %v2940_v7 = vadd.f32 %v2939_v26, %v2938_v42  ;;  %v3011_v42 = vld [vmem:[%s5594_s11] sm:$0xff] }
 0x7fa   : > { %v2935_v37 = vadd.f32 %v2934_v14, %v2933_v32  ;;  %v2941_v34 = vrot.slane %v2940_v7, 2  ;;  %v3012_v32 = vld [vmem:[%s5594_s11 + $0x8] sm:$0xff] }
 0x7fc   : > { %v2936_v57 = vrot.slane %v2935_v37, 1  ;;  %v2942_v30 = vadd.f32 %v2941_v34, %v2940_v7  ;;  %v3015_v7 = vpack.c.bf16 %v3012_v32, %v3011_v42  ;;  %v3014_v34 = vld [vmem:[%s5594_s11 + $0x18] sm:$0xff] }
 0x7fe   : > { %v2937_v44 = vadd.f32 %v2936_v57, %v2935_v37  ;;  %v2943_v21 = vrot.slane %v2942_v30, 1  ;;  %v3013_v37 = vld [vmem:[%s5594_s11 + $0x10] sm:$0xff] }
 0x7ff   : > { %v3016_v57 = vpack.c.bf16 %v3014_v34, %v3013_v37 }
 0x800   : > { %v2945_v16 = vmul.f32 0.0625, %v2937_v44  ;;  %v2944_v61 = vadd.f32 %v2943_v21, %v2942_v30  ;;  %v3036_v30 = vpop.permute.xlu1 %3035  ;;  %v3041_v44 = vpop.permute.xlu0 %3040 }
 0x802   : > { %v2947_v43 = vsub.f32 %v5468_v41, %v2945_v16  ;;  %v2949_v23 = vsub.f32 %v5471_v29, %v2945_v16  ;;  %v2946_v47 = vmul.f32 0.0625, %v2944_v61 }
 0x804   : > { %v2951_v58 = vmul.f32 %v2947_v43, %v2947_v43  ;;  %v2953_v18 = vmul.f32 %v2949_v23, %v2949_v23  ;;  %v2950_v27 = vsub.f32 %v5479_v38, %v2946_v47  ;;  %v2948_v59 = vsub.f32 %v5474_v19, %v2946_v47  ;;  %v3026_v21 = vpop.permute.xlu1 %3025 }
 0x806   : > { %v2955_v52 = vadd.f32 %v2953_v18, %v2951_v58  ;;  %v2954_v49 = vmul.f32 %v2950_v27, %v2950_v27  ;;  %v2952_v5 = vmul.f32 %v2948_v59, %v2948_v59 }
 0x808   : > { %v2956_v53 = vrot.slane %v2955_v52, 4  ;;  %v2962_v25 = vadd.f32 %v2954_v49, %v2952_v5 }
 0x80a   : > { %v2957_v0 = vadd.f32 %v2956_v53, %v2955_v52  ;;  %v2963_v17 = vrot.slane %v2962_v25, 4 }
 0x80c   : > { %v2958_v1 = vrot.slane %v2957_v0, 2  ;;  %v2964_v35 = vadd.f32 %v2963_v17, %v2962_v25 }
 0x80e   : > { %v2959_v10 = vadd.f32 %v2958_v1, %v2957_v0  ;;  %v2965_v60 = vrot.slane %v2964_v35, 2 }
 0x810   : > { %v2960_v12 = vrot.slane %v2959_v10, 1  ;;  %v2966_v63 = vadd.f32 %v2965_v60, %v2964_v35 }
 0x812   : > { %v2961_v31 = vadd.f32 %v2960_v12, %v2959_v10  ;;  %v2967_v36 = vrot.slane %v2966_v63, 1 }
 0x814   : > { %v2969_v2 = vmul.f32 0.0625, %v2961_v31  ;;  %v2968_v6 = vadd.f32 %v2967_v36, %v2966_v63 }
 0x816   : > { %v2971_v46 = vadd.f32 1e-05, %v2969_v2  ;;  %v2970_v22 = vmul.f32 0.0625, %v2968_v6 }
 0x818   : > { %4008 = vrsqrt.f32 %v2971_v46  ;;  %v2972_v48 = vadd.f32 1e-05, %v2970_v22 }
 0x81a   : > { %4010 = vrsqrt.f32 %v2972_v48 }
 0x825   : > { %v4009_v8 = vpop.eup %4008 }
 0x826   : > { %v2977_v24 = vmul.f32 %v4009_v8, %v2949_v23  ;;  %v2975_v4 = vmul.f32 %v4009_v8, %v2947_v43 }
 0x827   : > { %v4011_v56 = vpop.eup %4010 }
 0x828   : > { %v2976_v55 = vmul.f32 %v4011_v56, %v2948_v59  ;;  %v2978_v15 = vmul.f32 %v4011_v56, %v2950_v27  ;;  %v2991_v45 = vmul.f32 %v2984_v54, %v2975_v4  ;;  %v2993_v9 = vmul.f32 %v2989_v11, %v2977_v24 }
 0x82a   : > { %v2992_v40 = vmul.f32 %v2984_v54, %v2976_v55  ;;  %v2994_v3 = vmul.f32 %v2989_v11, %v2978_v15  ;;  %v3007_v33 = vadd.f32 %v3000_v62, %v2991_v45  ;;  %v3009_v20 = vadd.f32 %v3005_v39, %v2993_v9 }
 0x82c   : > { %v3008_v13 = vadd.f32 %v3000_v62, %v2992_v40  ;;  %v3010_v51 = vadd.f32 %v3005_v39, %v2994_v3  ;;  %v3017_v14 = vpack.c.bf16 %v3009_v20, %v3007_v33 }
 0x82e   : > { %v3018_v26 = vpack.c.bf16 %v3010_v51, %v3008_v13 }
 0x830   : > { %3063 = vmatprep.subr.bf16.mxu0 %v3018_v26 }
 0x831   : > { %3064 = vmatpush1.bf16.msra.mxu0 %v3017_v14 }
 0x834   : > { %3597 = vmatmul.mubr.msk.bf16.vlgmr.msra.gmra.mxu0 %vm930_vm6, %v3015_v7 }
 0x835   : > { %3091 = vmatprep.mubr.bf16.mxu0 %v6062_v28  ;;  %v3031_v28 = vpop.permute.xlu0 %3030 }
 0x83c   : > { %3598 = vmatmul.mubr.msk.bf16.gmra.mxu0 %vm930_vm6, %v3016_v57 }
 0x8f4   : > { %v3083_v16 = vpop.f32.mrf.mxu0 }
 0x8f5   : > { %v5502_v61 = vadd.f32 %v3083_v16, %v3026_v21 }
 0x8f6   : > { %v3085_v43 = vpop.f32.mrf.mxu0 }
 0x8f7   : > { %v5504_v23 = vadd.f32 %v3085_v43, %v3026_v21  ;;  %v3102_v58 = vmul.f32 %v5502_v61, %v5502_v61 }
 0x8f8   : > { %v3087_v47 = vpop.f32.mrf.mxu0 }
 0x8f9   : > { %v3103_v18 = vmul.f32 %v5504_v23, %v5504_v23  ;;  %v5510_v27 = vadd.f32 %v3087_v47, %v3031_v28  ;;  %v3110_v25 = vmul.f32 %v3102_v58, %v5502_v61 }
 0x8fa   : > { %v3089_v59 = vpop.f32.mrf.mxu0 }
 0x8fb   : > { %v3111_v52 = vmul.f32 %v3103_v18, %v5504_v23  ;;  %v3104_v49 = vmul.f32 %v5510_v27, %v5510_v27  ;;  %v5515_v5 = vadd.f32 %v3089_v59, %v3031_v28  ;;  %v3118_v6 = vmul.f32 0.044715, %v3110_v25 }
 0x8fc   : > { %v3093_v53 = vpop.f32.mrf.mxu0 }
 0x8fd   : > { %v3119_v0 = vmul.f32 0.044715, %v3111_v52  ;;  %v3112_v17 = vmul.f32 %v3104_v49, %v5510_v27  ;;  %v3105_v1 = vmul.f32 %v5515_v5, %v5515_v5  ;;  %v5521_v35 = vadd.f32 %v3093_v53, %v3036_v30 }
 0x8fe   : > { %v3095_v10 = vpop.f32.mrf.mxu0  ;;  %v3126_v9 = vadd.f32 %v3118_v6, %v5502_v61 }
 0x8ff   : > { %v3120_v60 = vmul.f32 0.044715, %v3112_v17  ;;  %v3113_v12 = vmul.f32 %v3105_v1, %v5515_v5  ;;  %v3127_v63 = vadd.f32 %v3119_v0, %v5504_v23  ;;  %v3106_v31 = vmul.f32 %v5521_v35, %v5521_v35 }
 0x900   : > { %v5527_v36 = vadd.f32 %v3095_v10, %v3036_v30  ;;  %v3097_v2 = vpop.f32.mrf.mxu0  ;;  %v3134_v26 = vmul.f32 0.7978846, %v3126_v9 }
 0x901   : > { %v3121_v46 = vmul.f32 0.044715, %v3113_v12  ;;  %v3114_v22 = vmul.f32 %v3106_v31, %v5521_v35  ;;  %v3098_v11 = vadd.f32 %v3097_v2, %v3041_v44  ;;  %v3128_v8 = vadd.f32 %v3120_v60, %v5510_v27 }
 0x902   : > { %v3107_v48 = vmul.f32 %v5527_v36, %v5527_v36  ;;  %v3099_v54 = vpop.f32.mrf.mxu0  ;;  %v3135_v56 = vmul.f32 0.7978846, %v3127_v63 }
 0x903   : > { %v3129_v24 = vadd.f32 %v3121_v46, %v5515_v5  ;;  %v3100_v4 = vadd.f32 %v3099_v54, %v3041_v44  ;;  %v3122_v55 = vmul.f32 0.044715, %v3114_v22  ;;  %v3108_v45 = vmul.f32 %v3098_v11, %v3098_v11 }
 0x904   : > { %v3115_v15 = vmul.f32 %v3107_v48, %v5527_v36  ;;  %v3136_v20 = vmul.f32 0.7978846, %v3128_v8  ;;  %4012 = vtanh.f32 %v3135_v56 }
 0x905   : > { %v3137_v39 = vmul.f32 0.7978846, %v3129_v24  ;;  %v3109_v62 = vmul.f32 %v3100_v4, %v3100_v4  ;;  %v3130_v40 = vadd.f32 %v3122_v55, %v5521_v35  ;;  %v3116_v33 = vmul.f32 %v3108_v45, %v3098_v11 }
 0x906   : > { %v3123_v3 = vmul.f32 0.044715, %v3115_v15 }
 0x907   : > { %v3117_v13 = vmul.f32 %v3109_v62, %v3100_v4  ;;  %v3138_v51 = vmul.f32 0.7978846, %v3130_v40  ;;  %v3124_v32 = vmul.f32 0.044715, %v3116_v33  ;;  %4014 = vtanh.f32 %v3137_v39 }
 0x908   : > { %v3131_v42 = vadd.f32 %v3123_v3, %v5527_v36  ;;  %v3191_v3 = vpop.permute.xlu1 %3190 }
 0x909   : > { %v3125_v14 = vmul.f32 0.044715, %v3117_v13  ;;  %4016 = vtanh.f32 %v3138_v51  ;;  %v3132_v37 = vadd.f32 %v3124_v32, %v3098_v11 }
 0x90a   : > { %v3139_v7 = vmul.f32 0.7978846, %v3131_v42  ;;  %4018 = vtanh.f32 %v3136_v20 }
 0x90b   : > { %v3133_v34 = vadd.f32 %v3125_v14, %v3100_v4  ;;  %v3140_v57 = vmul.f32 0.7978846, %v3132_v37 }
 0x90c   : > { %4020 = vtanh.f32 %v3139_v7 }
 0x90d   : > { %4022 = vtanh.f32 %v3134_v26  ;;  %v3141_v30 = vmul.f32 0.7978846, %v3133_v34 }
 0x90e   : > { %4024 = vtanh.f32 %v3140_v57 }
 0x90f   : > { %4026 = vtanh.f32 %v3141_v30 }
 0x911   : > { %v4013_v44 = vpop.eup %4012 }
 0x912   : > { %v3151_v49 = vadd.f32 1.0, %v4013_v44 }
 0x914   : > { %v4015_v21 = vpop.eup %4014  ;;  %v3159_v2 = vmul.f32 0.5, %v3151_v49 }
 0x915   : > { %v3153_v47 = vadd.f32 1.0, %v4015_v21 }
 0x916   : > { %v4017_v16 = vpop.eup %4016  ;;  %v3167_v55 = vmul.f32 %v3159_v2, %v5504_v23 }
 0x917   : > { %v4019_v43 = vpop.eup %4018  ;;  %v3154_v18 = vadd.f32 1.0, %v4017_v16  ;;  %v3161_v10 = vmul.f32 0.5, %v3153_v47  ;;  %v3417_v16 = vld [vmem:[%s5601_s18] sm:$0x7] }
 0x918   : > { %v3152_v25 = vadd.f32 1.0, %v4019_v43 }
 0x919   : > { %v4021_v28 = vpop.eup %4020  ;;  %v3162_v12 = vmul.f32 0.5, %v3154_v18  ;;  %v3169_v54 = vmul.f32 %v3161_v10, %v5515_v5  ;;  %v3175_v5 = vld [vmem:[%s5596_s13 + $0x8] sm:$0xff] }
 0x91a   : > { %v4023_v58 = vpop.eup %4022  ;;  %v3155_v59 = vadd.f32 1.0, %v4021_v28  ;;  %v3160_v6 = vmul.f32 0.5, %v3152_v25 }
 0x91b   : > { %v4025_v52 = vpop.eup %4024  ;;  %v3150_v60 = vadd.f32 1.0, %v4023_v58  ;;  %v3170_v24 = vmul.f32 %v3162_v12, %v5521_v35  ;;  %v3178_v9 = vpack.c.bf16 %v3169_v54, %v3167_v55 }
 0x91c   : > { %v4027_v53 = vpop.eup %4026  ;;  %v3156_v0 = vadd.f32 1.0, %v4025_v52  ;;  %v3163_v1 = vmul.f32 0.5, %v3155_v59  ;;  %v3168_v15 = vmul.f32 %v3160_v6, %v5510_v27  ;;  %v3186_v27 = vpop.permute.xlu0 %3185 }
 0x91d   : > { %v3157_v17 = vadd.f32 1.0, %v4027_v53  ;;  %v3158_v8 = vmul.f32 0.5, %v3150_v60 }
 0x91e   : > { %v3164_v63 = vmul.f32 0.5, %v3156_v0  ;;  %v3171_v22 = vmul.f32 %v3163_v1, %v5527_v36  ;;  %v3174_v36 = vld [vmem:[%s5596_s13] sm:$0xff] }
 0x91f   : > { %v3165_v31 = vmul.f32 0.5, %v3157_v17  ;;  %v3166_v39 = vmul.f32 %v3158_v8, %v5502_v61  ;;  %v3176_v23 = vpack.c.bf16 %v3175_v5, %v3174_v36 }
 0x920   : > { %v3172_v46 = vmul.f32 %v3164_v63, %v3098_v11 }
 0x921   : > { %v3173_v48 = vmul.f32 %v3165_v31, %v3100_v4  ;;  %v3177_v35 = vpack.c.bf16 %v3168_v15, %v3166_v39 }
 0x922   : > { %v3179_v45 = vpack.c.bf16 %v3172_v46, %v3170_v24 }
 0x923   : > { %v3180_v56 = vpack.c.bf16 %v3173_v48, %v3171_v22 }
 0x925   : > { %3209 = vmatprep.subr.bf16.mxu1 %v3180_v56 }
 0x926   : > { %3210 = vmatpush1.bf16.msra.mxu1 %v3179_v45 }
 0x927   : > { %3211 = vmatprep.subr.bf16.mxu1 %v3178_v9 }
 0x92a   : > { %3212 = vmatpush1.bf16.msra.mxu1 %v3177_v35 }
 0x92d   : > { %3599 = vmatmul.mubr.msk.bf16.vlgmr.msra.gmra.mxu1 %vm3193_vm9, %v3176_v23 }
 0x92e   : > { %3322 = vmatprep.mubr.f32.mxu1 %v6061_v50 }
 0x9ed   : > { %v3231_v11 = vpop.f32.mrf.mxu1 }
 0x9ee   : > { %v3232_v61 = vadd.f32 %v3231_v11, %v3186_v27 }
 0x9ef   : > { %v3233_v4 = vpop.f32.mrf.mxu1 }
 0x9f0   : > { %v3240_v62 = vadd.f32 %v3232_v61, %v5468_v41  ;;  %v3234_v40 = vadd.f32 %v3233_v4, %v3186_v27  ;;  %v3248_v41 = vld [vmem:[%s5598_s15] sm:$0x7] }
 0x9f1   : > { %v3235_v33 = vpop.f32.mrf.mxu1 }
 0x9f2   : > { %3244 = vst [vmem:[%s679_s5] sm:$0xff] %v3240_v62  ;;  %v3241_v20 = vadd.f32 %v3234_v40, %v5474_v19  ;;  %v3236_v13 = vadd.f32 %v3235_v33, %v3191_v3 }
 0x9f3   : > { %v3237_v51 = vpop.f32.mrf.mxu1 }
 0x9f4   : > { %3245 = vst [vmem:[%s679_s5 + $0x8] sm:$0xff] %v3241_v20  ;;  %v3242_v42 = vadd.f32 %v3236_v13, %v5471_v29  ;;  %v3238_v32 = vadd.f32 %v3237_v51, %v3191_v3  ;;  %v3334_v29 = vld [vmem:[%s5600_s17] sm:$0x7] }
 0x9f6   : > { %3246 = vst [vmem:[%s679_s5 + $0x10] sm:$0xff] %v3242_v42  ;;  %v3243_v26 = vadd.f32 %v3238_v32, %v5479_v38  ;;  %v3253_v38 = vpop.permute.xlu0 %3252 }
 0x9f8   : > { %3247 = vst [vmem:[%s679_s5 + $0x18] sm:$0xff] %v3243_v26  ;;  %3286 = vmatprep.subr.mxu1 %v3243_v26 }
 0x9f9   : > { %3287 = vmatpush1.msra.mxu1 %v3242_v42 }
 0x9fa   : > { %3288 = vmatprep.subr.mxu1 %v3241_v20 }
 0x9fb   : > { %3289 = vmatpush1.msra.mxu1 %v3240_v62 }
 0x9fc   : > { %3600 = vmatmul.mubr.msk.f32.vlgmr.msra.gmra.mxu1 %vm930_vm6, %v3248_v41  ;;  %3366 = vmatprep.subr.mxu1 %v3243_v26 }
 0x9fd   : > { %3367 = vmatpush1.msra.mxu1 %v3242_v42  ;;  %3402 = vmatprep.mubr.f32.mxu1 %v6061_v50 }
 0x9fe   : > { %3368 = vmatprep.subr.mxu1 %v3241_v20 }
 0x9ff   : > { %3369 = vmatpush1.msra.mxu1 %v3240_v62 }
 0xa00   : > { %3601 = vmatmul.mubr.msk.f32.vlgmr.msra.gmra.mxu1 %vm930_vm6, %v3334_v29 }
 0xabc   : > { %v3324_v19 = vpop.f32.mrf.mxu1 }
 0xabd   : > { %v3325_v7 = vadd.f32 %v3324_v19, %v3253_v38 }
 0xabe   : > { %v3326_v14 = vpop.f32.mrf.mxu1 }
 0xabf   : > { %v3327_v37 = vadd.f32 %v3326_v14, %v3253_v38 }
 0xac0   : > { %v3404_v50 = vpop.f32.mrf.mxu1 }
 0xac1   : > { %v3331_v34 = vcombine.low %v3325_v7, %v3327_v37  ;;  %v3410_v30 = vsel %vm3409_vm10, %v3404_v50, 0.0 }
 0xac2   : > { %v3406_v57 = vpop.f32.mrf.mxu1 }
 0xac3   : > { %3333 = vst [vmem:[%s670_s3] sm:$0x77] %v3331_v34  ;;  %v3411_v44 = vsel %vm3409_vm10, %v3406_v57, 0.0 }
 0xac4   : > { %v3412_v21 = vadd.f32 %v3411_v44, %v3410_v30 }
 0xac6   : > { %3413 = vadd.xlane.f32.xlu1 %v3412_v21 }
 0xb4f   : > { %v3414_v43 = vpop.xlane.xlu1 %3413 }
 0xb50   : > { %v3416_v28 = vmul.f32 0.00390625, %v3414_v43 }
 0xb52   : > { %v3418_v47 = vadd.f32 %v3417_v16, %v3416_v28 }
 0xb54   : > { %3420 = vst.msk [vmem:[%s674_s24] sm:$0x7] %vm3419_vm11, %v3418_v47 }
 0xb55 PF: > { %s32_s2 = sadd.s32 1, %s4034_s2  }
 0xb56   : > { %p29_p4 = scmp.ge.s32.totalorder %s32_s2, 4  }
 0xb58   :  { %31 = sbr.rel (!%p29_p4) target bundleno = 7 (0x7), region = 150 }

</bundles_post_ra>
